<compile_context>
chip_gen: v5e
topology: v5e:2x2
jax: 0.10.0
libtpu: 0.0.40
codegen_flags: <defaults>
</compile_context>

<pallas_src>
import jax
import jax.numpy as jnp
from jax import lax
from jax.experimental import pallas as pl
from jax.experimental.pallas import tpu as pltpu


# ----------------------------- kernel helpers -------------------------------

def _conv0_pool_relu(xp_ref, w_ref, b_ref, pool):
    """Fused Conv1d (BN scale folded into W) -> MaxPool(pool) -> +shift -> ReLU.

    xp_ref block: (1, pool, Lp, K) grouped im2col patches; xp_ref[0, j, r, :]
    is the conv window of output position r*pool + j.  Returns (Lp, Cout).
    Uses max_j relu(z_j + b) == relu(max_j z_j + b)  (monotone relu / shift).
    """
    z = jnp.dot(xp_ref[0, 0], w_ref[...], preferred_element_type=jnp.float32)
    for j in range(1, pool):
        z = jnp.maximum(
            z, jnp.dot(xp_ref[0, j], w_ref[...],
                       preferred_element_type=jnp.float32))
    return jnp.maximum(z + b_ref[...], 0.0)


def _conv_s1_relu(h, w_ref, b_ref, k, l_out):
    """Stride-1 Conv1d as k shifted matmuls: relu(sum_j h[j:j+Lout] @ W[j] + b).

    h: (Lin, Cin) value, w_ref: (k, Cin, Cout) ref, b_ref: (1, Cout) ref.
    """
    acc = jnp.dot(h[0:l_out, :], w_ref[0], preferred_element_type=jnp.float32)
    for j in range(1, k):
        acc = acc + jnp.dot(h[j:j + l_out, :], w_ref[j],
                            preferred_element_type=jnp.float32)
    return jnp.maximum(acc + b_ref[...], 0.0)


def _maxpool_rows(scr_ref, h, k, l_out):
    """MaxPool1d(kernel=k, stride=k) over the row axis of h via strided reads
    from a VMEM scratch (rows j, j+k, ... for each window offset j)."""
    scr_ref[...] = h
    m = scr_ref[pl.ds(0, l_out, stride=k), :]
    for j in range(1, k):
        m = jnp.maximum(m, scr_ref[pl.ds(j, l_out, stride=k), :])
    return m


def _build_fused_kernel(*, p1_pool, p1_k, p1_l2, p1_l3, p1_l4, p1_pool_end,
                        p1_lout, p2_pool, p2_k, p2_l2, p2_l3, p2_pad, p2_l4,
                        p2_pool_end, p2_lout):
    def kernel(xp1_ref, w1a_ref, b1a_ref, w1b_ref, b1b_ref, w1c_ref, b1c_ref,
               w1d_ref, b1d_ref,
               xp2_ref, w2a_ref, b2a_ref, w2b_ref, b2b_ref, w2c_ref, b2c_ref,
               w2d_ref, b2d_ref,
               o1_ref, o2_ref,
               p1_scr, p2_scr, pad_scr):
        # ------------------------------ path 1 ------------------------------
        h = _conv0_pool_relu(xp1_ref, w1a_ref, b1a_ref, p1_pool)     # (61, 64)
        h = _conv_s1_relu(h, w1b_ref, b1b_ref, p1_k, p1_l2)          # (54,128)
        h = _conv_s1_relu(h, w1c_ref, b1c_ref, p1_k, p1_l3)          # (47,128)
        h = _conv_s1_relu(h, w1d_ref, b1d_ref, p1_k, p1_l4)          # (40,128)
        o1_ref[0] = _maxpool_rows(p1_scr, h, p1_pool_end, p1_lout)   # (10,128)

        # ------------------------------ path 2 ------------------------------
        g = _conv0_pool_relu(xp2_ref, w2a_ref, b2a_ref, p2_pool)     # (13, 64)
        g = _conv_s1_relu(g, w2b_ref, b2b_ref, p2_k, p2_l2)          # ( 8,128)
        g = _conv_s1_relu(g, w2c_ref, b2c_ref, p2_k, p2_l3)          # ( 3,128)
        # Zero-pad the length axis by p2_pad on each side via VMEM scratch
        # (torch Conv1d(padding=2) pads the previous ReLU output).
        pad_scr[...] = jnp.zeros(pad_scr.shape, jnp.float32)
        pad_scr[p2_pad:p2_pad + p2_l3, :] = g
        g = _conv_s1_relu(pad_scr[...], w2d_ref, b2d_ref, p2_k, p2_l4)  # (2,128)
        o2_ref[0] = _maxpool_rows(p2_scr, g, p2_pool_end, p2_lout)   # ( 1,128)

    return kernel


# ------------------------------ XLA-level glue -------------------------------

def _fold_bn(w, b, gamma, beta, mean, var, eps=1e-5):
    """Fold Conv1d bias + eval-mode BatchNorm into scaled weights and a shift.

    w: (Cout, Cin, K) torch layout -> (K, Cin, Cout) f32, shift (1, Cout) f32.
    """
    inv = gamma * lax.rsqrt(var + eps)
    wm = jnp.transpose(w, (2, 1, 0)) * inv[None, None, :]
    shift = (beta + (b - mean) * inv).reshape(1, -1)
    return wm.astype(jnp.float32), shift.astype(jnp.float32)


def _grouped_patches(xs, k, stride, pool):
    """(B, L) single-channel signal -> (B, pool, Lp, k) conv im2col patches
    grouped by MaxPool window: patches[b, j, r, :] is the conv input window of
    output position r*pool + j (conv positions beyond Lp*pool are dropped,
    matching torch MaxPool1d floor behaviour)."""
    _, length = xs.shape
    l_conv = (length - k) // stride + 1
    l_pool = l_conv // pool
    j = jnp.arange(pool)[:, None, None]
    r = jnp.arange(l_pool)[None, :, None]
    t = jnp.arange(k)[None, None, :]
    idx = (r * pool + j) * stride + t
    return xs[:, idx], l_pool


def deepsleepnet_feature(x, params):
    """x: (B, 1, L) (PyTorch NCW).  Returns (B, 1408) for L = 3000."""
    # TODO(synk): Dropout layers are identity here (inference semantics);
    # stochastic train-mode dropout is not implemented.
    B, _, L = x.shape
    xs = x[:, 0, :].astype(jnp.float32)

    p1 = params["path1"]
    p2 = params["path2"]

    # ---- static shape bookkeeping ----
    k1a, s1a, pool1a = 50, 6, 8
    k1b, pool1b = 8, 4
    xp1, l1p = _grouped_patches(xs, k1a, s1a, pool1a)        # (B, 8, 61, 50)
    l1_2 = l1p - k1b + 1
    l1_3 = l1_2 - k1b + 1
    l1_4 = l1_3 - k1b + 1
    l1_out = l1_4 // pool1b

    k2a, s2a, pool2a = 400, 50, 4
    k2b, pad2, pool2b = 6, 2, 2
    xp2, l2p = _grouped_patches(xs, k2a, s2a, pool2a)        # (B, 4, 13, 400)
    l2_2 = l2p - k2b + 1
    l2_3 = l2_2 - k2b + 1
    l2_3p = l2_3 + 2 * pad2
    l2_4 = l2_3p - k2b + 1
    l2_out = l2_4 // pool2b

    # ---- fold eval-mode BN into weights / per-channel shifts ----
    w1a, b1a = _fold_bn(*p1[0]); w1a = w1a.reshape(k1a, -1)   # Cin == 1
    w1b, b1b = _fold_bn(*p1[1])
    w1c, b1c = _fold_bn(*p1[2])
    w1d, b1d = _fold_bn(*p1[3])
    w2a, b2a = _fold_bn(*p2[0]); w2a = w2a.reshape(k2a, -1)
    w2b, b2b = _fold_bn(*p2[1])
    w2c, b2c = _fold_bn(*p2[2])
    w2d, b2d = _fold_bn(*p2[3])
    c1 = w1d.shape[-1]
    c2 = w2d.shape[-1]

    kernel = _build_fused_kernel(
        p1_pool=pool1a, p1_k=k1b, p1_l2=l1_2, p1_l3=l1_3, p1_l4=l1_4,
        p1_pool_end=pool1b, p1_lout=l1_out,
        p2_pool=pool2a, p2_k=k2b, p2_l2=l2_2, p2_l3=l2_3, p2_pad=pad2,
        p2_l4=l2_4, p2_pool_end=pool2b, p2_lout=l2_out)

    def full_spec(a):
        zeros = (0,) * a.ndim
        return pl.BlockSpec(a.shape, lambda b, _z=zeros: _z)

    in_specs = [
        pl.BlockSpec((1,) + xp1.shape[1:], lambda b: (b, 0, 0, 0)),
        full_spec(w1a), full_spec(b1a), full_spec(w1b), full_spec(b1b),
        full_spec(w1c), full_spec(b1c), full_spec(w1d), full_spec(b1d),
        pl.BlockSpec((1,) + xp2.shape[1:], lambda b: (b, 0, 0, 0)),
        full_spec(w2a), full_spec(b2a), full_spec(w2b), full_spec(b2b),
        full_spec(w2c), full_spec(b2c), full_spec(w2d), full_spec(b2d),
    ]
    out_specs = [
        pl.BlockSpec((1, l1_out, c1), lambda b: (b, 0, 0)),
        pl.BlockSpec((1, l2_out, c2), lambda b: (b, 0, 0)),
    ]

    o1, o2 = pl.pallas_call(
        kernel,
        out_shape=[jax.ShapeDtypeStruct((B, l1_out, c1), jnp.float32),
                   jax.ShapeDtypeStruct((B, l2_out, c2), jnp.float32)],
        grid=(B,),
        in_specs=in_specs,
        out_specs=out_specs,
        scratch_shapes=[pltpu.VMEM((l1_4, c1), jnp.float32),
                        pltpu.VMEM((l2_4, c2), jnp.float32),
                        pltpu.VMEM((l2_3p, c2), jnp.float32)],
        compiler_params=pltpu.CompilerParams(
            dimension_semantics=("parallel",),
            vmem_limit_bytes=32 * 1024 * 1024),
    )(xp1, w1a, b1a, w1b, b1b, w1c, b1c, w1d, b1d,
      xp2, w2a, b2a, w2b, b2b, w2c, b2c, w2d, b2d)

    # torch Flatten of (B, C, L) is channel-major.
    out1 = jnp.transpose(o1, (0, 2, 1)).reshape(B, -1)
    out2 = jnp.transpose(o2, (0, 2, 1)).reshape(B, -1)
    return jnp.concatenate([out1, out2], axis=1)


# ------------------------- deterministic param init -------------------------

def init_params(key):
    def conv(k, cout, cin, ksz):
        k1, k2 = jax.random.split(k)
        bound = 1.0 / jnp.sqrt(cin * ksz)
        w = jax.random.uniform(k1, (cout, cin, ksz), jnp.float32, -bound, bound)
        b = jax.random.uniform(k2, (cout,), jnp.float32, -bound, bound)
        return w, b

    def bn(k, c):
        k1, k2, k3, k4 = jax.random.split(k, 4)
        gamma = (1.0 + 0.1 * jax.random.normal(k1, (c,))).astype(jnp.float32)
        beta = (0.1 * jax.random.normal(k2, (c,))).astype(jnp.float32)
        mean = (0.1 * jax.random.normal(k3, (c,))).astype(jnp.float32)
        var = jax.random.uniform(k4, (c,), jnp.float32, 0.5, 1.5)
        return gamma, beta, mean, var

    def layer(k, cout, cin, ksz):
        kc, kb = jax.random.split(k)
        w, b = conv(kc, cout, cin, ksz)
        g, be, m, v = bn(kb, cout)
        return (w, b, g, be, m, v)

    keys = jax.random.split(key, 8)
    path1 = [
        layer(keys[0], 64, 1, 50),
        layer(keys[1], 128, 64, 8),
        layer(keys[2], 128, 128, 8),
        layer(keys[3], 128, 128, 8),
    ]
    path2 = [
        layer(keys[4], 64, 1, 400),
        layer(keys[5], 128, 64, 6),
        layer(keys[6], 128, 128, 6),
        layer(keys[7], 128, 128, 6),
    ]
    return {"path1": path1, "path2": path2}


# ----------------------------- pure-JAX reference ----------------------------

def _ref_conv_bn_relu(x, w, b, gamma, beta, mean, var, *, stride, padding=0,
                      eps=1e-5):
    y = lax.conv_general_dilated(
        x, w, window_strides=(stride,), padding=[(padding, padding)],
        dimension_numbers=("NCH", "OIH", "NCH"))
    y = y + b[None, :, None]
    y = (y - mean[None, :, None]) * (gamma / jnp.sqrt(var + eps))[None, :, None]
    y = y + beta[None, :, None]
    return jnp.maximum(y, 0.0)


def _ref_maxpool(x, k):
    B, C, L = x.shape
    Lout = L // k
    return jnp.max(x[:, :, :Lout * k].reshape(B, C, Lout, k), axis=-1)


def reference_forward(x, params):
    p1 = params["path1"]
    h = _ref_conv_bn_relu(x, *p1[0], stride=6)
    h = _ref_maxpool(h, 8)
    h = _ref_conv_bn_relu(h, *p1[1], stride=1)
    h = _ref_conv_bn_relu(h, *p1[2], stride=1)
    h = _ref_conv_bn_relu(h, *p1[3], stride=1)
    h = _ref_maxpool(h, 4)
    out1 = h.reshape(h.shape[0], -1)

    p2 = params["path2"]
    g = _ref_conv_bn_relu(x, *p2[0], stride=50)
    g = _ref_maxpool(g, 4)
    g = _ref_conv_bn_relu(g, *p2[1], stride=1)
    g = _ref_conv_bn_relu(g, *p2[2], stride=1)
    g = _ref_conv_bn_relu(g, *p2[3], stride=1, padding=2)
    g = _ref_maxpool(g, 2)
    out2 = g.reshape(g.shape[0], -1)
    return jnp.concatenate([out1, out2], axis=1)


# ----------------------------------- main ------------------------------------

if __name__ == "__main__":
    key = jax.random.PRNGKey(0)
    kx, kp = jax.random.split(key)

    # Smallest usable signal length: path2's Conv1d(k=400, s=50) plus three
    # k=6 convs and pools force L >= 2950; use the canonical DeepSleepNet
    # epoch length L = 3000.
    B, L = 2, 3000
    x = jax.random.normal(kx, (B, 1, L), dtype=jnp.float32)
    params = init_params(kp)

    out = jax.jit(deepsleepnet_feature)(x, params)
    out = jax.block_until_ready(out)
    assert out.shape == (B, 1408), out.shape

    ref = reference_forward(x, params)
    assert jnp.allclose(out, ref, rtol=1e-3, atol=1e-3), float(
        jnp.max(jnp.abs(out - ref)))

    print("KERNEL_OK")
</pallas_src>

<mosaic_0001>
module attributes {stable_mosaic.version = 11 : i64} {
  func.func @kernel(%arg0: i32, %arg1: memref<1x8x61x50xf32, #tpu.memory_space<vmem>>, %arg2: memref<50x64xf32, #tpu.memory_space<vmem>>, %arg3: memref<1x64xf32, #tpu.memory_space<vmem>>, %arg4: memref<8x64x128xf32, #tpu.memory_space<vmem>>, %arg5: memref<1x128xf32, #tpu.memory_space<vmem>>, %arg6: memref<8x128x128xf32, #tpu.memory_space<vmem>>, %arg7: memref<1x128xf32, #tpu.memory_space<vmem>>, %arg8: memref<8x128x128xf32, #tpu.memory_space<vmem>>, %arg9: memref<1x128xf32, #tpu.memory_space<vmem>>, %arg10: memref<1x4x13x400xf32, #tpu.memory_space<vmem>>, %arg11: memref<400x64xf32, #tpu.memory_space<vmem>>, %arg12: memref<1x64xf32, #tpu.memory_space<vmem>>, %arg13: memref<6x64x128xf32, #tpu.memory_space<vmem>>, %arg14: memref<1x128xf32, #tpu.memory_space<vmem>>, %arg15: memref<6x128x128xf32, #tpu.memory_space<vmem>>, %arg16: memref<1x128xf32, #tpu.memory_space<vmem>>, %arg17: memref<6x128x128xf32, #tpu.memory_space<vmem>>, %arg18: memref<1x128xf32, #tpu.memory_space<vmem>>, %arg19: memref<1x10x128xf32, #tpu.memory_space<vmem>>, %arg20: memref<1x1x128xf32, #tpu.memory_space<vmem>>, %arg21: memref<40x128xf32, #tpu.memory_space<vmem>>, %arg22: memref<2x128xf32, #tpu.memory_space<vmem>>, %arg23: memref<7x128xf32, #tpu.memory_space<vmem>>) attributes {dimension_semantics = [#tpu.dimension_semantics<parallel>], iteration_bounds = array<i64: 2>, scalar_prefetch = 0 : i64, scratch_operands = 3 : i64, tpu.core_type = #tpu.core_type<tc>, window_params = [{transform_indices = @transform_0, window_bounds = array<i64: 1, 8, 61, 50>}, {pipeline_mode = #tpu.pipeline_mode<synchronous>, transform_indices = @transform_1, window_bounds = array<i64: 50, 64>}, {pipeline_mode = #tpu.pipeline_mode<synchronous>, transform_indices = @transform_2, window_bounds = array<i64: 1, 64>}, {pipeline_mode = #tpu.pipeline_mode<synchronous>, transform_indices = @transform_3, window_bounds = array<i64: 8, 64, 128>}, {pipeline_mode = #tpu.pipeline_mode<synchronous>, transform_indices = @transform_4, window_bounds = array<i64: 1, 128>}, {pipeline_mode = #tpu.pipeline_mode<synchronous>, transform_indices = @transform_5, window_bounds = array<i64: 8, 128, 128>}, {pipeline_mode = #tpu.pipeline_mode<synchronous>, transform_indices = @transform_6, window_bounds = array<i64: 1, 128>}, {pipeline_mode = #tpu.pipeline_mode<synchronous>, transform_indices = @transform_7, window_bounds = array<i64: 8, 128, 128>}, {pipeline_mode = #tpu.pipeline_mode<synchronous>, transform_indices = @transform_8, window_bounds = array<i64: 1, 128>}, {transform_indices = @transform_9, window_bounds = array<i64: 1, 4, 13, 400>}, {pipeline_mode = #tpu.pipeline_mode<synchronous>, transform_indices = @transform_10, window_bounds = array<i64: 400, 64>}, {pipeline_mode = #tpu.pipeline_mode<synchronous>, transform_indices = @transform_11, window_bounds = array<i64: 1, 64>}, {pipeline_mode = #tpu.pipeline_mode<synchronous>, transform_indices = @transform_12, window_bounds = array<i64: 6, 64, 128>}, {pipeline_mode = #tpu.pipeline_mode<synchronous>, transform_indices = @transform_13, window_bounds = array<i64: 1, 128>}, {pipeline_mode = #tpu.pipeline_mode<synchronous>, transform_indices = @transform_14, window_bounds = array<i64: 6, 128, 128>}, {pipeline_mode = #tpu.pipeline_mode<synchronous>, transform_indices = @transform_15, window_bounds = array<i64: 1, 128>}, {pipeline_mode = #tpu.pipeline_mode<synchronous>, transform_indices = @transform_16, window_bounds = array<i64: 6, 128, 128>}, {pipeline_mode = #tpu.pipeline_mode<synchronous>, transform_indices = @transform_17, window_bounds = array<i64: 1, 128>}, {transform_indices = @transform_18, window_bounds = array<i64: 1, 10, 128>}, {transform_indices = @transform_19, window_bounds = array<i64: 1, 1, 128>}]} {
    %c0 = arith.constant 0 : index
    %c0_0 = arith.constant 0 : index
    %c0_1 = arith.constant 0 : index
    %c0_2 = arith.constant 0 : index
    %0 = vector.load %arg1[%c0, %c0_0, %c0_1, %c0_2] : memref<1x8x61x50xf32, #tpu.memory_space<vmem>>, vector<1x1x61x50xf32>
    %1 = vector.shape_cast %0 : vector<1x1x61x50xf32> to vector<61x50xf32>
    %c0_3 = arith.constant 0 : index
    %c0_4 = arith.constant 0 : index
    %2 = vector.load %arg2[%c0_3, %c0_4] : memref<50x64xf32, #tpu.memory_space<vmem>>, vector<50x64xf32>
    %cst = arith.constant dense<0.000000e+00> : vector<61x64xf32>
    %3 = tpu.matmul %1, %2, %cst {dimension_numbers = #tpu.dot_dimension_numbers<[1], [0], [0], [1], [0, 0, 1, 1], [], []>} : vector<61x50xf32>, vector<50x64xf32>, vector<61x64xf32> -> vector<61x64xf32>
    %c0_5 = arith.constant 0 : index
    %c1 = arith.constant 1 : index
    %c0_6 = arith.constant 0 : index
    %c0_7 = arith.constant 0 : index
    %4 = vector.load %arg1[%c0_5, %c1, %c0_6, %c0_7] : memref<1x8x61x50xf32, #tpu.memory_space<vmem>>, vector<1x1x61x50xf32>
    %5 = vector.shape_cast %4 : vector<1x1x61x50xf32> to vector<61x50xf32>
    %c0_8 = arith.constant 0 : index
    %c0_9 = arith.constant 0 : index
    %6 = vector.load %arg2[%c0_8, %c0_9] : memref<50x64xf32, #tpu.memory_space<vmem>>, vector<50x64xf32>
    %cst_10 = arith.constant dense<0.000000e+00> : vector<61x64xf32>
    %7 = tpu.matmul %5, %6, %cst_10 {dimension_numbers = #tpu.dot_dimension_numbers<[1], [0], [0], [1], [0, 0, 1, 1], [], []>} : vector<61x50xf32>, vector<50x64xf32>, vector<61x64xf32> -> vector<61x64xf32>
    %8 = arith.maximumf %3, %7 : vector<61x64xf32>
    %c0_11 = arith.constant 0 : index
    %c2 = arith.constant 2 : index
    %c0_12 = arith.constant 0 : index
    %c0_13 = arith.constant 0 : index
    %9 = vector.load %arg1[%c0_11, %c2, %c0_12, %c0_13] : memref<1x8x61x50xf32, #tpu.memory_space<vmem>>, vector<1x1x61x50xf32>
    %10 = vector.shape_cast %9 : vector<1x1x61x50xf32> to vector<61x50xf32>
    %c0_14 = arith.constant 0 : index
    %c0_15 = arith.constant 0 : index
    %11 = vector.load %arg2[%c0_14, %c0_15] : memref<50x64xf32, #tpu.memory_space<vmem>>, vector<50x64xf32>
    %cst_16 = arith.constant dense<0.000000e+00> : vector<61x64xf32>
    %12 = tpu.matmul %10, %11, %cst_16 {dimension_numbers = #tpu.dot_dimension_numbers<[1], [0], [0], [1], [0, 0, 1, 1], [], []>} : vector<61x50xf32>, vector<50x64xf32>, vector<61x64xf32> -> vector<61x64xf32>
    %13 = arith.maximumf %8, %12 : vector<61x64xf32>
    %c0_17 = arith.constant 0 : index
    %c3 = arith.constant 3 : index
    %c0_18 = arith.constant 0 : index
    %c0_19 = arith.constant 0 : index
    %14 = vector.load %arg1[%c0_17, %c3, %c0_18, %c0_19] : memref<1x8x61x50xf32, #tpu.memory_space<vmem>>, vector<1x1x61x50xf32>
    %15 = vector.shape_cast %14 : vector<1x1x61x50xf32> to vector<61x50xf32>
    %c0_20 = arith.constant 0 : index
    %c0_21 = arith.constant 0 : index
    %16 = vector.load %arg2[%c0_20, %c0_21] : memref<50x64xf32, #tpu.memory_space<vmem>>, vector<50x64xf32>
    %cst_22 = arith.constant dense<0.000000e+00> : vector<61x64xf32>
    %17 = tpu.matmul %15, %16, %cst_22 {dimension_numbers = #tpu.dot_dimension_numbers<[1], [0], [0], [1], [0, 0, 1, 1], [], []>} : vector<61x50xf32>, vector<50x64xf32>, vector<61x64xf32> -> vector<61x64xf32>
    %18 = arith.maximumf %13, %17 : vector<61x64xf32>
    %c0_23 = arith.constant 0 : index
    %c4 = arith.constant 4 : index
    %c0_24 = arith.constant 0 : index
    %c0_25 = arith.constant 0 : index
    %19 = vector.load %arg1[%c0_23, %c4, %c0_24, %c0_25] : memref<1x8x61x50xf32, #tpu.memory_space<vmem>>, vector<1x1x61x50xf32>
    %20 = vector.shape_cast %19 : vector<1x1x61x50xf32> to vector<61x50xf32>
    %c0_26 = arith.constant 0 : index
    %c0_27 = arith.constant 0 : index
    %21 = vector.load %arg2[%c0_26, %c0_27] : memref<50x64xf32, #tpu.memory_space<vmem>>, vector<50x64xf32>
    %cst_28 = arith.constant dense<0.000000e+00> : vector<61x64xf32>
    %22 = tpu.matmul %20, %21, %cst_28 {dimension_numbers = #tpu.dot_dimension_numbers<[1], [0], [0], [1], [0, 0, 1, 1], [], []>} : vector<61x50xf32>, vector<50x64xf32>, vector<61x64xf32> -> vector<61x64xf32>
    %23 = arith.maximumf %18, %22 : vector<61x64xf32>
    %c0_29 = arith.constant 0 : index
    %c5 = arith.constant 5 : index
    %c0_30 = arith.constant 0 : index
    %c0_31 = arith.constant 0 : index
    %24 = vector.load %arg1[%c0_29, %c5, %c0_30, %c0_31] : memref<1x8x61x50xf32, #tpu.memory_space<vmem>>, vector<1x1x61x50xf32>
    %25 = vector.shape_cast %24 : vector<1x1x61x50xf32> to vector<61x50xf32>
    %c0_32 = arith.constant 0 : index
    %c0_33 = arith.constant 0 : index
    %26 = vector.load %arg2[%c0_32, %c0_33] : memref<50x64xf32, #tpu.memory_space<vmem>>, vector<50x64xf32>
    %cst_34 = arith.constant dense<0.000000e+00> : vector<61x64xf32>
    %27 = tpu.matmul %25, %26, %cst_34 {dimension_numbers = #tpu.dot_dimension_numbers<[1], [0], [0], [1], [0, 0, 1, 1], [], []>} : vector<61x50xf32>, vector<50x64xf32>, vector<61x64xf32> -> vector<61x64xf32>
    %28 = arith.maximumf %23, %27 : vector<61x64xf32>
    %c0_35 = arith.constant 0 : index
    %c6 = arith.constant 6 : index
    %c0_36 = arith.constant 0 : index
    %c0_37 = arith.constant 0 : index
    %29 = vector.load %arg1[%c0_35, %c6, %c0_36, %c0_37] : memref<1x8x61x50xf32, #tpu.memory_space<vmem>>, vector<1x1x61x50xf32>
    %30 = vector.shape_cast %29 : vector<1x1x61x50xf32> to vector<61x50xf32>
    %c0_38 = arith.constant 0 : index
    %c0_39 = arith.constant 0 : index
    %31 = vector.load %arg2[%c0_38, %c0_39] : memref<50x64xf32, #tpu.memory_space<vmem>>, vector<50x64xf32>
    %cst_40 = arith.constant dense<0.000000e+00> : vector<61x64xf32>
    %32 = tpu.matmul %30, %31, %cst_40 {dimension_numbers = #tpu.dot_dimension_numbers<[1], [0], [0], [1], [0, 0, 1, 1], [], []>} : vector<61x50xf32>, vector<50x64xf32>, vector<61x64xf32> -> vector<61x64xf32>
    %33 = arith.maximumf %28, %32 : vector<61x64xf32>
    %c0_41 = arith.constant 0 : index
    %c7 = arith.constant 7 : index
    %c0_42 = arith.constant 0 : index
    %c0_43 = arith.constant 0 : index
    %34 = vector.load %arg1[%c0_41, %c7, %c0_42, %c0_43] : memref<1x8x61x50xf32, #tpu.memory_space<vmem>>, vector<1x1x61x50xf32>
    %35 = vector.shape_cast %34 : vector<1x1x61x50xf32> to vector<61x50xf32>
    %c0_44 = arith.constant 0 : index
    %c0_45 = arith.constant 0 : index
    %36 = vector.load %arg2[%c0_44, %c0_45] : memref<50x64xf32, #tpu.memory_space<vmem>>, vector<50x64xf32>
    %cst_46 = arith.constant dense<0.000000e+00> : vector<61x64xf32>
    %37 = tpu.matmul %35, %36, %cst_46 {dimension_numbers = #tpu.dot_dimension_numbers<[1], [0], [0], [1], [0, 0, 1, 1], [], []>} : vector<61x50xf32>, vector<50x64xf32>, vector<61x64xf32> -> vector<61x64xf32>
    %38 = arith.maximumf %33, %37 : vector<61x64xf32>
    %c0_47 = arith.constant 0 : index
    %c0_48 = arith.constant 0 : index
    %39 = vector.load %arg3[%c0_47, %c0_48] : memref<1x64xf32, #tpu.memory_space<vmem>>, vector<1x64xf32>
    %40 = vector.broadcast %39 : vector<1x64xf32> to vector<61x64xf32>
    %41 = arith.addf %38, %40 : vector<61x64xf32>
    %cst_49 = arith.constant 0.000000e+00 : f32
    %42 = vector.broadcast %cst_49 : f32 to vector<61x64xf32>
    %43 = arith.maximumf %41, %42 : vector<61x64xf32>
    %44 = vector.extract_strided_slice %43 {offsets = [0, 0], sizes = [54, 64], strides = [1, 1]} : vector<61x64xf32> to vector<54x64xf32>
    %c0_50 = arith.constant 0 : index
    %c0_51 = arith.constant 0 : index
    %c0_52 = arith.constant 0 : index
    %45 = vector.load %arg4[%c0_50, %c0_51, %c0_52] : memref<8x64x128xf32, #tpu.memory_space<vmem>>, vector<1x64x128xf32>
    %46 = vector.shape_cast %45 : vector<1x64x128xf32> to vector<64x128xf32>
    %cst_53 = arith.constant dense<0.000000e+00> : vector<54x128xf32>
    %47 = tpu.matmul %44, %46, %cst_53 {dimension_numbers = #tpu.dot_dimension_numbers<[1], [0], [0], [1], [0, 0, 1, 1], [], []>} : vector<54x64xf32>, vector<64x128xf32>, vector<54x128xf32> -> vector<54x128xf32>
    %48 = vector.extract_strided_slice %43 {offsets = [1, 0], sizes = [54, 64], strides = [1, 1]} : vector<61x64xf32> to vector<54x64xf32>
    %c1_54 = arith.constant 1 : index
    %c0_55 = arith.constant 0 : index
    %c0_56 = arith.constant 0 : index
    %49 = vector.load %arg4[%c1_54, %c0_55, %c0_56] : memref<8x64x128xf32, #tpu.memory_space<vmem>>, vector<1x64x128xf32>
    %50 = vector.shape_cast %49 : vector<1x64x128xf32> to vector<64x128xf32>
    %cst_57 = arith.constant dense<0.000000e+00> : vector<54x128xf32>
    %51 = tpu.matmul %48, %50, %cst_57 {dimension_numbers = #tpu.dot_dimension_numbers<[1], [0], [0], [1], [0, 0, 1, 1], [], []>} : vector<54x64xf32>, vector<64x128xf32>, vector<54x128xf32> -> vector<54x128xf32>
    %52 = arith.addf %47, %51 : vector<54x128xf32>
    %53 = vector.extract_strided_slice %43 {offsets = [2, 0], sizes = [54, 64], strides = [1, 1]} : vector<61x64xf32> to vector<54x64xf32>
    %c2_58 = arith.constant 2 : index
    %c0_59 = arith.constant 0 : index
    %c0_60 = arith.constant 0 : index
    %54 = vector.load %arg4[%c2_58, %c0_59, %c0_60] : memref<8x64x128xf32, #tpu.memory_space<vmem>>, vector<1x64x128xf32>
    %55 = vector.shape_cast %54 : vector<1x64x128xf32> to vector<64x128xf32>
    %cst_61 = arith.constant dense<0.000000e+00> : vector<54x128xf32>
    %56 = tpu.matmul %53, %55, %cst_61 {dimension_numbers = #tpu.dot_dimension_numbers<[1], [0], [0], [1], [0, 0, 1, 1], [], []>} : vector<54x64xf32>, vector<64x128xf32>, vector<54x128xf32> -> vector<54x128xf32>
    %57 = arith.addf %52, %56 : vector<54x128xf32>
    %58 = vector.extract_strided_slice %43 {offsets = [3, 0], sizes = [54, 64], strides = [1, 1]} : vector<61x64xf32> to vector<54x64xf32>
    %c3_62 = arith.constant 3 : index
    %c0_63 = arith.constant 0 : index
    %c0_64 = arith.constant 0 : index
    %59 = vector.load %arg4[%c3_62, %c0_63, %c0_64] : memref<8x64x128xf32, #tpu.memory_space<vmem>>, vector<1x64x128xf32>
    %60 = vector.shape_cast %59 : vector<1x64x128xf32> to vector<64x128xf32>
    %cst_65 = arith.constant dense<0.000000e+00> : vector<54x128xf32>
    %61 = tpu.matmul %58, %60, %cst_65 {dimension_numbers = #tpu.dot_dimension_numbers<[1], [0], [0], [1], [0, 0, 1, 1], [], []>} : vector<54x64xf32>, vector<64x128xf32>, vector<54x128xf32> -> vector<54x128xf32>
    %62 = arith.addf %57, %61 : vector<54x128xf32>
    %63 = vector.extract_strided_slice %43 {offsets = [4, 0], sizes = [54, 64], strides = [1, 1]} : vector<61x64xf32> to vector<54x64xf32>
    %c4_66 = arith.constant 4 : index
    %c0_67 = arith.constant 0 : index
    %c0_68 = arith.constant 0 : index
    %64 = vector.load %arg4[%c4_66, %c0_67, %c0_68] : memref<8x64x128xf32, #tpu.memory_space<vmem>>, vector<1x64x128xf32>
    %65 = vector.shape_cast %64 : vector<1x64x128xf32> to vector<64x128xf32>
    %cst_69 = arith.constant dense<0.000000e+00> : vector<54x128xf32>
    %66 = tpu.matmul %63, %65, %cst_69 {dimension_numbers = #tpu.dot_dimension_numbers<[1], [0], [0], [1], [0, 0, 1, 1], [], []>} : vector<54x64xf32>, vector<64x128xf32>, vector<54x128xf32> -> vector<54x128xf32>
    %67 = arith.addf %62, %66 : vector<54x128xf32>
    %68 = vector.extract_strided_slice %43 {offsets = [5, 0], sizes = [54, 64], strides = [1, 1]} : vector<61x64xf32> to vector<54x64xf32>
    %c5_70 = arith.constant 5 : index
    %c0_71 = arith.constant 0 : index
    %c0_72 = arith.constant 0 : index
    %69 = vector.load %arg4[%c5_70, %c0_71, %c0_72] : memref<8x64x128xf32, #tpu.memory_space<vmem>>, vector<1x64x128xf32>
    %70 = vector.shape_cast %69 : vector<1x64x128xf32> to vector<64x128xf32>
    %cst_73 = arith.constant dense<0.000000e+00> : vector<54x128xf32>
    %71 = tpu.matmul %68, %70, %cst_73 {dimension_numbers = #tpu.dot_dimension_numbers<[1], [0], [0], [1], [0, 0, 1, 1], [], []>} : vector<54x64xf32>, vector<64x128xf32>, vector<54x128xf32> -> vector<54x128xf32>
    %72 = arith.addf %67, %71 : vector<54x128xf32>
    %73 = vector.extract_strided_slice %43 {offsets = [6, 0], sizes = [54, 64], strides = [1, 1]} : vector<61x64xf32> to vector<54x64xf32>
    %c6_74 = arith.constant 6 : index
    %c0_75 = arith.constant 0 : index
    %c0_76 = arith.constant 0 : index
    %74 = vector.load %arg4[%c6_74, %c0_75, %c0_76] : memref<8x64x128xf32, #tpu.memory_space<vmem>>, vector<1x64x128xf32>
    %75 = vector.shape_cast %74 : vector<1x64x128xf32> to vector<64x128xf32>
    %cst_77 = arith.constant dense<0.000000e+00> : vector<54x128xf32>
    %76 = tpu.matmul %73, %75, %cst_77 {dimension_numbers = #tpu.dot_dimension_numbers<[1], [0], [0], [1], [0, 0, 1, 1], [], []>} : vector<54x64xf32>, vector<64x128xf32>, vector<54x128xf32> -> vector<54x128xf32>
    %77 = arith.addf %72, %76 : vector<54x128xf32>
    %78 = vector.extract_strided_slice %43 {offsets = [7, 0], sizes = [54, 64], strides = [1, 1]} : vector<61x64xf32> to vector<54x64xf32>
    %c7_78 = arith.constant 7 : index
    %c0_79 = arith.constant 0 : index
    %c0_80 = arith.constant 0 : index
    %79 = vector.load %arg4[%c7_78, %c0_79, %c0_80] : memref<8x64x128xf32, #tpu.memory_space<vmem>>, vector<1x64x128xf32>
    %80 = vector.shape_cast %79 : vector<1x64x128xf32> to vector<64x128xf32>
    %cst_81 = arith.constant dense<0.000000e+00> : vector<54x128xf32>
    %81 = tpu.matmul %78, %80, %cst_81 {dimension_numbers = #tpu.dot_dimension_numbers<[1], [0], [0], [1], [0, 0, 1, 1], [], []>} : vector<54x64xf32>, vector<64x128xf32>, vector<54x128xf32> -> vector<54x128xf32>
    %82 = arith.addf %77, %81 : vector<54x128xf32>
    %c0_82 = arith.constant 0 : index
    %c0_83 = arith.constant 0 : index
    %83 = vector.load %arg5[%c0_82, %c0_83] : memref<1x128xf32, #tpu.memory_space<vmem>>, vector<1x128xf32>
    %84 = vector.broadcast %83 : vector<1x128xf32> to vector<54x128xf32>
    %85 = arith.addf %82, %84 : vector<54x128xf32>
    %cst_84 = arith.constant 0.000000e+00 : f32
    %86 = vector.broadcast %cst_84 : f32 to vector<54x128xf32>
    %87 = arith.maximumf %85, %86 : vector<54x128xf32>
    %88 = vector.extract_strided_slice %87 {offsets = [0, 0], sizes = [47, 128], strides = [1, 1]} : vector<54x128xf32> to vector<47x128xf32>
    %c0_85 = arith.constant 0 : index
    %c0_86 = arith.constant 0 : index
    %c0_87 = arith.constant 0 : index
    %89 = vector.load %arg6[%c0_85, %c0_86, %c0_87] : memref<8x128x128xf32, #tpu.memory_space<vmem>>, vector<1x128x128xf32>
    %90 = vector.shape_cast %89 : vector<1x128x128xf32> to vector<128x128xf32>
    %cst_88 = arith.constant dense<0.000000e+00> : vector<47x128xf32>
    %91 = tpu.matmul %88, %90, %cst_88 {dimension_numbers = #tpu.dot_dimension_numbers<[1], [0], [0], [1], [0, 0, 1, 1], [], []>} : vector<47x128xf32>, vector<128x128xf32>, vector<47x128xf32> -> vector<47x128xf32>
    %92 = vector.extract_strided_slice %87 {offsets = [1, 0], sizes = [47, 128], strides = [1, 1]} : vector<54x128xf32> to vector<47x128xf32>
    %c1_89 = arith.constant 1 : index
    %c0_90 = arith.constant 0 : index
    %c0_91 = arith.constant 0 : index
    %93 = vector.load %arg6[%c1_89, %c0_90, %c0_91] : memref<8x128x128xf32, #tpu.memory_space<vmem>>, vector<1x128x128xf32>
    %94 = vector.shape_cast %93 : vector<1x128x128xf32> to vector<128x128xf32>
    %cst_92 = arith.constant dense<0.000000e+00> : vector<47x128xf32>
    %95 = tpu.matmul %92, %94, %cst_92 {dimension_numbers = #tpu.dot_dimension_numbers<[1], [0], [0], [1], [0, 0, 1, 1], [], []>} : vector<47x128xf32>, vector<128x128xf32>, vector<47x128xf32> -> vector<47x128xf32>
    %96 = arith.addf %91, %95 : vector<47x128xf32>
    %97 = vector.extract_strided_slice %87 {offsets = [2, 0], sizes = [47, 128], strides = [1, 1]} : vector<54x128xf32> to vector<47x128xf32>
    %c2_93 = arith.constant 2 : index
    %c0_94 = arith.constant 0 : index
    %c0_95 = arith.constant 0 : index
    %98 = vector.load %arg6[%c2_93, %c0_94, %c0_95] : memref<8x128x128xf32, #tpu.memory_space<vmem>>, vector<1x128x128xf32>
    %99 = vector.shape_cast %98 : vector<1x128x128xf32> to vector<128x128xf32>
    %cst_96 = arith.constant dense<0.000000e+00> : vector<47x128xf32>
    %100 = tpu.matmul %97, %99, %cst_96 {dimension_numbers = #tpu.dot_dimension_numbers<[1], [0], [0], [1], [0, 0, 1, 1], [], []>} : vector<47x128xf32>, vector<128x128xf32>, vector<47x128xf32> -> vector<47x128xf32>
    %101 = arith.addf %96, %100 : vector<47x128xf32>
    %102 = vector.extract_strided_slice %87 {offsets = [3, 0], sizes = [47, 128], strides = [1, 1]} : vector<54x128xf32> to vector<47x128xf32>
    %c3_97 = arith.constant 3 : index
    %c0_98 = arith.constant 0 : index
    %c0_99 = arith.constant 0 : index
    %103 = vector.load %arg6[%c3_97, %c0_98, %c0_99] : memref<8x128x128xf32, #tpu.memory_space<vmem>>, vector<1x128x128xf32>
    %104 = vector.shape_cast %103 : vector<1x128x128xf32> to vector<128x128xf32>
    %cst_100 = arith.constant dense<0.000000e+00> : vector<47x128xf32>
    %105 = tpu.matmul %102, %104, %cst_100 {dimension_numbers = #tpu.dot_dimension_numbers<[1], [0], [0], [1], [0, 0, 1, 1], [], []>} : vector<47x128xf32>, vector<128x128xf32>, vector<47x128xf32> -> vector<47x128xf32>
    %106 = arith.addf %101, %105 : vector<47x128xf32>
    %107 = vector.extract_strided_slice %87 {offsets = [4, 0], sizes = [47, 128], strides = [1, 1]} : vector<54x128xf32> to vector<47x128xf32>
    %c4_101 = arith.constant 4 : index
    %c0_102 = arith.constant 0 : index
    %c0_103 = arith.constant 0 : index
    %108 = vector.load %arg6[%c4_101, %c0_102, %c0_103] : memref<8x128x128xf32, #tpu.memory_space<vmem>>, vector<1x128x128xf32>
    %109 = vector.shape_cast %108 : vector<1x128x128xf32> to vector<128x128xf32>
    %cst_104 = arith.constant dense<0.000000e+00> : vector<47x128xf32>
    %110 = tpu.matmul %107, %109, %cst_104 {dimension_numbers = #tpu.dot_dimension_numbers<[1], [0], [0], [1], [0, 0, 1, 1], [], []>} : vector<47x128xf32>, vector<128x128xf32>, vector<47x128xf32> -> vector<47x128xf32>
    %111 = arith.addf %106, %110 : vector<47x128xf32>
    %112 = vector.extract_strided_slice %87 {offsets = [5, 0], sizes = [47, 128], strides = [1, 1]} : vector<54x128xf32> to vector<47x128xf32>
    %c5_105 = arith.constant 5 : index
    %c0_106 = arith.constant 0 : index
    %c0_107 = arith.constant 0 : index
    %113 = vector.load %arg6[%c5_105, %c0_106, %c0_107] : memref<8x128x128xf32, #tpu.memory_space<vmem>>, vector<1x128x128xf32>
    %114 = vector.shape_cast %113 : vector<1x128x128xf32> to vector<128x128xf32>
    %cst_108 = arith.constant dense<0.000000e+00> : vector<47x128xf32>
    %115 = tpu.matmul %112, %114, %cst_108 {dimension_numbers = #tpu.dot_dimension_numbers<[1], [0], [0], [1], [0, 0, 1, 1], [], []>} : vector<47x128xf32>, vector<128x128xf32>, vector<47x128xf32> -> vector<47x128xf32>
    %116 = arith.addf %111, %115 : vector<47x128xf32>
    %117 = vector.extract_strided_slice %87 {offsets = [6, 0], sizes = [47, 128], strides = [1, 1]} : vector<54x128xf32> to vector<47x128xf32>
    %c6_109 = arith.constant 6 : index
    %c0_110 = arith.constant 0 : index
    %c0_111 = arith.constant 0 : index
    %118 = vector.load %arg6[%c6_109, %c0_110, %c0_111] : memref<8x128x128xf32, #tpu.memory_space<vmem>>, vector<1x128x128xf32>
    %119 = vector.shape_cast %118 : vector<1x128x128xf32> to vector<128x128xf32>
    %cst_112 = arith.constant dense<0.000000e+00> : vector<47x128xf32>
    %120 = tpu.matmul %117, %119, %cst_112 {dimension_numbers = #tpu.dot_dimension_numbers<[1], [0], [0], [1], [0, 0, 1, 1], [], []>} : vector<47x128xf32>, vector<128x128xf32>, vector<47x128xf32> -> vector<47x128xf32>
    %121 = arith.addf %116, %120 : vector<47x128xf32>
    %122 = vector.extract_strided_slice %87 {offsets = [7, 0], sizes = [47, 128], strides = [1, 1]} : vector<54x128xf32> to vector<47x128xf32>
    %c7_113 = arith.constant 7 : index
    %c0_114 = arith.constant 0 : index
    %c0_115 = arith.constant 0 : index
    %123 = vector.load %arg6[%c7_113, %c0_114, %c0_115] : memref<8x128x128xf32, #tpu.memory_space<vmem>>, vector<1x128x128xf32>
    %124 = vector.shape_cast %123 : vector<1x128x128xf32> to vector<128x128xf32>
    %cst_116 = arith.constant dense<0.000000e+00> : vector<47x128xf32>
    %125 = tpu.matmul %122, %124, %cst_116 {dimension_numbers = #tpu.dot_dimension_numbers<[1], [0], [0], [1], [0, 0, 1, 1], [], []>} : vector<47x128xf32>, vector<128x128xf32>, vector<47x128xf32> -> vector<47x128xf32>
    %126 = arith.addf %121, %125 : vector<47x128xf32>
    %c0_117 = arith.constant 0 : index
    %c0_118 = arith.constant 0 : index
    %127 = vector.load %arg7[%c0_117, %c0_118] : memref<1x128xf32, #tpu.memory_space<vmem>>, vector<1x128xf32>
    %128 = vector.broadcast %127 : vector<1x128xf32> to vector<47x128xf32>
    %129 = arith.addf %126, %128 : vector<47x128xf32>
    %cst_119 = arith.constant 0.000000e+00 : f32
    %130 = vector.broadcast %cst_119 : f32 to vector<47x128xf32>
    %131 = arith.maximumf %129, %130 : vector<47x128xf32>
    %132 = vector.extract_strided_slice %131 {offsets = [0, 0], sizes = [40, 128], strides = [1, 1]} : vector<47x128xf32> to vector<40x128xf32>
    %c0_120 = arith.constant 0 : index
    %c0_121 = arith.constant 0 : index
    %c0_122 = arith.constant 0 : index
    %133 = vector.load %arg8[%c0_120, %c0_121, %c0_122] : memref<8x128x128xf32, #tpu.memory_space<vmem>>, vector<1x128x128xf32>
    %134 = vector.shape_cast %133 : vector<1x128x128xf32> to vector<128x128xf32>
    %cst_123 = arith.constant dense<0.000000e+00> : vector<40x128xf32>
    %135 = tpu.matmul %132, %134, %cst_123 {dimension_numbers = #tpu.dot_dimension_numbers<[1], [0], [0], [1], [0, 0, 1, 1], [], []>} : vector<40x128xf32>, vector<128x128xf32>, vector<40x128xf32> -> vector<40x128xf32>
    %136 = vector.extract_strided_slice %131 {offsets = [1, 0], sizes = [40, 128], strides = [1, 1]} : vector<47x128xf32> to vector<40x128xf32>
    %c1_124 = arith.constant 1 : index
    %c0_125 = arith.constant 0 : index
    %c0_126 = arith.constant 0 : index
    %137 = vector.load %arg8[%c1_124, %c0_125, %c0_126] : memref<8x128x128xf32, #tpu.memory_space<vmem>>, vector<1x128x128xf32>
    %138 = vector.shape_cast %137 : vector<1x128x128xf32> to vector<128x128xf32>
    %cst_127 = arith.constant dense<0.000000e+00> : vector<40x128xf32>
    %139 = tpu.matmul %136, %138, %cst_127 {dimension_numbers = #tpu.dot_dimension_numbers<[1], [0], [0], [1], [0, 0, 1, 1], [], []>} : vector<40x128xf32>, vector<128x128xf32>, vector<40x128xf32> -> vector<40x128xf32>
    %140 = arith.addf %135, %139 : vector<40x128xf32>
    %141 = vector.extract_strided_slice %131 {offsets = [2, 0], sizes = [40, 128], strides = [1, 1]} : vector<47x128xf32> to vector<40x128xf32>
    %c2_128 = arith.constant 2 : index
    %c0_129 = arith.constant 0 : index
    %c0_130 = arith.constant 0 : index
    %142 = vector.load %arg8[%c2_128, %c0_129, %c0_130] : memref<8x128x128xf32, #tpu.memory_space<vmem>>, vector<1x128x128xf32>
    %143 = vector.shape_cast %142 : vector<1x128x128xf32> to vector<128x128xf32>
    %cst_131 = arith.constant dense<0.000000e+00> : vector<40x128xf32>
    %144 = tpu.matmul %141, %143, %cst_131 {dimension_numbers = #tpu.dot_dimension_numbers<[1], [0], [0], [1], [0, 0, 1, 1], [], []>} : vector<40x128xf32>, vector<128x128xf32>, vector<40x128xf32> -> vector<40x128xf32>
    %145 = arith.addf %140, %144 : vector<40x128xf32>
    %146 = vector.extract_strided_slice %131 {offsets = [3, 0], sizes = [40, 128], strides = [1, 1]} : vector<47x128xf32> to vector<40x128xf32>
    %c3_132 = arith.constant 3 : index
    %c0_133 = arith.constant 0 : index
    %c0_134 = arith.constant 0 : index
    %147 = vector.load %arg8[%c3_132, %c0_133, %c0_134] : memref<8x128x128xf32, #tpu.memory_space<vmem>>, vector<1x128x128xf32>
    %148 = vector.shape_cast %147 : vector<1x128x128xf32> to vector<128x128xf32>
    %cst_135 = arith.constant dense<0.000000e+00> : vector<40x128xf32>
    %149 = tpu.matmul %146, %148, %cst_135 {dimension_numbers = #tpu.dot_dimension_numbers<[1], [0], [0], [1], [0, 0, 1, 1], [], []>} : vector<40x128xf32>, vector<128x128xf32>, vector<40x128xf32> -> vector<40x128xf32>
    %150 = arith.addf %145, %149 : vector<40x128xf32>
    %151 = vector.extract_strided_slice %131 {offsets = [4, 0], sizes = [40, 128], strides = [1, 1]} : vector<47x128xf32> to vector<40x128xf32>
    %c4_136 = arith.constant 4 : index
    %c0_137 = arith.constant 0 : index
    %c0_138 = arith.constant 0 : index
    %152 = vector.load %arg8[%c4_136, %c0_137, %c0_138] : memref<8x128x128xf32, #tpu.memory_space<vmem>>, vector<1x128x128xf32>
    %153 = vector.shape_cast %152 : vector<1x128x128xf32> to vector<128x128xf32>
    %cst_139 = arith.constant dense<0.000000e+00> : vector<40x128xf32>
    %154 = tpu.matmul %151, %153, %cst_139 {dimension_numbers = #tpu.dot_dimension_numbers<[1], [0], [0], [1], [0, 0, 1, 1], [], []>} : vector<40x128xf32>, vector<128x128xf32>, vector<40x128xf32> -> vector<40x128xf32>
    %155 = arith.addf %150, %154 : vector<40x128xf32>
    %156 = vector.extract_strided_slice %131 {offsets = [5, 0], sizes = [40, 128], strides = [1, 1]} : vector<47x128xf32> to vector<40x128xf32>
    %c5_140 = arith.constant 5 : index
    %c0_141 = arith.constant 0 : index
    %c0_142 = arith.constant 0 : index
    %157 = vector.load %arg8[%c5_140, %c0_141, %c0_142] : memref<8x128x128xf32, #tpu.memory_space<vmem>>, vector<1x128x128xf32>
    %158 = vector.shape_cast %157 : vector<1x128x128xf32> to vector<128x128xf32>
    %cst_143 = arith.constant dense<0.000000e+00> : vector<40x128xf32>
    %159 = tpu.matmul %156, %158, %cst_143 {dimension_numbers = #tpu.dot_dimension_numbers<[1], [0], [0], [1], [0, 0, 1, 1], [], []>} : vector<40x128xf32>, vector<128x128xf32>, vector<40x128xf32> -> vector<40x128xf32>
    %160 = arith.addf %155, %159 : vector<40x128xf32>
    %161 = vector.extract_strided_slice %131 {offsets = [6, 0], sizes = [40, 128], strides = [1, 1]} : vector<47x128xf32> to vector<40x128xf32>
    %c6_144 = arith.constant 6 : index
    %c0_145 = arith.constant 0 : index
    %c0_146 = arith.constant 0 : index
    %162 = vector.load %arg8[%c6_144, %c0_145, %c0_146] : memref<8x128x128xf32, #tpu.memory_space<vmem>>, vector<1x128x128xf32>
    %163 = vector.shape_cast %162 : vector<1x128x128xf32> to vector<128x128xf32>
    %cst_147 = arith.constant dense<0.000000e+00> : vector<40x128xf32>
    %164 = tpu.matmul %161, %163, %cst_147 {dimension_numbers = #tpu.dot_dimension_numbers<[1], [0], [0], [1], [0, 0, 1, 1], [], []>} : vector<40x128xf32>, vector<128x128xf32>, vector<40x128xf32> -> vector<40x128xf32>
    %165 = arith.addf %160, %164 : vector<40x128xf32>
    %166 = vector.extract_strided_slice %131 {offsets = [7, 0], sizes = [40, 128], strides = [1, 1]} : vector<47x128xf32> to vector<40x128xf32>
    %c7_148 = arith.constant 7 : index
    %c0_149 = arith.constant 0 : index
    %c0_150 = arith.constant 0 : index
    %167 = vector.load %arg8[%c7_148, %c0_149, %c0_150] : memref<8x128x128xf32, #tpu.memory_space<vmem>>, vector<1x128x128xf32>
    %168 = vector.shape_cast %167 : vector<1x128x128xf32> to vector<128x128xf32>
    %cst_151 = arith.constant dense<0.000000e+00> : vector<40x128xf32>
    %169 = tpu.matmul %166, %168, %cst_151 {dimension_numbers = #tpu.dot_dimension_numbers<[1], [0], [0], [1], [0, 0, 1, 1], [], []>} : vector<40x128xf32>, vector<128x128xf32>, vector<40x128xf32> -> vector<40x128xf32>
    %170 = arith.addf %165, %169 : vector<40x128xf32>
    %c0_152 = arith.constant 0 : index
    %c0_153 = arith.constant 0 : index
    %171 = vector.load %arg9[%c0_152, %c0_153] : memref<1x128xf32, #tpu.memory_space<vmem>>, vector<1x128xf32>
    %172 = vector.broadcast %171 : vector<1x128xf32> to vector<40x128xf32>
    %173 = arith.addf %170, %172 : vector<40x128xf32>
    %cst_154 = arith.constant 0.000000e+00 : f32
    %174 = vector.broadcast %cst_154 : f32 to vector<40x128xf32>
    %175 = arith.maximumf %173, %174 : vector<40x128xf32>
    %c0_155 = arith.constant 0 : index
    %c0_156 = arith.constant 0 : index
    %176 = vector.load %arg21[%c0_155, %c0_156] : memref<40x128xf32, #tpu.memory_space<vmem>>, vector<40x128xf32>
    tpu.vector_store %arg21[%c0_155, %c0_156], %175 {strides = array<i32>} : memref<40x128xf32, #tpu.memory_space<vmem>>, vector<40x128xf32>,
    %c0_157 = arith.constant 0 : index
    %c0_158 = arith.constant 0 : index
    %177 = tpu.strided_load %arg21[%c0_157, %c0_158] {strides = array<i32: 4, 1>} : memref<40x128xf32, #tpu.memory_space<vmem>>, vector<10x128xf32>
    %c1_159 = arith.constant 1 : index
    %c0_160 = arith.constant 0 : index
    %178 = tpu.strided_load %arg21[%c1_159, %c0_160] {strides = array<i32: 4, 1>} : memref<40x128xf32, #tpu.memory_space<vmem>>, vector<10x128xf32>
    %179 = arith.maximumf %177, %178 : vector<10x128xf32>
    %c2_161 = arith.constant 2 : index
    %c0_162 = arith.constant 0 : index
    %180 = tpu.strided_load %arg21[%c2_161, %c0_162] {strides = array<i32: 4, 1>} : memref<40x128xf32, #tpu.memory_space<vmem>>, vector<10x128xf32>
    %181 = arith.maximumf %179, %180 : vector<10x128xf32>
    %c3_163 = arith.constant 3 : index
    %c0_164 = arith.constant 0 : index
    %182 = tpu.strided_load %arg21[%c3_163, %c0_164] {strides = array<i32: 4, 1>} : memref<40x128xf32, #tpu.memory_space<vmem>>, vector<10x128xf32>
    %183 = arith.maximumf %181, %182 : vector<10x128xf32>
    %c0_165 = arith.constant 0 : index
    %c0_166 = arith.constant 0 : index
    %c0_167 = arith.constant 0 : index
    %184 = vector.load %arg19[%c0_165, %c0_166, %c0_167] : memref<1x10x128xf32, #tpu.memory_space<vmem>>, vector<1x10x128xf32>
    %185 = vector.shape_cast %184 : vector<1x10x128xf32> to vector<10x128xf32>
    %186 = vector.shape_cast %183 : vector<10x128xf32> to vector<1x10x128xf32>
    tpu.vector_store %arg19[%c0_165, %c0_166, %c0_167], %186 {strides = array<i32>} : memref<1x10x128xf32, #tpu.memory_space<vmem>>, vector<1x10x128xf32>,
    %c0_168 = arith.constant 0 : index
    %c0_169 = arith.constant 0 : index
    %c0_170 = arith.constant 0 : index
    %c0_171 = arith.constant 0 : index
    %187 = vector.load %arg10[%c0_168, %c0_169, %c0_170, %c0_171] : memref<1x4x13x400xf32, #tpu.memory_space<vmem>>, vector<1x1x13x400xf32>
    %188 = vector.shape_cast %187 : vector<1x1x13x400xf32> to vector<13x400xf32>
    %c0_172 = arith.constant 0 : index
    %c0_173 = arith.constant 0 : index
    %189 = vector.load %arg11[%c0_172, %c0_173] : memref<400x64xf32, #tpu.memory_space<vmem>>, vector<400x64xf32>
    %cst_174 = arith.constant dense<0.000000e+00> : vector<13x64xf32>
    %190 = tpu.matmul %188, %189, %cst_174 {dimension_numbers = #tpu.dot_dimension_numbers<[1], [0], [0], [1], [0, 0, 1, 1], [], []>} : vector<13x400xf32>, vector<400x64xf32>, vector<13x64xf32> -> vector<13x64xf32>
    %c0_175 = arith.constant 0 : index
    %c1_176 = arith.constant 1 : index
    %c0_177 = arith.constant 0 : index
    %c0_178 = arith.constant 0 : index
    %191 = vector.load %arg10[%c0_175, %c1_176, %c0_177, %c0_178] : memref<1x4x13x400xf32, #tpu.memory_space<vmem>>, vector<1x1x13x400xf32>
    %192 = vector.shape_cast %191 : vector<1x1x13x400xf32> to vector<13x400xf32>
    %c0_179 = arith.constant 0 : index
    %c0_180 = arith.constant 0 : index
    %193 = vector.load %arg11[%c0_179, %c0_180] : memref<400x64xf32, #tpu.memory_space<vmem>>, vector<400x64xf32>
    %cst_181 = arith.constant dense<0.000000e+00> : vector<13x64xf32>
    %194 = tpu.matmul %192, %193, %cst_181 {dimension_numbers = #tpu.dot_dimension_numbers<[1], [0], [0], [1], [0, 0, 1, 1], [], []>} : vector<13x400xf32>, vector<400x64xf32>, vector<13x64xf32> -> vector<13x64xf32>
    %195 = arith.maximumf %190, %194 : vector<13x64xf32>
    %c0_182 = arith.constant 0 : index
    %c2_183 = arith.constant 2 : index
    %c0_184 = arith.constant 0 : index
    %c0_185 = arith.constant 0 : index
    %196 = vector.load %arg10[%c0_182, %c2_183, %c0_184, %c0_185] : memref<1x4x13x400xf32, #tpu.memory_space<vmem>>, vector<1x1x13x400xf32>
    %197 = vector.shape_cast %196 : vector<1x1x13x400xf32> to vector<13x400xf32>
    %c0_186 = arith.constant 0 : index
    %c0_187 = arith.constant 0 : index
    %198 = vector.load %arg11[%c0_186, %c0_187] : memref<400x64xf32, #tpu.memory_space<vmem>>, vector<400x64xf32>
    %cst_188 = arith.constant dense<0.000000e+00> : vector<13x64xf32>
    %199 = tpu.matmul %197, %198, %cst_188 {dimension_numbers = #tpu.dot_dimension_numbers<[1], [0], [0], [1], [0, 0, 1, 1], [], []>} : vector<13x400xf32>, vector<400x64xf32>, vector<13x64xf32> -> vector<13x64xf32>
    %200 = arith.maximumf %195, %199 : vector<13x64xf32>
    %c0_189 = arith.constant 0 : index
    %c3_190 = arith.constant 3 : index
    %c0_191 = arith.constant 0 : index
    %c0_192 = arith.constant 0 : index
    %201 = vector.load %arg10[%c0_189, %c3_190, %c0_191, %c0_192] : memref<1x4x13x400xf32, #tpu.memory_space<vmem>>, vector<1x1x13x400xf32>
    %202 = vector.shape_cast %201 : vector<1x1x13x400xf32> to vector<13x400xf32>
    %c0_193 = arith.constant 0 : index
    %c0_194 = arith.constant 0 : index
    %203 = vector.load %arg11[%c0_193, %c0_194] : memref<400x64xf32, #tpu.memory_space<vmem>>, vector<400x64xf32>
    %cst_195 = arith.constant dense<0.000000e+00> : vector<13x64xf32>
    %204 = tpu.matmul %202, %203, %cst_195 {dimension_numbers = #tpu.dot_dimension_numbers<[1], [0], [0], [1], [0, 0, 1, 1], [], []>} : vector<13x400xf32>, vector<400x64xf32>, vector<13x64xf32> -> vector<13x64xf32>
    %205 = arith.maximumf %200, %204 : vector<13x64xf32>
    %c0_196 = arith.constant 0 : index
    %c0_197 = arith.constant 0 : index
    %206 = vector.load %arg12[%c0_196, %c0_197] : memref<1x64xf32, #tpu.memory_space<vmem>>, vector<1x64xf32>
    %207 = vector.broadcast %206 : vector<1x64xf32> to vector<13x64xf32>
    %208 = arith.addf %205, %207 : vector<13x64xf32>
    %cst_198 = arith.constant 0.000000e+00 : f32
    %209 = vector.broadcast %cst_198 : f32 to vector<13x64xf32>
    %210 = arith.maximumf %208, %209 : vector<13x64xf32>
    %211 = vector.extract_strided_slice %210 {offsets = [0, 0], sizes = [8, 64], strides = [1, 1]} : vector<13x64xf32> to vector<8x64xf32>
    %c0_199 = arith.constant 0 : index
    %c0_200 = arith.constant 0 : index
    %c0_201 = arith.constant 0 : index
    %212 = vector.load %arg13[%c0_199, %c0_200, %c0_201] : memref<6x64x128xf32, #tpu.memory_space<vmem>>, vector<1x64x128xf32>
    %213 = vector.shape_cast %212 : vector<1x64x128xf32> to vector<64x128xf32>
    %cst_202 = arith.constant dense<0.000000e+00> : vector<8x128xf32>
    %214 = tpu.matmul %211, %213, %cst_202 {dimension_numbers = #tpu.dot_dimension_numbers<[1], [0], [0], [1], [0, 0, 1, 1], [], []>} : vector<8x64xf32>, vector<64x128xf32>, vector<8x128xf32> -> vector<8x128xf32>
    %215 = vector.extract_strided_slice %210 {offsets = [1, 0], sizes = [8, 64], strides = [1, 1]} : vector<13x64xf32> to vector<8x64xf32>
    %c1_203 = arith.constant 1 : index
    %c0_204 = arith.constant 0 : index
    %c0_205 = arith.constant 0 : index
    %216 = vector.load %arg13[%c1_203, %c0_204, %c0_205] : memref<6x64x128xf32, #tpu.memory_space<vmem>>, vector<1x64x128xf32>
    %217 = vector.shape_cast %216 : vector<1x64x128xf32> to vector<64x128xf32>
    %cst_206 = arith.constant dense<0.000000e+00> : vector<8x128xf32>
    %218 = tpu.matmul %215, %217, %cst_206 {dimension_numbers = #tpu.dot_dimension_numbers<[1], [0], [0], [1], [0, 0, 1, 1], [], []>} : vector<8x64xf32>, vector<64x128xf32>, vector<8x128xf32> -> vector<8x128xf32>
    %219 = arith.addf %214, %218 : vector<8x128xf32>
    %220 = vector.extract_strided_slice %210 {offsets = [2, 0], sizes = [8, 64], strides = [1, 1]} : vector<13x64xf32> to vector<8x64xf32>
    %c2_207 = arith.constant 2 : index
    %c0_208 = arith.constant 0 : index
    %c0_209 = arith.constant 0 : index
    %221 = vector.load %arg13[%c2_207, %c0_208, %c0_209] : memref<6x64x128xf32, #tpu.memory_space<vmem>>, vector<1x64x128xf32>
    %222 = vector.shape_cast %221 : vector<1x64x128xf32> to vector<64x128xf32>
    %cst_210 = arith.constant dense<0.000000e+00> : vector<8x128xf32>
    %223 = tpu.matmul %220, %222, %cst_210 {dimension_numbers = #tpu.dot_dimension_numbers<[1], [0], [0], [1], [0, 0, 1, 1], [], []>} : vector<8x64xf32>, vector<64x128xf32>, vector<8x128xf32> -> vector<8x128xf32>
    %224 = arith.addf %219, %223 : vector<8x128xf32>
    %225 = vector.extract_strided_slice %210 {offsets = [3, 0], sizes = [8, 64], strides = [1, 1]} : vector<13x64xf32> to vector<8x64xf32>
    %c3_211 = arith.constant 3 : index
    %c0_212 = arith.constant 0 : index
    %c0_213 = arith.constant 0 : index
    %226 = vector.load %arg13[%c3_211, %c0_212, %c0_213] : memref<6x64x128xf32, #tpu.memory_space<vmem>>, vector<1x64x128xf32>
    %227 = vector.shape_cast %226 : vector<1x64x128xf32> to vector<64x128xf32>
    %cst_214 = arith.constant dense<0.000000e+00> : vector<8x128xf32>
    %228 = tpu.matmul %225, %227, %cst_214 {dimension_numbers = #tpu.dot_dimension_numbers<[1], [0], [0], [1], [0, 0, 1, 1], [], []>} : vector<8x64xf32>, vector<64x128xf32>, vector<8x128xf32> -> vector<8x128xf32>
    %229 = arith.addf %224, %228 : vector<8x128xf32>
    %230 = vector.extract_strided_slice %210 {offsets = [4, 0], sizes = [8, 64], strides = [1, 1]} : vector<13x64xf32> to vector<8x64xf32>
    %c4_215 = arith.constant 4 : index
    %c0_216 = arith.constant 0 : index
    %c0_217 = arith.constant 0 : index
    %231 = vector.load %arg13[%c4_215, %c0_216, %c0_217] : memref<6x64x128xf32, #tpu.memory_space<vmem>>, vector<1x64x128xf32>
    %232 = vector.shape_cast %231 : vector<1x64x128xf32> to vector<64x128xf32>
    %cst_218 = arith.constant dense<0.000000e+00> : vector<8x128xf32>
    %233 = tpu.matmul %230, %232, %cst_218 {dimension_numbers = #tpu.dot_dimension_numbers<[1], [0], [0], [1], [0, 0, 1, 1], [], []>} : vector<8x64xf32>, vector<64x128xf32>, vector<8x128xf32> -> vector<8x128xf32>
    %234 = arith.addf %229, %233 : vector<8x128xf32>
    %235 = vector.extract_strided_slice %210 {offsets = [5, 0], sizes = [8, 64], strides = [1, 1]} : vector<13x64xf32> to vector<8x64xf32>
    %c5_219 = arith.constant 5 : index
    %c0_220 = arith.constant 0 : index
    %c0_221 = arith.constant 0 : index
    %236 = vector.load %arg13[%c5_219, %c0_220, %c0_221] : memref<6x64x128xf32, #tpu.memory_space<vmem>>, vector<1x64x128xf32>
    %237 = vector.shape_cast %236 : vector<1x64x128xf32> to vector<64x128xf32>
    %cst_222 = arith.constant dense<0.000000e+00> : vector<8x128xf32>
    %238 = tpu.matmul %235, %237, %cst_222 {dimension_numbers = #tpu.dot_dimension_numbers<[1], [0], [0], [1], [0, 0, 1, 1], [], []>} : vector<8x64xf32>, vector<64x128xf32>, vector<8x128xf32> -> vector<8x128xf32>
    %239 = arith.addf %234, %238 : vector<8x128xf32>
    %c0_223 = arith.constant 0 : index
    %c0_224 = arith.constant 0 : index
    %240 = vector.load %arg14[%c0_223, %c0_224] : memref<1x128xf32, #tpu.memory_space<vmem>>, vector<1x128xf32>
    %241 = vector.broadcast %240 : vector<1x128xf32> to vector<8x128xf32>
    %242 = arith.addf %239, %241 : vector<8x128xf32>
    %cst_225 = arith.constant 0.000000e+00 : f32
    %243 = vector.broadcast %cst_225 : f32 to vector<8x128xf32>
    %244 = arith.maximumf %242, %243 : vector<8x128xf32>
    %245 = vector.extract_strided_slice %244 {offsets = [0, 0], sizes = [3, 128], strides = [1, 1]} : vector<8x128xf32> to vector<3x128xf32>
    %c0_226 = arith.constant 0 : index
    %c0_227 = arith.constant 0 : index
    %c0_228 = arith.constant 0 : index
    %246 = vector.load %arg15[%c0_226, %c0_227, %c0_228] : memref<6x128x128xf32, #tpu.memory_space<vmem>>, vector<1x128x128xf32>
    %247 = vector.shape_cast %246 : vector<1x128x128xf32> to vector<128x128xf32>
    %cst_229 = arith.constant dense<0.000000e+00> : vector<3x128xf32>
    %248 = tpu.matmul %245, %247, %cst_229 {dimension_numbers = #tpu.dot_dimension_numbers<[1], [0], [0], [1], [0, 0, 1, 1], [], []>} : vector<3x128xf32>, vector<128x128xf32>, vector<3x128xf32> -> vector<3x128xf32>
    %249 = vector.extract_strided_slice %244 {offsets = [1, 0], sizes = [3, 128], strides = [1, 1]} : vector<8x128xf32> to vector<3x128xf32>
    %c1_230 = arith.constant 1 : index
    %c0_231 = arith.constant 0 : index
    %c0_232 = arith.constant 0 : index
    %250 = vector.load %arg15[%c1_230, %c0_231, %c0_232] : memref<6x128x128xf32, #tpu.memory_space<vmem>>, vector<1x128x128xf32>
    %251 = vector.shape_cast %250 : vector<1x128x128xf32> to vector<128x128xf32>
    %cst_233 = arith.constant dense<0.000000e+00> : vector<3x128xf32>
    %252 = tpu.matmul %249, %251, %cst_233 {dimension_numbers = #tpu.dot_dimension_numbers<[1], [0], [0], [1], [0, 0, 1, 1], [], []>} : vector<3x128xf32>, vector<128x128xf32>, vector<3x128xf32> -> vector<3x128xf32>
    %253 = arith.addf %248, %252 : vector<3x128xf32>
    %254 = vector.extract_strided_slice %244 {offsets = [2, 0], sizes = [3, 128], strides = [1, 1]} : vector<8x128xf32> to vector<3x128xf32>
    %c2_234 = arith.constant 2 : index
    %c0_235 = arith.constant 0 : index
    %c0_236 = arith.constant 0 : index
    %255 = vector.load %arg15[%c2_234, %c0_235, %c0_236] : memref<6x128x128xf32, #tpu.memory_space<vmem>>, vector<1x128x128xf32>
    %256 = vector.shape_cast %255 : vector<1x128x128xf32> to vector<128x128xf32>
    %cst_237 = arith.constant dense<0.000000e+00> : vector<3x128xf32>
    %257 = tpu.matmul %254, %256, %cst_237 {dimension_numbers = #tpu.dot_dimension_numbers<[1], [0], [0], [1], [0, 0, 1, 1], [], []>} : vector<3x128xf32>, vector<128x128xf32>, vector<3x128xf32> -> vector<3x128xf32>
    %258 = arith.addf %253, %257 : vector<3x128xf32>
    %259 = vector.extract_strided_slice %244 {offsets = [3, 0], sizes = [3, 128], strides = [1, 1]} : vector<8x128xf32> to vector<3x128xf32>
    %c3_238 = arith.constant 3 : index
    %c0_239 = arith.constant 0 : index
    %c0_240 = arith.constant 0 : index
    %260 = vector.load %arg15[%c3_238, %c0_239, %c0_240] : memref<6x128x128xf32, #tpu.memory_space<vmem>>, vector<1x128x128xf32>
    %261 = vector.shape_cast %260 : vector<1x128x128xf32> to vector<128x128xf32>
    %cst_241 = arith.constant dense<0.000000e+00> : vector<3x128xf32>
    %262 = tpu.matmul %259, %261, %cst_241 {dimension_numbers = #tpu.dot_dimension_numbers<[1], [0], [0], [1], [0, 0, 1, 1], [], []>} : vector<3x128xf32>, vector<128x128xf32>, vector<3x128xf32> -> vector<3x128xf32>
    %263 = arith.addf %258, %262 : vector<3x128xf32>
    %264 = vector.extract_strided_slice %244 {offsets = [4, 0], sizes = [3, 128], strides = [1, 1]} : vector<8x128xf32> to vector<3x128xf32>
    %c4_242 = arith.constant 4 : index
    %c0_243 = arith.constant 0 : index
    %c0_244 = arith.constant 0 : index
    %265 = vector.load %arg15[%c4_242, %c0_243, %c0_244] : memref<6x128x128xf32, #tpu.memory_space<vmem>>, vector<1x128x128xf32>
    %266 = vector.shape_cast %265 : vector<1x128x128xf32> to vector<128x128xf32>
    %cst_245 = arith.constant dense<0.000000e+00> : vector<3x128xf32>
    %267 = tpu.matmul %264, %266, %cst_245 {dimension_numbers = #tpu.dot_dimension_numbers<[1], [0], [0], [1], [0, 0, 1, 1], [], []>} : vector<3x128xf32>, vector<128x128xf32>, vector<3x128xf32> -> vector<3x128xf32>
    %268 = arith.addf %263, %267 : vector<3x128xf32>
    %269 = vector.extract_strided_slice %244 {offsets = [5, 0], sizes = [3, 128], strides = [1, 1]} : vector<8x128xf32> to vector<3x128xf32>
    %c5_246 = arith.constant 5 : index
    %c0_247 = arith.constant 0 : index
    %c0_248 = arith.constant 0 : index
    %270 = vector.load %arg15[%c5_246, %c0_247, %c0_248] : memref<6x128x128xf32, #tpu.memory_space<vmem>>, vector<1x128x128xf32>
    %271 = vector.shape_cast %270 : vector<1x128x128xf32> to vector<128x128xf32>
    %cst_249 = arith.constant dense<0.000000e+00> : vector<3x128xf32>
    %272 = tpu.matmul %269, %271, %cst_249 {dimension_numbers = #tpu.dot_dimension_numbers<[1], [0], [0], [1], [0, 0, 1, 1], [], []>} : vector<3x128xf32>, vector<128x128xf32>, vector<3x128xf32> -> vector<3x128xf32>
    %273 = arith.addf %268, %272 : vector<3x128xf32>
    %c0_250 = arith.constant 0 : index
    %c0_251 = arith.constant 0 : index
    %274 = vector.load %arg16[%c0_250, %c0_251] : memref<1x128xf32, #tpu.memory_space<vmem>>, vector<1x128xf32>
    %275 = vector.broadcast %274 : vector<1x128xf32> to vector<3x128xf32>
    %276 = arith.addf %273, %275 : vector<3x128xf32>
    %cst_252 = arith.constant 0.000000e+00 : f32
    %277 = vector.broadcast %cst_252 : f32 to vector<3x128xf32>
    %278 = arith.maximumf %276, %277 : vector<3x128xf32>
    %cst_253 = arith.constant 0.000000e+00 : f32
    %279 = vector.broadcast %cst_253 : f32 to vector<7x128xf32>
    %c0_254 = arith.constant 0 : index
    %c0_255 = arith.constant 0 : index
    %280 = vector.load %arg23[%c0_254, %c0_255] : memref<7x128xf32, #tpu.memory_space<vmem>>, vector<7x128xf32>
    tpu.vector_store %arg23[%c0_254, %c0_255], %279 {strides = array<i32>} : memref<7x128xf32, #tpu.memory_space<vmem>>, vector<7x128xf32>,
    %c2_256 = arith.constant 2 : index
    %c0_257 = arith.constant 0 : index
    %281 = vector.load %arg23[%c2_256, %c0_257] : memref<7x128xf32, #tpu.memory_space<vmem>>, vector<3x128xf32>
    tpu.vector_store %arg23[%c2_256, %c0_257], %278 {strides = array<i32>} : memref<7x128xf32, #tpu.memory_space<vmem>>, vector<3x128xf32>,
    %c0_258 = arith.constant 0 : index
    %c0_259 = arith.constant 0 : index
    %282 = vector.load %arg23[%c0_258, %c0_259] : memref<7x128xf32, #tpu.memory_space<vmem>>, vector<7x128xf32>
    %283 = vector.extract_strided_slice %282 {offsets = [0, 0], sizes = [2, 128], strides = [1, 1]} : vector<7x128xf32> to vector<2x128xf32>
    %c0_260 = arith.constant 0 : index
    %c0_261 = arith.constant 0 : index
    %c0_262 = arith.constant 0 : index
    %284 = vector.load %arg17[%c0_260, %c0_261, %c0_262] : memref<6x128x128xf32, #tpu.memory_space<vmem>>, vector<1x128x128xf32>
    %285 = vector.shape_cast %284 : vector<1x128x128xf32> to vector<128x128xf32>
    %cst_263 = arith.constant dense<0.000000e+00> : vector<2x128xf32>
    %286 = tpu.matmul %283, %285, %cst_263 {dimension_numbers = #tpu.dot_dimension_numbers<[1], [0], [0], [1], [0, 0, 1, 1], [], []>} : vector<2x128xf32>, vector<128x128xf32>, vector<2x128xf32> -> vector<2x128xf32>
    %287 = vector.extract_strided_slice %282 {offsets = [1, 0], sizes = [2, 128], strides = [1, 1]} : vector<7x128xf32> to vector<2x128xf32>
    %c1_264 = arith.constant 1 : index
    %c0_265 = arith.constant 0 : index
    %c0_266 = arith.constant 0 : index
    %288 = vector.load %arg17[%c1_264, %c0_265, %c0_266] : memref<6x128x128xf32, #tpu.memory_space<vmem>>, vector<1x128x128xf32>
    %289 = vector.shape_cast %288 : vector<1x128x128xf32> to vector<128x128xf32>
    %cst_267 = arith.constant dense<0.000000e+00> : vector<2x128xf32>
    %290 = tpu.matmul %287, %289, %cst_267 {dimension_numbers = #tpu.dot_dimension_numbers<[1], [0], [0], [1], [0, 0, 1, 1], [], []>} : vector<2x128xf32>, vector<128x128xf32>, vector<2x128xf32> -> vector<2x128xf32>
    %291 = arith.addf %286, %290 : vector<2x128xf32>
    %292 = vector.extract_strided_slice %282 {offsets = [2, 0], sizes = [2, 128], strides = [1, 1]} : vector<7x128xf32> to vector<2x128xf32>
    %c2_268 = arith.constant 2 : index
    %c0_269 = arith.constant 0 : index
    %c0_270 = arith.constant 0 : index
    %293 = vector.load %arg17[%c2_268, %c0_269, %c0_270] : memref<6x128x128xf32, #tpu.memory_space<vmem>>, vector<1x128x128xf32>
    %294 = vector.shape_cast %293 : vector<1x128x128xf32> to vector<128x128xf32>
    %cst_271 = arith.constant dense<0.000000e+00> : vector<2x128xf32>
    %295 = tpu.matmul %292, %294, %cst_271 {dimension_numbers = #tpu.dot_dimension_numbers<[1], [0], [0], [1], [0, 0, 1, 1], [], []>} : vector<2x128xf32>, vector<128x128xf32>, vector<2x128xf32> -> vector<2x128xf32>
    %296 = arith.addf %291, %295 : vector<2x128xf32>
    %297 = vector.extract_strided_slice %282 {offsets = [3, 0], sizes = [2, 128], strides = [1, 1]} : vector<7x128xf32> to vector<2x128xf32>
    %c3_272 = arith.constant 3 : index
    %c0_273 = arith.constant 0 : index
    %c0_274 = arith.constant 0 : index
    %298 = vector.load %arg17[%c3_272, %c0_273, %c0_274] : memref<6x128x128xf32, #tpu.memory_space<vmem>>, vector<1x128x128xf32>
    %299 = vector.shape_cast %298 : vector<1x128x128xf32> to vector<128x128xf32>
    %cst_275 = arith.constant dense<0.000000e+00> : vector<2x128xf32>
    %300 = tpu.matmul %297, %299, %cst_275 {dimension_numbers = #tpu.dot_dimension_numbers<[1], [0], [0], [1], [0, 0, 1, 1], [], []>} : vector<2x128xf32>, vector<128x128xf32>, vector<2x128xf32> -> vector<2x128xf32>
    %301 = arith.addf %296, %300 : vector<2x128xf32>
    %302 = vector.extract_strided_slice %282 {offsets = [4, 0], sizes = [2, 128], strides = [1, 1]} : vector<7x128xf32> to vector<2x128xf32>
    %c4_276 = arith.constant 4 : index
    %c0_277 = arith.constant 0 : index
    %c0_278 = arith.constant 0 : index
    %303 = vector.load %arg17[%c4_276, %c0_277, %c0_278] : memref<6x128x128xf32, #tpu.memory_space<vmem>>, vector<1x128x128xf32>
    %304 = vector.shape_cast %303 : vector<1x128x128xf32> to vector<128x128xf32>
    %cst_279 = arith.constant dense<0.000000e+00> : vector<2x128xf32>
    %305 = tpu.matmul %302, %304, %cst_279 {dimension_numbers = #tpu.dot_dimension_numbers<[1], [0], [0], [1], [0, 0, 1, 1], [], []>} : vector<2x128xf32>, vector<128x128xf32>, vector<2x128xf32> -> vector<2x128xf32>
    %306 = arith.addf %301, %305 : vector<2x128xf32>
    %307 = vector.extract_strided_slice %282 {offsets = [5, 0], sizes = [2, 128], strides = [1, 1]} : vector<7x128xf32> to vector<2x128xf32>
    %c5_280 = arith.constant 5 : index
    %c0_281 = arith.constant 0 : index
    %c0_282 = arith.constant 0 : index
    %308 = vector.load %arg17[%c5_280, %c0_281, %c0_282] : memref<6x128x128xf32, #tpu.memory_space<vmem>>, vector<1x128x128xf32>
    %309 = vector.shape_cast %308 : vector<1x128x128xf32> to vector<128x128xf32>
    %cst_283 = arith.constant dense<0.000000e+00> : vector<2x128xf32>
    %310 = tpu.matmul %307, %309, %cst_283 {dimension_numbers = #tpu.dot_dimension_numbers<[1], [0], [0], [1], [0, 0, 1, 1], [], []>} : vector<2x128xf32>, vector<128x128xf32>, vector<2x128xf32> -> vector<2x128xf32>
    %311 = arith.addf %306, %310 : vector<2x128xf32>
    %c0_284 = arith.constant 0 : index
    %c0_285 = arith.constant 0 : index
    %312 = vector.load %arg18[%c0_284, %c0_285] : memref<1x128xf32, #tpu.memory_space<vmem>>, vector<1x128xf32>
    %313 = vector.broadcast %312 : vector<1x128xf32> to vector<2x128xf32>
    %314 = arith.addf %311, %313 : vector<2x128xf32>
    %cst_286 = arith.constant 0.000000e+00 : f32
    %315 = vector.broadcast %cst_286 : f32 to vector<2x128xf32>
    %316 = arith.maximumf %314, %315 : vector<2x128xf32>
    %c0_287 = arith.constant 0 : index
    %c0_288 = arith.constant 0 : index
    %317 = vector.load %arg22[%c0_287, %c0_288] : memref<2x128xf32, #tpu.memory_space<vmem>>, vector<2x128xf32>
    tpu.vector_store %arg22[%c0_287, %c0_288], %316 {strides = array<i32>} : memref<2x128xf32, #tpu.memory_space<vmem>>, vector<2x128xf32>,
    %c0_289 = arith.constant 0 : index
    %c0_290 = arith.constant 0 : index
    %318 = tpu.strided_load %arg22[%c0_289, %c0_290] {strides = array<i32: 2, 1>} : memref<2x128xf32, #tpu.memory_space<vmem>>, vector<1x128xf32>
    %c1_291 = arith.constant 1 : index
    %c0_292 = arith.constant 0 : index
    %319 = tpu.strided_load %arg22[%c1_291, %c0_292] {strides = array<i32: 2, 1>} : memref<2x128xf32, #tpu.memory_space<vmem>>, vector<1x128xf32>
    %320 = arith.maximumf %318, %319 : vector<1x128xf32>
    %c0_293 = arith.constant 0 : index
    %c0_294 = arith.constant 0 : index
    %c0_295 = arith.constant 0 : index
    %321 = vector.load %arg20[%c0_293, %c0_294, %c0_295] : memref<1x1x128xf32, #tpu.memory_space<vmem>>, vector<1x1x128xf32>
    %322 = vector.shape_cast %321 : vector<1x1x128xf32> to vector<1x128xf32>
    %323 = vector.shape_cast %320 : vector<1x128xf32> to vector<1x1x128xf32>
    tpu.vector_store %arg20[%c0_293, %c0_294, %c0_295], %323 {strides = array<i32>} : memref<1x1x128xf32, #tpu.memory_space<vmem>>, vector<1x1x128xf32>,
    return
  }
  func.func @transform_0(%arg0: i32) -> (i32, i32, i32, i32) {
    %c0_i32 = arith.constant 0 : i32
    %c0_i32_0 = arith.constant 0 : i32
    %c0_i32_1 = arith.constant 0 : i32
    %c0_i32_2 = arith.constant 0 : i32
    return %arg0, %c0_i32, %c0_i32_0, %c0_i32_1 : i32, i32, i32, i32
  }
  func.func @transform_1(%arg0: i32) -> (i32, i32) {
    %c0_i32 = arith.constant 0 : i32
    %c0_i32_0 = arith.constant 0 : i32
    %c0_i32_1 = arith.constant 0 : i32
    return %c0_i32, %c0_i32_0 : i32, i32
  }
  func.func @transform_2(%arg0: i32) -> (i32, i32) {
    %c0_i32 = arith.constant 0 : i32
    %c0_i32_0 = arith.constant 0 : i32
    %c0_i32_1 = arith.constant 0 : i32
    return %c0_i32, %c0_i32_0 : i32, i32
  }
  func.func @transform_3(%arg0: i32) -> (i32, i32, i32) {
    %c0_i32 = arith.constant 0 : i32
    %c0_i32_0 = arith.constant 0 : i32
    %c0_i32_1 = arith.constant 0 : i32
    %c0_i32_2 = arith.constant 0 : i32
    return %c0_i32, %c0_i32_0, %c0_i32_1 : i32, i32, i32
  }
  func.func @transform_4(%arg0: i32) -> (i32, i32) {
    %c0_i32 = arith.constant 0 : i32
    %c0_i32_0 = arith.constant 0 : i32
    %c0_i32_1 = arith.constant 0 : i32
    return %c0_i32, %c0_i32_0 : i32, i32
  }
  func.func @transform_5(%arg0: i32) -> (i32, i32, i32) {
    %c0_i32 = arith.constant 0 : i32
    %c0_i32_0 = arith.constant 0 : i32
    %c0_i32_1 = arith.constant 0 : i32
    %c0_i32_2 = arith.constant 0 : i32
    return %c0_i32, %c0_i32_0, %c0_i32_1 : i32, i32, i32
  }
  func.func @transform_6(%arg0: i32) -> (i32, i32) {
    %c0_i32 = arith.constant 0 : i32
    %c0_i32_0 = arith.constant 0 : i32
    %c0_i32_1 = arith.constant 0 : i32
    return %c0_i32, %c0_i32_0 : i32, i32
  }
  func.func @transform_7(%arg0: i32) -> (i32, i32, i32) {
    %c0_i32 = arith.constant 0 : i32
    %c0_i32_0 = arith.constant 0 : i32
    %c0_i32_1 = arith.constant 0 : i32
    %c0_i32_2 = arith.constant 0 : i32
    return %c0_i32, %c0_i32_0, %c0_i32_1 : i32, i32, i32
  }
  func.func @transform_8(%arg0: i32) -> (i32, i32) {
    %c0_i32 = arith.constant 0 : i32
    %c0_i32_0 = arith.constant 0 : i32
    %c0_i32_1 = arith.constant 0 : i32
    return %c0_i32, %c0_i32_0 : i32, i32
  }
  func.func @transform_9(%arg0: i32) -> (i32, i32, i32, i32) {
    %c0_i32 = arith.constant 0 : i32
    %c0_i32_0 = arith.constant 0 : i32
    %c0_i32_1 = arith.constant 0 : i32
    %c0_i32_2 = arith.constant 0 : i32
    return %arg0, %c0_i32, %c0_i32_0, %c0_i32_1 : i32, i32, i32, i32
  }
  func.func @transform_10(%arg0: i32) -> (i32, i32) {
    %c0_i32 = arith.constant 0 : i32
    %c0_i32_0 = arith.constant 0 : i32
    %c0_i32_1 = arith.constant 0 : i32
    return %c0_i32, %c0_i32_0 : i32, i32
  }
  func.func @transform_11(%arg0: i32) -> (i32, i32) {
    %c0_i32 = arith.constant 0 : i32
    %c0_i32_0 = arith.constant 0 : i32
    %c0_i32_1 = arith.constant 0 : i32
    return %c0_i32, %c0_i32_0 : i32, i32
  }
  func.func @transform_12(%arg0: i32) -> (i32, i32, i32) {
    %c0_i32 = arith.constant 0 : i32
    %c0_i32_0 = arith.constant 0 : i32
    %c0_i32_1 = arith.constant 0 : i32
    %c0_i32_2 = arith.constant 0 : i32
    return %c0_i32, %c0_i32_0, %c0_i32_1 : i32, i32, i32
  }
  func.func @transform_13(%arg0: i32) -> (i32, i32) {
    %c0_i32 = arith.constant 0 : i32
    %c0_i32_0 = arith.constant 0 : i32
    %c0_i32_1 = arith.constant 0 : i32
    return %c0_i32, %c0_i32_0 : i32, i32
  }
  func.func @transform_14(%arg0: i32) -> (i32, i32, i32) {
    %c0_i32 = arith.constant 0 : i32
    %c0_i32_0 = arith.constant 0 : i32
    %c0_i32_1 = arith.constant 0 : i32
    %c0_i32_2 = arith.constant 0 : i32
    return %c0_i32, %c0_i32_0, %c0_i32_1 : i32, i32, i32
  }
  func.func @transform_15(%arg0: i32) -> (i32, i32) {
    %c0_i32 = arith.constant 0 : i32
    %c0_i32_0 = arith.constant 0 : i32
    %c0_i32_1 = arith.constant 0 : i32
    return %c0_i32, %c0_i32_0 : i32, i32
  }
  func.func @transform_16(%arg0: i32) -> (i32, i32, i32) {
    %c0_i32 = arith.constant 0 : i32
    %c0_i32_0 = arith.constant 0 : i32
    %c0_i32_1 = arith.constant 0 : i32
    %c0_i32_2 = arith.constant 0 : i32
    return %c0_i32, %c0_i32_0, %c0_i32_1 : i32, i32, i32
  }
  func.func @transform_17(%arg0: i32) -> (i32, i32) {
    %c0_i32 = arith.constant 0 : i32
    %c0_i32_0 = arith.constant 0 : i32
    %c0_i32_1 = arith.constant 0 : i32
    return %c0_i32, %c0_i32_0 : i32, i32
  }
  func.func @transform_18(%arg0: i32) -> (i32, i32, i32) {
    %c0_i32 = arith.constant 0 : i32
    %c0_i32_0 = arith.constant 0 : i32
    %c0_i32_1 = arith.constant 0 : i32
    return %arg0, %c0_i32, %c0_i32_0 : i32, i32, i32
  }
  func.func @transform_19(%arg0: i32) -> (i32, i32, i32) {
    %c0_i32 = arith.constant 0 : i32
    %c0_i32_0 = arith.constant 0 : i32
    %c0_i32_1 = arith.constant 0 : i32
    return %arg0, %c0_i32, %c0_i32_0 : i32, i32, i32
  }
}

</mosaic_0001>

<bundles_post_ra>
// kernel: deepsleepnet_feature.1
= control target key start
LH: loop header
LB: loop body
LE: loop exit
PB: predicated region body
PF: predicated region fallthrough
CT: control target
= control target key end

     0   :  { %s8449_s0 = inlined_call_operand.vmem [shape: f32[2,8,61,50], index: 0, kind: input, shape index: {}]   ;;  %s8450_s1 = inlined_call_operand.vmem [shape: f32[50,64], index: 1, kind: input, shape index: {}]   ;;  %s8451_s2 = inlined_call_operand.vmem [shape: f32[1,64], index: 2, kind: input, shape index: {}]   ;;  %s8452_s3 = inlined_call_operand.vmem [shape: f32[8,64,128], index: 3, kind: input, shape index: {}]   ;;  %s8453_s4 = inlined_call_operand.vmem [shape: f32[1,128], index: 4, kind: input, shape index: {}]   ;;  %s8454_s5 = inlined_call_operand.vmem [shape: f32[8,128,128], index: 5, kind: input, shape index: {}]   ;;  %s8455_s6 = inlined_call_operand.vmem [shape: f32[1,128], index: 6, kind: input, shape index: {}]   ;;  %s8456_s7 = inlined_call_operand.vmem [shape: f32[8,128,128], index: 7, kind: input, shape index: {}]   ;;  %s8457_s8 = inlined_call_operand.vmem [shape: f32[1,128], index: 8, kind: input, shape index: {}]   ;;  %s8458_s9 = inlined_call_operand.vmem [shape: f32[2,4,13,400], index: 9, kind: input, shape index: {}]   ;;  %s8459_s10 = inlined_call_operand.vmem [shape: f32[400,64], index: 10, kind: input, shape index: {}]   ;;  %s8460_s11 = inlined_call_operand.vmem [shape: f32[1,64], index: 11, kind: input, shape index: {}]   ;;  %s8461_s12 = inlined_call_operand.vmem [shape: f32[6,64,128], index: 12, kind: input, shape index: {}]   ;;  %s8462_s13 = inlined_call_operand.vmem [shape: f32[1,128], index: 13, kind: input, shape index: {}]   ;;  %s8463_s14 = inlined_call_operand.vmem [shape: f32[6,128,128], index: 14, kind: input, shape index: {}]   ;;  %s8464_s15 = inlined_call_operand.vmem [shape: f32[1,128], index: 15, kind: input, shape index: {}]   ;;  %s8465_s16 = inlined_call_operand.vmem [shape: f32[6,128,128], index: 16, kind: input, shape index: {}]   ;;  %s8466_s17 = inlined_call_operand.vmem [shape: f32[1,128], index: 17, kind: input, shape index: {}]   ;;  %s8467_s18 = inlined_call_operand.vmem [shape: f32[2,10,128], index: 18, kind: output, shape index: {0}]   ;;  %s8468_s19 = inlined_call_operand.vmem [shape: f32[2,1,128], index: 19, kind: output, shape index: {1}]  }
   0x1   :  { %8471 = sst [smem:[#allocation5_spill]] %s8449_s0  ;;  %s5293_s0 = smov 0  }
   0x2   :  { %8472 = sst [smem:[#allocation6_spill]] %s8450_s1 }
   0x3   :  { %8473 = sst [smem:[#allocation7_spill]] %s8451_s2 }
   0x4   :  { %8474 = sst [smem:[#allocation8_spill]] %s8452_s3 }
   0x5 LB: > { %s4449_s30 = sadd.s32 4294967295, %s5190_s0   ;;  %p4453_p0 = scmp.ge.s32.totalorder %s5190_s0, 1  ;;  %s5190_s0 = sphi %s5293_s0, %s30_s0  }
   0x6   : > { %p550_p1 = scmp.lt.s32.totalorder %s5190_s0, 3 }
   0x8   : > { %p551_p2 = pnand %p4453_p0, %p550_p1 }
   0x9   : > { %s8475_s1 = sld [smem:[#allocation6_spill]] (!%p551_p2)  ;;  %p614_p3 = scmp.lt.s32.totalorder (!%p551_p2), %s4449_s30, 1 }
   0xa   : > { %554 = sbr.rel (%p551_p2) target bundleno = 1409 (0x581), region = 92  ;;  %s8476_s2 = sld [smem:[#allocation5_spill]] (!%p551_p2) }
   0xb   : > { %s8477_s27 = sld [smem:[#allocation8_spill]] (!%p551_p2) }
   0xc   : > { %s8478_s3 = sld [smem:[#allocation7_spill]] (!%p551_p2) }
   0xf   : > { %v646_v0 = vld [vmem:[%s8475_s1 + $0x30] sm:$0x3]  ;;  %vm672_vm0 = vcmask 1041408   ;;  %v645_v1 = vld [vmem:[%s8475_s1 + $0x28] sm:$0xff]  ;;  %v644_v2 = vld [vmem:[%s8475_s1 + $0x20] sm:$0xff]  ;;  %s8480_s30 = smov (!%p614_p3, %s4449_s30), 1 }
  0x10   : > { %4460 = vmatpush.msk.msra.mxu0 %vm672_vm0, %v646_v0  ;;  %4494 = vmatpush.msk.msra.mxu2 %vm672_vm0, %v646_v0  ;;  %v643_v3 = vld [vmem:[%s8475_s1 + $0x18] sm:$0xff]  ;;  %s5164_s26 = sshll.u32 %s8480_s30, 9  ;;  %v642_v4 = vld [vmem:[%s8475_s1 + $0x10] sm:$0xff]  ;;  %v5326_v5 = vld [vmem:[%s8475_s1 + $0x8] sm:$0xff]  ;;  %vm647_vm1 = vcmask 408576   ;;  %vm1349_vm2 = vcmask 523264   ;;  %s631_s20 = scalar_lea.vmem %s8468_s19, %s8480_s30 }
  0x11   : > { %4477 = vmatpush.msk.msra.mxu1 %vm672_vm0, %v646_v0  ;;  %4511 = vmatpush.msk.msra.mxu3 %vm672_vm0, %v646_v0  ;;  %s5331_s23 = scalar_lea.vmem %s8476_s2, %s5164_s26  ;;  %v640_v6 = vld [vmem:[%s8475_s1] sm:$0xff]  ;;  %vm1335_vm3 = vcmask 1046528   ;;  %vm1463_vm4 = vcmask 1045504   ;;  %vm1546_vm5 = vcmask 1044480   ;;  %vm1714_vm6 = vcmask 1042432   ;;  %s5165_s25 = sshll.u32 %s8480_s30, 8 }
  0x12   : > { %686 = vmatpush.msra.mxu0 %v645_v1  ;;  %842 = vmatpush.msra.mxu2 %v645_v1  ;;  %v632_v7 = vld [vmem:[%s5331_s23] sm:$0xff]  ;;  %v633_v11 = vld [vmem:[%s5331_s23 + $0x8] sm:$0xff]  ;;  %v634_v15 = vld [vmem:[%s5331_s23 + $0x10] sm:$0xff]  ;;  %vm1630_vm7 = vcmask 1043456   ;;  %vm1881_vm8 = vcmask 1040384   ;;  %s7455_s28 = scalar_lea.vmem %s8458_s9, %s5165_s25  ;;  %vm3218_vm9 = vcmask 130048  }
  0x13   : > { %760 = vmatpush.msra.mxu1 %v645_v1  ;;  %924 = vmatpush.msra.mxu3 %v645_v1  ;;  %v4486_v8 = vld [vmem:[%s5331_s23 + $0x80] sm:$0xff]  ;;  %v4487_v12 = vld [vmem:[%s5331_s23 + $0x88] sm:$0xff]  ;;  %v4488_v16 = vld [vmem:[%s5331_s23 + $0x90] sm:$0xff]  ;;  %s5166_s21 = sshll.u32 %s8480_s30, 4 }
  0x14   : > { %687 = vmatpush.msra.mxu0 %v644_v2  ;;  %843 = vmatpush.msra.mxu2 %v644_v2  ;;  %v4469_v9 = vld [vmem:[%s5331_s23 + $0x40] sm:$0xff]  ;;  %v4470_v13 = vld [vmem:[%s5331_s23 + $0x48] sm:$0xff]  ;;  %v4471_v17 = vld [vmem:[%s5331_s23 + $0x50] sm:$0xff] }
  0x15   : > { %761 = vmatpush.msra.mxu1 %v644_v2  ;;  %925 = vmatpush.msra.mxu3 %v644_v2  ;;  %v4503_v10 = vld [vmem:[%s5331_s23 + $0xc0] sm:$0xff]  ;;  %v4504_v14 = vld [vmem:[%s5331_s23 + $0xc8] sm:$0xff]  ;;  %v4505_v18 = vld [vmem:[%s5331_s23 + $0xd0] sm:$0xff] }
  0x16   : > { %688 = vmatpush.msra.mxu0 %v643_v3  ;;  %844 = vmatpush.msra.mxu2 %v643_v3  ;;  %v635_v19 = vld [vmem:[%s5331_s23 + $0x18] sm:$0xff]  ;;  %v636_v23 = vld [vmem:[%s5331_s23 + $0x20] sm:$0xff]  ;;  %v637_v27 = vld [vmem:[%s5331_s23 + $0x28] sm:$0xff] }
  0x17   : > { %762 = vmatpush.msra.mxu1 %v643_v3  ;;  %926 = vmatpush.msra.mxu3 %v643_v3  ;;  %v4489_v20 = vld [vmem:[%s5331_s23 + $0x98] sm:$0xff]  ;;  %v4490_v24 = vld [vmem:[%s5331_s23 + $0xa0] sm:$0xff]  ;;  %v4491_v28 = vld [vmem:[%s5331_s23 + $0xa8] sm:$0xff] }
  0x18   : > { %689 = vmatpush.msra.mxu0 %v642_v4  ;;  %845 = vmatpush.msra.mxu2 %v642_v4  ;;  %v4472_v21 = vld [vmem:[%s5331_s23 + $0x58] sm:$0xff]  ;;  %v4473_v25 = vld [vmem:[%s5331_s23 + $0x60] sm:$0xff]  ;;  %v4474_v29 = vld [vmem:[%s5331_s23 + $0x68] sm:$0xff] }
  0x19   : > { %763 = vmatpush.msra.mxu1 %v642_v4  ;;  %927 = vmatpush.msra.mxu3 %v642_v4  ;;  %v4506_v22 = vld [vmem:[%s5331_s23 + $0xd8] sm:$0xff]  ;;  %v4507_v26 = vld [vmem:[%s5331_s23 + $0xe0] sm:$0xff]  ;;  %v4508_v30 = vld [vmem:[%s5331_s23 + $0xe8] sm:$0xff] }
  0x1a   : > { %690 = vmatpush.msra.mxu0 %v5326_v5  ;;  %846 = vmatpush.msra.mxu2 %v5326_v5  ;;  %v638_v31 = vld [vmem:[%s5331_s23 + $0x30] sm:$0xff]  ;;  %v639_v35 = vld [vmem:[%s5331_s23 + $0x38] sm:$0x1f]  ;;  %v4520_v39 = vld [vmem:[%s5331_s23 + $0x100] sm:$0xff] }
  0x1b   : > { %764 = vmatpush.msra.mxu1 %v5326_v5  ;;  %928 = vmatpush.msra.mxu3 %v5326_v5  ;;  %v4492_v32 = vld [vmem:[%s5331_s23 + $0xb0] sm:$0xff]  ;;  %v4493_v36 = vld [vmem:[%s5331_s23 + $0xb8] sm:$0x1f]  ;;  %v4554_v40 = vld [vmem:[%s5331_s23 + $0x180] sm:$0xff] }
  0x1c   : > { %691 = vmatpush.msra.mxu0 %v640_v6  ;;  %847 = vmatpush.msra.mxu2 %v640_v6  ;;  %v4475_v33 = vld [vmem:[%s5331_s23 + $0x70] sm:$0xff]  ;;  %v4476_v37 = vld [vmem:[%s5331_s23 + $0x78] sm:$0x1f]  ;;  %v4537_v41 = vld [vmem:[%s5331_s23 + $0x140] sm:$0xff] }
  0x1d   : > { %4461 = vmatmul.msk.f32.vlgmr.msra.gmra.mxu0 %vm647_vm1, %v632_v7  ;;  %4495 = vmatmul.msk.f32.vlgmr.msra.gmra.mxu2 %vm647_vm1, %v4486_v8  ;;  %v4509_v34 = vld [vmem:[%s5331_s23 + $0xf0] sm:$0xff]  ;;  %v4510_v38 = vld [vmem:[%s5331_s23 + $0xf8] sm:$0x1f]  ;;  %v4571_v42 = vld [vmem:[%s5331_s23 + $0x1c0] sm:$0xff] }
  0x1e   : > { %765 = vmatpush.msra.mxu1 %v640_v6  ;;  %929 = vmatpush.msra.mxu3 %v640_v6  ;;  %v4521_v43 = vld [vmem:[%s5331_s23 + $0x108] sm:$0xff]  ;;  %v4522_v47 = vld [vmem:[%s5331_s23 + $0x110] sm:$0xff]  ;;  %v4523_v51 = vld [vmem:[%s5331_s23 + $0x118] sm:$0xff] }
  0x1f   : > { %4478 = vmatmul.msk.f32.vlgmr.msra.gmra.mxu1 %vm647_vm1, %v4469_v9  ;;  %4512 = vmatmul.msk.f32.vlgmr.msra.gmra.mxu3 %vm647_vm1, %v4503_v10  ;;  %v4555_v44 = vld [vmem:[%s5331_s23 + $0x188] sm:$0xff]  ;;  %v4556_v48 = vld [vmem:[%s5331_s23 + $0x190] sm:$0xff]  ;;  %v4557_v52 = vld [vmem:[%s5331_s23 + $0x198] sm:$0xff] }
  0x20   : > { %4562 = vmatpush.msk.msrb.mxu2 %vm672_vm0, %v646_v0  ;;  %4528 = vmatpush.msk.msrb.mxu0 %vm672_vm0, %v646_v0  ;;  %v4538_v45 = vld [vmem:[%s5331_s23 + $0x148] sm:$0xff]  ;;  %v4539_v49 = vld [vmem:[%s5331_s23 + $0x150] sm:$0xff]  ;;  %v4540_v53 = vld [vmem:[%s5331_s23 + $0x158] sm:$0xff] }
  0x21   : > { %4579 = vmatpush.msk.msrb.mxu3 %vm672_vm0, %v646_v0  ;;  %4545 = vmatpush.msk.msrb.mxu1 %vm672_vm0, %v646_v0  ;;  %v4572_v46 = vld [vmem:[%s5331_s23 + $0x1c8] sm:$0xff]  ;;  %v4573_v50 = vld [vmem:[%s5331_s23 + $0x1d0] sm:$0xff]  ;;  %v4574_v54 = vld [vmem:[%s5331_s23 + $0x1d8] sm:$0xff] }
  0x22   : > { %1170 = vmatpush.msrb.mxu2 %v645_v1  ;;  %1006 = vmatpush.msrb.mxu0 %v645_v1  ;;  %v4524_v55 = vld [vmem:[%s5331_s23 + $0x120] sm:$0xff]  ;;  %v4525_v59 = vld [vmem:[%s5331_s23 + $0x128] sm:$0xff]  ;;  %v4526_v63 = vld [vmem:[%s5331_s23 + $0x130] sm:$0xff] }
  0x23   : > { %1252 = vmatpush.msrb.mxu3 %v645_v1  ;;  %1088 = vmatpush.msrb.mxu1 %v645_v1  ;;  %v4558_v56 = vld [vmem:[%s5331_s23 + $0x1a0] sm:$0xff]  ;;  %v4559_v60 = vld [vmem:[%s5331_s23 + $0x1a8] sm:$0xff]  ;;  %v4560_v0 = vld [vmem:[%s5331_s23 + $0x1b0] sm:$0xff] }
  0x24   : > { %1171 = vmatpush.msrb.mxu2 %v644_v2  ;;  %1007 = vmatpush.msrb.mxu0 %v644_v2  ;;  %v4541_v57 = vld [vmem:[%s5331_s23 + $0x160] sm:$0xff]  ;;  %v4542_v61 = vld [vmem:[%s5331_s23 + $0x168] sm:$0xff]  ;;  %v4543_v1 = vld [vmem:[%s5331_s23 + $0x170] sm:$0xff] }
  0x25   : > { %4462 = vmatmul.msk.f32.gmra.mxu0 %vm647_vm1, %v633_v11  ;;  %4496 = vmatmul.msk.f32.gmra.mxu2 %vm647_vm1, %v4487_v12  ;;  %v4575_v58 = vld [vmem:[%s5331_s23 + $0x1e0] sm:$0xff]  ;;  %v4576_v62 = vld [vmem:[%s5331_s23 + $0x1e8] sm:$0xff]  ;;  %v4617_v12 = vld [vmem:[%s8477_s27 + $0xb8] sm:$0xff] }
  0x26   : > { %1253 = vmatpush.msrb.mxu3 %v644_v2  ;;  %1089 = vmatpush.msrb.mxu1 %v644_v2  ;;  %v4577_v2 = vld [vmem:[%s5331_s23 + $0x1f0] sm:$0xff] }
  0x27   : > { %4479 = vmatmul.msk.f32.gmra.mxu1 %vm647_vm1, %v4470_v13  ;;  %4513 = vmatmul.msk.f32.gmra.mxu3 %vm647_vm1, %v4504_v14  ;;  %v4595_v14 = vld [vmem:[%s8477_s27 + $0x78] sm:$0xff] }
  0x28   : > { %1172 = vmatpush.msrb.mxu2 %v643_v3  ;;  %1008 = vmatpush.msrb.mxu0 %v643_v3 }
  0x29   : > { %1254 = vmatpush.msrb.mxu3 %v643_v3  ;;  %1090 = vmatpush.msrb.mxu1 %v643_v3  ;;  %v4527_v3 = vld [vmem:[%s5331_s23 + $0x138] sm:$0x1f] }
  0x2a   : > { %1173 = vmatpush.msrb.mxu2 %v642_v4  ;;  %1009 = vmatpush.msrb.mxu0 %v642_v4 }
  0x2b   : > { %1255 = vmatpush.msrb.mxu3 %v642_v4  ;;  %1091 = vmatpush.msrb.mxu1 %v642_v4  ;;  %v4561_v4 = vld [vmem:[%s5331_s23 + $0x1b8] sm:$0x1f] }
  0x2c   : > { %1174 = vmatpush.msrb.mxu2 %v5326_v5  ;;  %1010 = vmatpush.msrb.mxu0 %v5326_v5 }
  0x2d   : > { %4463 = vmatmul.msk.f32.gmra.mxu0 %vm647_vm1, %v634_v15  ;;  %4497 = vmatmul.msk.f32.gmra.mxu2 %vm647_vm1, %v4488_v16  ;;  %v4632_v15 = vld [vmem:[%s8477_s27 + $0xf8] sm:$0xff] }
  0x2e   : > { %1256 = vmatpush.msrb.mxu3 %v5326_v5  ;;  %1011 = vmatpush.msrb.mxu0 %v640_v6  ;;  %v1318_v16 = vld [vmem:[%s8477_s27 + $0x38] sm:$0xff] }
  0x2f   : > { %4480 = vmatmul.msk.f32.gmra.mxu1 %vm647_vm1, %v4471_v17  ;;  %4514 = vmatmul.msk.f32.gmra.mxu3 %vm647_vm1, %v4505_v18 }
  0x30   : > { %1092 = vmatpush.msrb.mxu1 %v5326_v5  ;;  %1175 = vmatpush.msrb.mxu2 %v640_v6  ;;  %v4544_v5 = vld [vmem:[%s5331_s23 + $0x178] sm:$0x1f] }
  0x31   : > { %1257 = vmatpush.msrb.mxu3 %v640_v6  ;;  %1372 = vmatpush.msra.mxu0 %v4595_v14 }
  0x32   : > { %1093 = vmatpush.msrb.mxu1 %v640_v6  ;;  %v4578_v6 = vld [vmem:[%s5331_s23 + $0x1f8] sm:$0x1f]  ;;  %1499 = vmatpush.msra.mxu2 %v4617_v12  ;;  %s628_s23 = scalar_lea.vmem %s8467_s18, %s5166_s21 }
  0x33   : > { %1584 = vmatpush.msra.mxu3 %v4632_v15 }
  0x34   : > { %1424 = vmatpush.msra.mxu1 %v1318_v16 }
  0x35   : > { %4464 = vmatmul.msk.f32.gmra.mxu0 %vm647_vm1, %v635_v19  ;;  %4498 = vmatmul.msk.f32.gmra.mxu2 %vm647_vm1, %v4489_v20  ;;  %v4616_v20 = vld [vmem:[%s8477_s27 + $0xb0] sm:$0xff] }
  0x36   : > { %1500 = vmatpush.msra.mxu2 %v4616_v20 }
  0x37   : > { %4481 = vmatmul.msk.f32.gmra.mxu1 %vm647_vm1, %v4472_v21  ;;  %4515 = vmatmul.msk.f32.gmra.mxu3 %vm647_vm1, %v4506_v22  ;;  %v4594_v22 = vld [vmem:[%s8477_s27 + $0x70] sm:$0xff] }
  0x38   : > { %1373 = vmatpush.msra.mxu0 %v4594_v22 }
  0x3d   : > { %4465 = vmatmul.msk.f32.gmra.mxu0 %vm647_vm1, %v636_v23  ;;  %4499 = vmatmul.msk.f32.gmra.mxu2 %vm647_vm1, %v4490_v24  ;;  %v4631_v23 = vld [vmem:[%s8477_s27 + $0xf0] sm:$0xff] }
  0x3e   : > { %v1317_v24 = vld [vmem:[%s8477_s27 + $0x30] sm:$0xff]  ;;  %1585 = vmatpush.msra.mxu3 %v4631_v23 }
  0x3f   : > { %4482 = vmatmul.msk.f32.gmra.mxu1 %vm647_vm1, %v4473_v25  ;;  %4516 = vmatmul.msk.f32.gmra.mxu3 %vm647_vm1, %v4507_v26 }
  0x40   : > { %1425 = vmatpush.msra.mxu1 %v1317_v24 }
  0x45   : > { %4466 = vmatmul.msk.f32.gmra.mxu0 %vm647_vm1, %v637_v27  ;;  %4500 = vmatmul.msk.f32.gmra.mxu2 %vm647_vm1, %v4491_v28  ;;  %v4615_v28 = vld [vmem:[%s8477_s27 + $0xa8] sm:$0xff] }
  0x46   : > { %1501 = vmatpush.msra.mxu2 %v4615_v28 }
  0x47   : > { %4483 = vmatmul.msk.f32.gmra.mxu1 %vm647_vm1, %v4474_v29  ;;  %4517 = vmatmul.msk.f32.gmra.mxu3 %vm647_vm1, %v4508_v30  ;;  %v4593_v30 = vld [vmem:[%s8477_s27 + $0x68] sm:$0xff] }
  0x48   : > { %1374 = vmatpush.msra.mxu0 %v4593_v30 }
  0x4d   : > { %4467 = vmatmul.msk.f32.gmra.mxu0 %vm647_vm1, %v638_v31  ;;  %4501 = vmatmul.msk.f32.gmra.mxu2 %vm647_vm1, %v4492_v32  ;;  %v4630_v31 = vld [vmem:[%s8477_s27 + $0xe8] sm:$0xff] }
  0x4e   : > { %v1316_v32 = vld [vmem:[%s8477_s27 + $0x28] sm:$0xff]  ;;  %1586 = vmatpush.msra.mxu3 %v4630_v31 }
  0x4f   : > { %4484 = vmatmul.msk.f32.gmra.mxu1 %vm647_vm1, %v4475_v33  ;;  %4518 = vmatmul.msk.f32.gmra.mxu3 %vm647_vm1, %v4509_v34 }
  0x50   : > { %1426 = vmatpush.msra.mxu1 %v1316_v32 }
  0x55   : > { %4468 = vmatmul.msk.f32.gmra.mxu0 %vm647_vm1, %v639_v35  ;;  %4502 = vmatmul.msk.f32.gmra.mxu2 %vm647_vm1, %v4493_v36  ;;  %v4614_v36 = vld [vmem:[%s8477_s27 + $0xa0] sm:$0xff] }
  0x56   : > { %1502 = vmatpush.msra.mxu2 %v4614_v36 }
  0x57   : > { %4485 = vmatmul.msk.f32.gmra.mxu1 %vm647_vm1, %v4476_v37  ;;  %4519 = vmatmul.msk.f32.gmra.mxu3 %vm647_vm1, %v4510_v38  ;;  %v4592_v38 = vld [vmem:[%s8477_s27 + $0x60] sm:$0xff] }
  0x58   : > { %1375 = vmatpush.msra.mxu0 %v4592_v38 }
  0x5d   : > { %4529 = vmatmul.msk.f32.vlgmr.msrb.gmra.mxu0 %vm647_vm1, %v4520_v39  ;;  %4563 = vmatmul.msk.f32.vlgmr.msrb.gmra.mxu2 %vm647_vm1, %v4554_v40  ;;  %v4629_v39 = vld [vmem:[%s8477_s27 + $0xe0] sm:$0xff] }
  0x5e   : > { %v1315_v40 = vld [vmem:[%s8477_s27 + $0x20] sm:$0xff]  ;;  %1587 = vmatpush.msra.mxu3 %v4629_v39 }
  0x5f   : > { %4546 = vmatmul.msk.f32.vlgmr.msrb.gmra.mxu1 %vm647_vm1, %v4537_v41  ;;  %4580 = vmatmul.msk.f32.vlgmr.msrb.gmra.mxu3 %vm647_vm1, %v4571_v42  ;;  %v1314_v42 = vld [vmem:[%s8477_s27 + $0x18] sm:$0xff] }
  0x60   : > { %1427 = vmatpush.msra.mxu1 %v1315_v40  ;;  %v4677_v40 = vld [vmem:[%s8477_s27 + $0x1b8] sm:$0xff] }
  0x62   : > { %1428 = vmatpush.msra.mxu1 %v1314_v42  ;;  %v4647_v42 = vld [vmem:[%s8477_s27 + $0x138] sm:$0xff] }
  0x65   : > { %4530 = vmatmul.msk.f32.gmra.mxu0 %vm647_vm1, %v4521_v43  ;;  %4564 = vmatmul.msk.f32.gmra.mxu2 %vm647_vm1, %v4555_v44 }
  0x67   : > { %4547 = vmatmul.msk.f32.gmra.mxu1 %vm647_vm1, %v4538_v45  ;;  %4581 = vmatmul.msk.f32.gmra.mxu3 %vm647_vm1, %v4572_v46  ;;  %v1313_v45 = vld [vmem:[%s8477_s27 + $0x10] sm:$0xff] }
  0x68   : > { %1429 = vmatpush.msra.mxu1 %v1313_v45 }
  0x6d   : > { %4531 = vmatmul.msk.f32.gmra.mxu0 %vm647_vm1, %v4522_v47  ;;  %4565 = vmatmul.msk.f32.gmra.mxu2 %vm647_vm1, %v4556_v48  ;;  %v1312_v47 = vld [vmem:[%s8477_s27 + $0x8] sm:$0xff]  ;;  %v4613_v48 = vld [vmem:[%s8477_s27 + $0x98] sm:$0xff] }
  0x6e   : > { %1430 = vmatpush.msra.mxu1 %v1312_v47  ;;  %1503 = vmatpush.msra.mxu2 %v4613_v48 }
  0x6f   : > { %4548 = vmatmul.msk.f32.gmra.mxu1 %vm647_vm1, %v4539_v49  ;;  %4582 = vmatmul.msk.f32.gmra.mxu3 %vm647_vm1, %v4573_v50  ;;  %v4591_v49 = vld [vmem:[%s8477_s27 + $0x58] sm:$0xff] }
  0x70   : > { %v4628_v50 = vld [vmem:[%s8477_s27 + $0xd8] sm:$0xff]  ;;  %1376 = vmatpush.msra.mxu0 %v4591_v49  ;;  %v4676_v49 = vld [vmem:[%s8477_s27 + $0x1b0] sm:$0xff] }
  0x71   : > { %1588 = vmatpush.msra.mxu3 %v4628_v50 }
  0x75   : > { %4532 = vmatmul.msk.f32.gmra.mxu0 %vm647_vm1, %v4523_v51  ;;  %4566 = vmatmul.msk.f32.gmra.mxu2 %vm647_vm1, %v4557_v52  ;;  %v1311_v52 = vld [vmem:[%s8477_s27] sm:$0xff] }
  0x76   : > { %1431 = vmatpush.msra.mxu1 %v1311_v52 }
  0x77   : > { %4549 = vmatmul.msk.f32.gmra.mxu1 %vm647_vm1, %v4540_v53  ;;  %4583 = vmatmul.msk.f32.gmra.mxu3 %vm647_vm1, %v4574_v54 }
  0x7d   : > { %4533 = vmatmul.msk.f32.gmra.mxu0 %vm647_vm1, %v4524_v55  ;;  %4567 = vmatmul.msk.f32.gmra.mxu2 %vm647_vm1, %v4558_v56  ;;  %v4612_v56 = vld [vmem:[%s8477_s27 + $0x90] sm:$0xff] }
  0x7e   : > { %1504 = vmatpush.msra.mxu2 %v4612_v56 }
  0x7f   : > { %4550 = vmatmul.msk.f32.gmra.mxu1 %vm647_vm1, %v4541_v57  ;;  %4584 = vmatmul.msk.f32.gmra.mxu3 %vm647_vm1, %v4575_v58  ;;  %v4590_v57 = vld [vmem:[%s8477_s27 + $0x50] sm:$0xff] }
  0x80   : > { %v4627_v58 = vld [vmem:[%s8477_s27 + $0xd0] sm:$0xff]  ;;  %1377 = vmatpush.msra.mxu0 %v4590_v57 }
  0x81   : > { %1589 = vmatpush.msra.mxu3 %v4627_v58 }
  0x85   : > { %4534 = vmatmul.msk.f32.gmra.mxu0 %vm647_vm1, %v4525_v59  ;;  %4568 = vmatmul.msk.f32.gmra.mxu2 %vm647_vm1, %v4559_v60  ;;  %v4589_v60 = vld [vmem:[%s8477_s27 + $0x48] sm:$0xff] }
  0x86   : > { %1378 = vmatpush.msra.mxu0 %v4589_v60 }
  0x87   : > { %4551 = vmatmul.msk.f32.gmra.mxu1 %vm647_vm1, %v4542_v61  ;;  %4585 = vmatmul.msk.f32.gmra.mxu3 %vm647_vm1, %v4576_v62  ;;  %v4611_v61 = vld [vmem:[%s8477_s27 + $0x88] sm:$0xff] }
  0x88   : > { %v4626_v62 = vld [vmem:[%s8477_s27 + $0xc8] sm:$0xff]  ;;  %1505 = vmatpush.msra.mxu2 %v4611_v61 }
  0x89   : > { %1590 = vmatpush.msra.mxu3 %v4626_v62  ;;  %v4646_v62 = vld [vmem:[%s8477_s27 + $0x130] sm:$0xff] }
  0x8d   : > { %4535 = vmatmul.msk.f32.gmra.mxu0 %vm647_vm1, %v4526_v63  ;;  %4569 = vmatmul.msk.f32.gmra.mxu2 %vm647_vm1, %v4560_v0 }
  0x8f   : > { %4552 = vmatmul.msk.f32.gmra.mxu1 %vm647_vm1, %v4543_v1  ;;  %4586 = vmatmul.msk.f32.gmra.mxu3 %vm647_vm1, %v4577_v2  ;;  %v4588_v1 = vld [vmem:[%s8477_s27 + $0x40] sm:$0xff] }
  0x90   : > { %v4610_v2 = vld [vmem:[%s8477_s27 + $0x80] sm:$0xff]  ;;  %1379 = vmatpush.msra.mxu0 %v4588_v1  ;;  %v4691_v1 = vld [vmem:[%s8477_s27 + $0x1f0] sm:$0xff] }
  0x91   : > { %1506 = vmatpush.msra.mxu2 %v4610_v2 }
  0x92   : > { %1668 = vmatpush.msrb.mxu0 %v4647_v42  ;;  %v4659_v42 = vld [vmem:[%s8477_s27 + $0x160] sm:$0xff] }
  0x93   : > { %1835 = vmatpush.msrb.mxu2 %v4677_v40 }
  0x94   : > { %1669 = vmatpush.msrb.mxu0 %v4646_v62 }
  0x95   : > { %4536 = vmatmul.msk.f32.gmra.mxu0 %vm647_vm1, %v4527_v3  ;;  %4570 = vmatmul.msk.f32.gmra.mxu2 %vm647_vm1, %v4561_v4  ;;  %v4625_v3 = vld [vmem:[%s8477_s27 + $0xc0] sm:$0xff] }
  0x96   : > { %1591 = vmatpush.msra.mxu3 %v4625_v3  ;;  %1836 = vmatpush.msrb.mxu2 %v4676_v49 }
  0x97   : > { %4553 = vmatmul.msk.f32.gmra.mxu1 %vm647_vm1, %v4544_v5  ;;  %4587 = vmatmul.msk.f32.gmra.mxu3 %vm647_vm1, %v4578_v6 }
  0x9a   : > { %v5476_v7 = vpop.f32.mrf.mxu0 }
  0x9c   : > { %v5478_v8 = vpop.f32.mrf.mxu1 }
  0x9d   : > { %v791_v4 = vmax.f32 %v5476_v7, %v5478_v8 }
  0xa0   : > { %v5480_v9 = vpop.f32.mrf.mxu2 }
  0xa1   : > { %v873_v6 = vmax.f32 %v791_v4, %v5480_v9  ;;  %v5647_v9 = vld [vmem:[%s8478_s3] ss:$0 sm:$0xff] }
  0xa2   : > { %v5482_v10 = vpop.f32.mrf.mxu0  ;;  %v5484_v11 = vpop.f32.mrf.mxu3 }
  0xa3   : > { %v955_v14 = vmax.f32 %v873_v6, %v5484_v11 }
  0xa4   : > { %v5489_v13 = vpop.f32.mrf.mxu1 }
  0xa5   : > { %v792_v20 = vmax.f32 %v5482_v10, %v5489_v13 }
  0xa8   : > { %v5500_v17 = vpop.f32.mrf.mxu2 }
  0xa9   : > { %v874_v7 = vmax.f32 %v792_v20, %v5500_v17  ;;  %v4675_v20 = vld [vmem:[%s8477_s27 + $0x1a8] sm:$0xff] }
  0xaa   : > { %v5502_v18 = vpop.f32.mrf.mxu0  ;;  %v5504_v19 = vpop.f32.mrf.mxu3  ;;  %1837 = vmatpush.msrb.mxu2 %v4675_v20 }
  0xab   : > { %v956_v28 = vmax.f32 %v874_v7, %v5504_v19 }
  0xac   : > { %v5509_v21 = vpop.f32.mrf.mxu1 }
  0xad   : > { %v793_v32 = vmax.f32 %v5502_v18, %v5509_v21  ;;  %v4692_v18 = vld [vmem:[%s8477_s27 + $0x1f8] sm:$0xff] }
  0xae   : > { %1919 = vmatpush.msrb.mxu3 %v4692_v18 }
  0xb0   : > { %v5520_v25 = vpop.f32.mrf.mxu2  ;;  %1920 = vmatpush.msrb.mxu3 %v4691_v1 }
  0xb1   : > { %v875_v17 = vmax.f32 %v793_v32, %v5520_v25  ;;  %v4662_v25 = vld [vmem:[%s8477_s27 + $0x178] sm:$0xff] }
  0xb2   : > { %v5522_v26 = vpop.f32.mrf.mxu0  ;;  %v5524_v27 = vpop.f32.mrf.mxu3  ;;  %1752 = vmatpush.msrb.mxu1 %v4662_v25 }
  0xb3   : > { %v957_v45 = vmax.f32 %v875_v17, %v5524_v27  ;;  %v4690_v17 = vld [vmem:[%s8477_s27 + $0x1e8] sm:$0xff] }
  0xb4   : > { %v5529_v29 = vpop.f32.mrf.mxu1  ;;  %1921 = vmatpush.msrb.mxu3 %v4690_v17 }
  0xb5   : > { %v794_v47 = vmax.f32 %v5522_v26, %v5529_v29 }
  0xb8   : > { %v5540_v33 = vpop.f32.mrf.mxu2 }
  0xb9   : > { %v876_v56 = vmax.f32 %v794_v47, %v5540_v33  ;;  %v4661_v33 = vld [vmem:[%s8477_s27 + $0x170] sm:$0xff]  ;;  %v4689_v47 = vld [vmem:[%s8477_s27 + $0x1e0] sm:$0xff] }
  0xba   : > { %v5542_v34 = vpop.f32.mrf.mxu0  ;;  %v5544_v35 = vpop.f32.mrf.mxu3  ;;  %1753 = vmatpush.msrb.mxu1 %v4661_v33  ;;  %1922 = vmatpush.msrb.mxu3 %v4689_v47  ;;  %v4673_v33 = vld [vmem:[%s8477_s27 + $0x198] sm:$0xff]  ;;  %v4670_v47 = vld [vmem:[%s8477_s27 + $0x180] sm:$0xff] }
  0xbb   : > { %v958_v29 = vmax.f32 %v876_v56, %v5544_v35 }
  0xbc   : > { %v5549_v37 = vpop.f32.mrf.mxu1 }
  0xc0   : > { %v5560_v41 = vpop.f32.mrf.mxu2 }
  0xc2   : > { %v5565_v43 = vpop.f32.mrf.mxu0  ;;  %v5567_v44 = vpop.f32.mrf.mxu3 }
  0xc4   : > { %v5572_v46 = vpop.f32.mrf.mxu1 }
  0xc8   : > { %v5586_v51 = vpop.f32.mrf.mxu2 }
  0xca   : > { %v5591_v53 = vpop.f32.mrf.mxu0  ;;  %v5593_v54 = vpop.f32.mrf.mxu3 }
  0xcc   : > { %v5595_v55 = vpop.f32.mrf.mxu1 }
  0xd0   : > { %v5606_v59 = vpop.f32.mrf.mxu2 }
  0xd2   : > { %v5617_v63 = vpop.f32.mrf.mxu0  ;;  %v5619_v0 = vpop.f32.mrf.mxu3 }
  0xd4   : > { %v5632_v5 = vpop.f32.mrf.mxu1 }
  0xd8   : > { %v5635_v12 = vpop.f32.mrf.mxu2 }
  0xda   : > { %v5638_v15 = vpop.f32.mrf.mxu3  ;;  %v1013_v16 = vpop.f32.mrf.mxu0 }
  0xdb   : > { %v1037_v22 = vmax.f32 %v955_v14, %v1013_v16 }
  0xdc   : > { %v1095_v23 = vpop.f32.mrf.mxu1 }
  0xdd   : > { %v1119_v8 = vmax.f32 %v1037_v22, %v1095_v23  ;;  %v795_v22 = vmax.f32 %v5542_v34, %v5549_v37 }
  0xe0   : > { %v1177_v24 = vpop.f32.mrf.mxu2 }
  0xe1   : > { %v1201_v30 = vmax.f32 %v1119_v8, %v1177_v24 }
  0xe2   : > { %v1016_v11 = vpop.f32.mrf.mxu0  ;;  %v1259_v31 = vpop.f32.mrf.mxu3 }
  0xe3   : > { %v1038_v10 = vmax.f32 %v956_v28, %v1016_v11  ;;  %v1283_v13 = vmax.f32 %v1201_v30, %v1259_v31  ;;  %v877_v31 = vmax.f32 %v795_v22, %v5560_v41  ;;  %v4645_v41 = vld [vmem:[%s8477_s27 + $0x128] sm:$0xff] }
  0xe4   : > { %v1098_v36 = vpop.f32.mrf.mxu1  ;;  %1670 = vmatpush.msrb.mxu0 %v4645_v41 }
  0xe5   : > { %v1295_v38 = vadd.f32 %v5647_v9, %v1283_v13  ;;  %v1120_v39 = vmax.f32 %v1038_v10, %v1098_v36  ;;  %v4660_v10 = vld [vmem:[%s8477_s27 + $0x168] sm:$0xff] }
  0xe6   : > { %1754 = vmatpush.msrb.mxu1 %v4660_v10 }
  0xe7   : > { %v5653_v19 = vmax.f32 %v1295_v38, 0.0  ;;  %v4674_v38 = vld [vmem:[%s8477_s27 + $0x1a0] sm:$0xff] }
  0xe8   : > { %v1180_v21 = vpop.f32.mrf.mxu2  ;;  %1838 = vmatpush.msrb.mxu2 %v4674_v38  ;;  %1755 = vmatpush.msrb.mxu1 %v4659_v42 }
  0xe9   : > { %v1202_v48 = vmax.f32 %v1120_v39, %v1180_v21  ;;  %4603 = vmatmul.msk.f32.vlgmr.msra.gmra.mxu1 %vm1349_vm2, %v5653_v19  ;;  %v1336_v3 = vrot.slane %v5653_v19, 1  ;;  %v1464_v35 = vrot.slane %v5653_v19, 2  ;;  %v1547_v8 = vrot.slane %v5653_v19, 3 }
  0xea   : > { %v1019_v50 = vpop.f32.mrf.mxu0  ;;  %v1262_v52 = vpop.f32.mrf.mxu3  ;;  %v959_v39 = vmax.f32 %v877_v31, %v5567_v44  ;;  %v4644_v44 = vld [vmem:[%s8477_s27 + $0x120] sm:$0xff]  ;;  %1839 = vmatpush.msrb.mxu2 %v4673_v33 }
  0xeb   : > { %v1039_v57 = vmax.f32 %v957_v45, %v1019_v50  ;;  %v1284_v27 = vmax.f32 %v1202_v48, %v1262_v52  ;;  %v796_v48 = vmax.f32 %v5565_v43, %v5572_v46  ;;  %1671 = vmatpush.msrb.mxu0 %v4644_v44  ;;  %v4658_v52 = vld [vmem:[%s8477_s27 + $0x158] sm:$0xff]  ;;  %v4657_v46 = vld [vmem:[%s8477_s27 + $0x150] sm:$0xff] }
  0xec   : > { %v1101_v58 = vpop.f32.mrf.mxu1  ;;  %1756 = vmatpush.msrb.mxu1 %v4658_v52 }
  0xed   : > { %v1296_v26 = vadd.f32 %v5647_v9, %v1284_v27  ;;  %v1121_v61 = vmax.f32 %v1039_v57, %v1101_v58 }
  0xee   : > { %1757 = vmatpush.msrb.mxu1 %v4657_v46 }
  0xef   : > { %v5678_v60 = vmax.f32 %v1296_v26, 0.0  ;;  %v878_v26 = vmax.f32 %v796_v48, %v5586_v51  ;;  %v4656_v51 = vld [vmem:[%s8477_s27 + $0x148] sm:$0xff] }
  0xf0   : > { %v1183_v2 = vpop.f32.mrf.mxu2  ;;  %1758 = vmatpush.msrb.mxu1 %v4656_v51 }
  0xf1   : > { %v1203_v4 = vmax.f32 %v1121_v61, %v1183_v2  ;;  %4604 = vmatmul.msk.f32.gmra.mxu1 %vm1349_vm2, %v5678_v60  ;;  %v1337_v6 = vrot.slane %v5678_v60, 1  ;;  %v1465_v14 = vrot.slane %v5678_v60, 2  ;;  %v1548_v16 = vrot.slane %v5678_v60, 3  ;;  %v4643_v2 = vld [vmem:[%s8477_s27 + $0x118] sm:$0xff] }
  0xf2   : > { %v1022_v23 = vpop.f32.mrf.mxu0  ;;  %v1265_v7 = vpop.f32.mrf.mxu3  ;;  %1672 = vmatpush.msrb.mxu0 %v4643_v2 }
  0xf3   : > { %v1040_v24 = vmax.f32 %v958_v29, %v1022_v23  ;;  %v1285_v28 = vmax.f32 %v1203_v4, %v1265_v7  ;;  %v1338_v30 = vsel %vm1335_vm3, %v1336_v3, %v1337_v6  ;;  %v1466_v11 = vsel %vm1463_vm4, %v1464_v35, %v1465_v14  ;;  %v4688_v4 = vld [vmem:[%s8477_s27 + $0x1d8] sm:$0xff]  ;;  %v4655_v7 = vld [vmem:[%s8477_s27 + $0x140] sm:$0xff] }
  0xf4   : > { %v1104_v32 = vpop.f32.mrf.mxu1  ;;  %4596 = vmatmul.msk.f32.vlgmr.msra.gmra.mxu0 %vm1349_vm2, %v1338_v30  ;;  %4618 = vmatmul.msk.f32.vlgmr.msra.gmra.mxu2 %vm1349_vm2, %v1466_v11  ;;  %v1549_v34 = vsel %vm1546_vm5, %v1547_v8, %v1548_v16  ;;  %v960_v3 = vmax.f32 %v878_v26, %v5593_v54  ;;  %v797_v54 = vmax.f32 %v5591_v53, %v5595_v55 }
  0xf5   : > { %v1297_v37 = vadd.f32 %v5647_v9, %v1285_v28  ;;  %4633 = vmatmul.msk.f32.vlgmr.msra.gmra.mxu3 %vm1349_vm2, %v1549_v34  ;;  %v1122_v36 = vmax.f32 %v1040_v24, %v1104_v32  ;;  %1759 = vmatpush.msrb.mxu1 %v4655_v7  ;;  %v4672_v32 = vld [vmem:[%s8477_s27 + $0x190] sm:$0xff] }
  0xf6   : > { %1923 = vmatpush.msrb.mxu3 %v4688_v4  ;;  %v879_v11 = vmax.f32 %v797_v54, %v5606_v59  ;;  %v4642_v59 = vld [vmem:[%s8477_s27 + $0x110] sm:$0xff]  ;;  %1840 = vmatpush.msrb.mxu2 %v4672_v32  ;;  %v1715_v32 = vrot.slane %v5653_v19, 5 }
  0xf7   : > { %v5713_v13 = vmax.f32 %v1297_v37, 0.0  ;;  %v4687_v34 = vld [vmem:[%s8477_s27 + $0x1d0] sm:$0xff]  ;;  %1673 = vmatpush.msrb.mxu0 %v4642_v59  ;;  %v4641_v37 = vld [vmem:[%s8477_s27 + $0x108] sm:$0xff] }
  0xf8   : > { %v1186_v40 = vpop.f32.mrf.mxu2  ;;  %1924 = vmatpush.msrb.mxu3 %v4687_v34  ;;  %v961_v41 = vmax.f32 %v879_v11, %v5619_v0  ;;  %v4686_v0 = vld [vmem:[%s8477_s27 + $0x1c8] sm:$0xff] }
  0xf9   : > { %v1204_v18 = vmax.f32 %v1122_v36, %v1186_v40  ;;  %4605 = vmatmul.msk.f32.gmra.mxu1 %vm1349_vm2, %v5713_v13  ;;  %v1339_v21 = vrot.slane %v5713_v13, 1  ;;  %v1467_v25 = vrot.slane %v5713_v13, 2  ;;  %v1550_v45 = vrot.slane %v5713_v13, 3  ;;  %1674 = vmatpush.msrb.mxu0 %v4641_v37 }
  0xfa   : > { %v1025_v49 = vpop.f32.mrf.mxu0  ;;  %v1268_v50 = vpop.f32.mrf.mxu3  ;;  %1925 = vmatpush.msrb.mxu3 %v4686_v0 }
  0xfb   : > { %v1041_v56 = vmax.f32 %v959_v39, %v1025_v49  ;;  %v1286_v57 = vmax.f32 %v1204_v18, %v1268_v50  ;;  %v1340_v27 = vsel %vm1335_vm3, %v1337_v6, %v1339_v21  ;;  %v1468_v58 = vsel %vm1463_vm4, %v1465_v14, %v1467_v25  ;;  %v4671_v18 = vld [vmem:[%s8477_s27 + $0x188] sm:$0xff] }
  0xfc   : > { %v1107_v29 = vpop.f32.mrf.mxu1  ;;  %4597 = vmatmul.msk.f32.gmra.mxu0 %vm1349_vm2, %v1340_v27  ;;  %4619 = vmatmul.msk.f32.gmra.mxu2 %vm1349_vm2, %v1468_v58  ;;  %v1551_v43 = vsel %vm1546_vm5, %v1548_v16, %v1550_v45 }
  0xfd   : > { %v1298_v61 = vadd.f32 %v5647_v9, %v1286_v57  ;;  %4634 = vmatmul.msk.f32.gmra.mxu3 %vm1349_vm2, %v1551_v43  ;;  %v1123_v1 = vmax.f32 %v1041_v56, %v1107_v29  ;;  %1841 = vmatpush.msrb.mxu2 %v4671_v18  ;;  %v4685_v56 = vld [vmem:[%s8477_s27 + $0x1c0] sm:$0xff]  ;;  %v1882_v18 = vrot.slane %v5653_v19, 7 }
  0xfe   : > { %1926 = vmatpush.msrb.mxu3 %v4685_v56 }
  0xff   : > { %v5755_v62 = vmax.f32 %v1298_v61, 0.0  ;;  %1842 = vmatpush.msrb.mxu2 %v4670_v47  ;;  %v1885_v47 = vrot.slane %v5713_v13, 7 }
 0x100   : > { %v1189_v35 = vpop.f32.mrf.mxu2 }
 0x101   : > { %v1205_v6 = vmax.f32 %v1123_v1, %v1189_v35  ;;  %4606 = vmatmul.msk.f32.gmra.mxu1 %vm1349_vm2, %v5755_v62  ;;  %v1341_v14 = vrot.slane %v5755_v62, 1  ;;  %v1469_v16 = vrot.slane %v5755_v62, 2  ;;  %v1552_v20 = vrot.slane %v5755_v62, 3 }
 0x102   : > { %v1028_v22 = vpop.f32.mrf.mxu0  ;;  %v1271_v23 = vpop.f32.mrf.mxu3  ;;  %v1636_v56 = vrot.slane %v5755_v62, 4 }
 0x103   : > { %v1042_v8 = vmax.f32 %v960_v3, %v1028_v22  ;;  %v1287_v24 = vmax.f32 %v1205_v6, %v1271_v23  ;;  %v1342_v28 = vsel %vm1335_vm3, %v1339_v21, %v1341_v14  ;;  %v1470_v30 = vsel %vm1463_vm4, %v1467_v25, %v1469_v16  ;;  %v4640_v21 = vld [vmem:[%s8477_s27 + $0x100] sm:$0xff] }
 0x104   : > { %v1110_v31 = vpop.f32.mrf.mxu1  ;;  %4598 = vmatmul.msk.f32.gmra.mxu0 %vm1349_vm2, %v1342_v28  ;;  %4620 = vmatmul.msk.f32.gmra.mxu2 %vm1349_vm2, %v1470_v30  ;;  %v1553_v53 = vsel %vm1546_vm5, %v1550_v45, %v1552_v20  ;;  %v798_v25 = vmax.f32 %v5617_v63, %v5632_v5 }
 0x105   : > { %v1299_v55 = vadd.f32 %v5647_v9, %v1287_v24  ;;  %4635 = vmatmul.msk.f32.gmra.mxu3 %vm1349_vm2, %v1553_v53  ;;  %v1124_v36 = vmax.f32 %v1042_v8, %v1110_v31  ;;  %1675 = vmatpush.msrb.mxu0 %v4640_v21  ;;  %v1716_v53 = vrot.slane %v5678_v60, 5 }
 0x106   : > { %v880_v63 = vmax.f32 %v798_v25, %v5635_v12 }
 0x107   : > { %v5800_v10 = vmax.f32 %v1299_v55, 0.0  ;;  %v1717_v34 = vsel %vm1714_vm6, %v1715_v32, %v1716_v53 }
 0x108   : > { %v1192_v17 = vpop.f32.mrf.mxu2  ;;  %v962_v29 = vmax.f32 %v880_v63, %v5638_v15 }
 0x109   : > { %v1206_v38 = vmax.f32 %v1124_v36, %v1192_v17  ;;  %4607 = vmatmul.msk.f32.gmra.mxu1 %vm1349_vm2, %v5800_v10  ;;  %v1343_v39 = vrot.slane %v5800_v10, 1  ;;  %v1471_v40 = vrot.slane %v5800_v10, 2  ;;  %v1554_v42 = vrot.slane %v5800_v10, 3 }
 0x10a   : > { %v1031_v45 = vpop.f32.mrf.mxu0  ;;  %v1274_v44 = vpop.f32.mrf.mxu3  ;;  %v1799_v17 = vrot.slane %v5678_v60, 6 }
 0x10b   : > { %v1043_v48 = vmax.f32 %v961_v41, %v1031_v45  ;;  %v1288_v49 = vmax.f32 %v1206_v38, %v1274_v44  ;;  %v1344_v50 = vsel %vm1335_vm3, %v1341_v14, %v1343_v39  ;;  %v1472_v52 = vsel %vm1463_vm4, %v1469_v16, %v1471_v40 }
 0x10c   : > { %v1113_v5 = vpop.f32.mrf.mxu1  ;;  %4599 = vmatmul.msk.f32.gmra.mxu0 %vm1349_vm2, %v1344_v50  ;;  %4621 = vmatmul.msk.f32.gmra.mxu2 %vm1349_vm2, %v1472_v52  ;;  %v1555_v57 = vsel %vm1546_vm5, %v1552_v20, %v1554_v42  ;;  %v1632_v41 = vrot.slane %v5678_v60, 4  ;;  %v1634_v45 = vrot.slane %v5713_v13, 4  ;;  %v1801_v44 = vrot.slane %v5713_v13, 6 }
 0x10d   : > { %v1300_v27 = vadd.f32 %v5647_v9, %v1288_v49  ;;  %4636 = vmatmul.msk.f32.gmra.mxu3 %vm1349_vm2, %v1555_v57  ;;  %v1125_v26 = vmax.f32 %v1043_v48, %v1113_v5  ;;  %v1722_v52 = vrot.slane %v5800_v10, 5  ;;  %v1887_v5 = vrot.slane %v5755_v62, 7 }
 0x10e   : > { %v1635_v48 = vsel %vm1630_vm7, %v1632_v41, %v1634_v45  ;;  %v1802_v49 = vsel %vm672_vm0, %v1799_v17, %v1801_v44  ;;  %v1637_v57 = vsel %vm1630_vm7, %v1634_v45, %v1636_v56  ;;  %v4714_v45 = vld [vmem:[%s8454_s5 + $0xf0] sm:$0xff] }
 0x10f   : > { %v5833_v58 = vmax.f32 %v1300_v27, 0.0 }
 0x110   : > { %v1195_v43 = vpop.f32.mrf.mxu2 }
 0x111   : > { %v1207_v12 = vmax.f32 %v1125_v26, %v1195_v43  ;;  %4608 = vmatmul.msk.f32.gmra.mxu1 %vm1349_vm2, %v5833_v58  ;;  %v1345_v46 = vrot.slane %v5833_v58, 1  ;;  %v1473_v61 = vrot.slane %v5833_v58, 2  ;;  %v1556_v1 = vrot.slane %v5833_v58, 3 }
 0x112   : > { %v1034_v51 = vpop.f32.mrf.mxu0  ;;  %v1277_v33 = vpop.f32.mrf.mxu3  ;;  %v1888_v26 = vsel %vm1881_vm8, %v1885_v47, %v1887_v5  ;;  %v1638_v43 = vrot.slane %v5800_v10, 4 }
 0x113   : > { %v1044_v2 = vmax.f32 %v962_v29, %v1034_v51  ;;  %v1289_v3 = vmax.f32 %v1207_v12, %v1277_v33  ;;  %v1346_v35 = vsel %vm1335_vm3, %v1343_v39, %v1345_v46  ;;  %v1474_v4 = vsel %vm1463_vm4, %v1471_v40, %v1473_v61 }
 0x114   : > { %v1116_v15 = vpop.f32.mrf.mxu1  ;;  %4600 = vmatmul.msk.f32.gmra.mxu0 %vm1349_vm2, %v1346_v35  ;;  %4622 = vmatmul.msk.f32.gmra.mxu2 %vm1349_vm2, %v1474_v4  ;;  %v1557_v6 = vsel %vm1546_vm5, %v1554_v42, %v1556_v1  ;;  %v1883_v39 = vrot.slane %v5678_v60, 7  ;;  %v1631_v40 = vrot.slane %v5653_v19, 4  ;;  %v1798_v42 = vrot.slane %v5653_v19, 6 }
 0x115   : > { %v1301_v14 = vadd.f32 %v5647_v9, %v1289_v3  ;;  %4637 = vmatmul.msk.f32.gmra.mxu3 %vm1349_vm2, %v1557_v6  ;;  %v1126_v20 = vmax.f32 %v1044_v2, %v1116_v15  ;;  %v1720_v60 = vrot.slane %v5755_v62, 5  ;;  %v1724_v29 = vrot.slane %v5833_v58, 5 }
 0x116   : > { %v1633_v0 = vsel %vm1630_vm7, %v1631_v40, %v1632_v41  ;;  %v1800_v21 = vsel %vm672_vm0, %v1798_v42, %v1799_v17  ;;  %v1884_v25 = vsel %vm1881_vm8, %v1882_v18, %v1883_v39  ;;  %v1886_v50 = vsel %vm1881_vm8, %v1883_v39, %v1885_v47  ;;  %v4731_v41 = vld [vmem:[%s8454_s5 + $0x178] sm:$0xff]  ;;  %v1987_v40 = vld [vmem:[%s8454_s5 + $0x68] sm:$0xff]  ;;  %v4730_v42 = vld [vmem:[%s8454_s5 + $0x170] sm:$0xff] }
 0x117   : > { %v5848_v16 = vmax.f32 %v1301_v14, 0.0  ;;  %v1723_v63 = vsel %vm1714_vm6, %v1720_v60, %v1722_v52  ;;  %v1725_v12 = vsel %vm1714_vm6, %v1722_v52, %v1724_v29  ;;  %v1640_v2 = vrot.slane %v5833_v58, 4  ;;  %v4715_v17 = vld [vmem:[%s8454_s5 + $0xf8] sm:$0xff]  ;;  %2137 = vmatpush.msra.mxu2 %v4731_v41  ;;  %v4728_v52 = vld [vmem:[%s8454_s5 + $0x160] sm:$0xff] }
 0x118   : > { %v1198_v54 = vpop.f32.mrf.mxu2  ;;  %v1891_v35 = vrot.slane %v5833_v58, 7  ;;  %v4747_v39 = vld [vmem:[%s8454_s5 + $0x1f8] sm:$0xff]  ;;  %2030 = vmatpush.msra.mxu0 %v4715_v17  ;;  %v4738_v17 = vld [vmem:[%s8454_s5 + $0x1b0] sm:$0xff] }
 0x119   : > { %v1208_v22 = vmax.f32 %v1126_v20, %v1198_v54  ;;  %4609 = vmatmul.msk.f32.gmra.mxu1 %vm1349_vm2, %v5848_v16  ;;  %v1347_v23 = vrot.slane %v5848_v16, 1  ;;  %v1475_v7 = vrot.slane %v5848_v16, 2  ;;  %v1558_v8 = vrot.slane %v5848_v16, 3  ;;  %2214 = vmatpush.msra.mxu3 %v4747_v39  ;;  %v1985_v47 = vld [vmem:[%s8454_s5 + $0x58] sm:$0xff]  ;;  %v1974_v39 = vld [vmem:[%s8454_s5] sm:$0xff] }
 0x11a   : > { %v1280_v24 = vpop.f32.mrf.mxu3  ;;  %v1726_v33 = vrot.slane %v5848_v16, 5  ;;  %v1641_v4 = vsel %vm1630_vm7, %v1638_v43, %v1640_v2  ;;  %v1642_v20 = vrot.slane %v5848_v16, 4  ;;  %2138 = vmatpush.msra.mxu2 %v4730_v42  ;;  %2031 = vmatpush.msra.mxu0 %v4714_v45  ;;  %v4721_v42 = vld [vmem:[%s8454_s5 + $0x128] sm:$0xff]  ;;  %v4704_v45 = vld [vmem:[%s8454_s5 + $0xa0] sm:$0xff] }
 0x11b   : > { %v1290_v28 = vmax.f32 %v1208_v22, %v1280_v24  ;;  %v1348_v30 = vsel %vm1335_vm3, %v1345_v46, %v1347_v23  ;;  %v1476_v11 = vsel %vm1463_vm4, %v1473_v61, %v1475_v7  ;;  %v1559_v31 = vsel %vm1546_vm5, %v1556_v1, %v1558_v8 }
 0x11c   : > { %4601 = vmatmul.msk.f32.gmra.mxu0 %vm1349_vm2, %v1348_v30  ;;  %4623 = vmatmul.msk.f32.gmra.mxu2 %vm1349_vm2, %v1476_v11  ;;  %v1889_v46 = vrot.slane %v5800_v10, 7  ;;  %v1639_v61 = vsel %vm1630_vm7, %v1636_v56, %v1638_v43  ;;  %v1727_v3 = vsel %vm1714_vm6, %v1724_v29, %v1726_v33  ;;  %v1893_v22 = vrot.slane %v5848_v16, 7  ;;  %v1983_v56 = vld [vmem:[%s8454_s5 + $0x48] sm:$0xff]  ;;  %v1982_v29 = vld [vmem:[%s8454_s5 + $0x40] sm:$0xff]  ;;  %v4727_v43 = vld [vmem:[%s8454_s5 + $0x158] sm:$0xff] }
 0x11d   : > { %v1302_v55 = vadd.f32 %v5647_v9, %v1290_v28  ;;  %4638 = vmatmul.msk.f32.gmra.mxu3 %vm1349_vm2, %v1559_v31  ;;  %v1718_v9 = vrot.slane %v5713_v13, 5  ;;  %v1803_v13 = vrot.slane %v5755_v62, 6  ;;  %v1805_v62 = vrot.slane %v5800_v10, 6 }
 0x11e   : > { %v1890_v51 = vsel %vm1881_vm8, %v1887_v5, %v1889_v46  ;;  %v1807_v10 = vrot.slane %v5833_v58, 6  ;;  %v1892_v6 = vsel %vm1881_vm8, %v1889_v46, %v1891_v35  ;;  %v1809_v58 = vrot.slane %v5848_v16, 6  ;;  %v4744_v5 = vld [vmem:[%s8454_s5 + $0x1e0] sm:$0xff]  ;;  %v4743_v46 = vld [vmem:[%s8454_s5 + $0x1d8] sm:$0xff] }
 0x11f   : > { %v5864_v59 = vmax.f32 %v1302_v55, 0.0  ;;  %v1719_v38 = vsel %vm1714_vm6, %v1716_v53, %v1718_v9  ;;  %v1721_v19 = vsel %vm1714_vm6, %v1718_v9, %v1720_v60  ;;  %v1804_v27 = vsel %vm672_vm0, %v1801_v44, %v1803_v13  ;;  %v1989_v9 = vld [vmem:[%s8454_s5 + $0x78] sm:$0xff]  ;;  %v1986_v60 = vld [vmem:[%s8454_s5 + $0x60] sm:$0xff]  ;;  %v4746_v44 = vld [vmem:[%s8454_s5 + $0x1f0] sm:$0xff] }
 0x120   : > { %v1806_v1 = vsel %vm672_vm0, %v1803_v13, %v1805_v62  ;;  %v1808_v15 = vsel %vm672_vm0, %v1805_v62, %v1807_v10  ;;  %2065 = vmatpush.msra.mxu1 %v1989_v9  ;;  %2215 = vmatpush.msra.mxu3 %v4746_v44  ;;  %v4711_v62 = vld [vmem:[%s8454_s5 + $0xd8] sm:$0xff]  ;;  %v4722_v9 = vld [vmem:[%s8454_s5 + $0x130] sm:$0xff]  ;;  %v4720_v44 = vld [vmem:[%s8454_s5 + $0x120] sm:$0xff] }
 0x121   : > { %4663 = vmatmul.msk.f32.vlgmr.msrb.gmra.mxu1 %vm1349_vm2, %v1717_v34  ;;  %v1560_v37 = vrot.slane %v5864_v59, 3  ;;  %v1728_v14 = vrot.slane %v5864_v59, 5  ;;  %v1644_v24 = vrot.slane %v5864_v59, 4  ;;  %v1811_v28 = vrot.slane %v5864_v59, 6 }
 0x122   : > { %v1895_v16 = vrot.slane %v5864_v59, 7 }
 0x123   : > { %v1561_v36 = vsel %vm1546_vm5, %v1558_v8, %v1560_v37  ;;  %v1729_v54 = vsel %vm1714_vm6, %v1726_v33, %v1728_v14  ;;  %v1894_v8 = vsel %vm1881_vm8, %v1891_v35, %v1893_v22  ;;  %v1645_v30 = vsel %vm1630_vm7, %v1642_v20, %v1644_v24  ;;  %v4742_v33 = vld [vmem:[%s8454_s5 + $0x1d0] sm:$0xff]  ;;  %v4709_v14 = vld [vmem:[%s8454_s5 + $0xc8] sm:$0xff]  ;;  %v4723_v24 = vld [vmem:[%s8454_s5 + $0x138] sm:$0xff] }
 0x124   : > { %4602 = vmatmul.msk.f32.gmra.mxu0 %vm1349_vm2, %v1347_v23  ;;  %4624 = vmatmul.msk.f32.gmra.mxu2 %vm1349_vm2, %v1475_v7  ;;  %v1643_v23 = vsel %vm1630_vm7, %v1640_v2, %v1642_v20  ;;  %v1810_v7 = vsel %vm672_vm0, %v1807_v10, %v1809_v58  ;;  %v1812_v11 = vsel %vm672_vm0, %v1809_v58, %v1811_v28  ;;  %v1979_v2 = vld [vmem:[%s8454_s5 + $0x28] sm:$0xff]  ;;  %v1977_v58 = vld [vmem:[%s8454_s5 + $0x18] sm:$0xff] }
 0x125   : > { %4639 = vmatmul.msk.f32.gmra.mxu3 %vm1349_vm2, %v1561_v36  ;;  %v1896_v31 = vsel %vm1881_vm8, %v1893_v22, %v1895_v16  ;;  %v4741_v20 = vld [vmem:[%s8454_s5 + $0x1c8] sm:$0xff]  ;;  %v4724_v22 = vld [vmem:[%s8454_s5 + $0x140] sm:$0xff]  ;;  %v4739_v28 = vld [vmem:[%s8454_s5 + $0x1b8] sm:$0xff] }
 0x129   : > { %4664 = vmatmul.msk.f32.gmra.mxu1 %vm1349_vm2, %v1719_v38  ;;  %v1988_v38 = vld [vmem:[%s8454_s5 + $0x70] sm:$0xff] }
 0x12a   : > { %2066 = vmatpush.msra.mxu1 %v1988_v38 }
 0x12c   : > { %4648 = vmatmul.msk.f32.vlgmr.msrb.gmra.mxu0 %vm1349_vm2, %v1633_v0  ;;  %4678 = vmatmul.msk.f32.vlgmr.msrb.gmra.mxu2 %vm1349_vm2, %v1800_v21 }
 0x12d   : > { %4693 = vmatmul.msk.f32.vlgmr.msrb.gmra.mxu3 %vm1349_vm2, %v1884_v25  ;;  %2067 = vmatpush.msra.mxu1 %v1987_v40  ;;  %v4705_v40 = vld [vmem:[%s8454_s5 + $0xa8] sm:$0xff] }
 0x12f   : > { %2068 = vmatpush.msra.mxu1 %v1986_v60  ;;  %v4737_v60 = vld [vmem:[%s8454_s5 + $0x1a8] sm:$0xff] }
 0x131   : > { %4665 = vmatmul.msk.f32.gmra.mxu1 %vm1349_vm2, %v1721_v19  ;;  %v4729_v19 = vld [vmem:[%s8454_s5 + $0x168] sm:$0xff] }
 0x132   : > { %2139 = vmatpush.msra.mxu2 %v4729_v19  ;;  %2069 = vmatpush.msra.mxu1 %v1985_v47  ;;  %v4736_v19 = vld [vmem:[%s8454_s5 + $0x1a0] sm:$0xff]  ;;  %v4703_v47 = vld [vmem:[%s8454_s5 + $0x98] sm:$0xff] }
 0x134   : > { %4649 = vmatmul.msk.f32.gmra.mxu0 %vm1349_vm2, %v1635_v48  ;;  %4679 = vmatmul.msk.f32.gmra.mxu2 %vm1349_vm2, %v1802_v49  ;;  %v4713_v48 = vld [vmem:[%s8454_s5 + $0xe8] sm:$0xff] }
 0x135   : > { %4694 = vmatmul.msk.f32.gmra.mxu3 %vm1349_vm2, %v1886_v50  ;;  %v4745_v49 = vld [vmem:[%s8454_s5 + $0x1e8] sm:$0xff]  ;;  %v1984_v50 = vld [vmem:[%s8454_s5 + $0x50] sm:$0xff]  ;;  %2032 = vmatpush.msra.mxu0 %v4713_v48  ;;  %v4719_v48 = vld [vmem:[%s8454_s5 + $0x118] sm:$0xff] }
 0x136   : > { %2216 = vmatpush.msra.mxu3 %v4745_v49  ;;  %2070 = vmatpush.msra.mxu1 %v1984_v50  ;;  %v4735_v49 = vld [vmem:[%s8454_s5 + $0x198] sm:$0xff] }
 0x137   : > { %2140 = vmatpush.msra.mxu2 %v4728_v52  ;;  %v4702_v52 = vld [vmem:[%s8454_s5 + $0x90] sm:$0xff] }
 0x138   : > { %2217 = vmatpush.msra.mxu3 %v4744_v5  ;;  %2071 = vmatpush.msra.mxu1 %v1983_v56  ;;  %v4718_v56 = vld [vmem:[%s8454_s5 + $0x110] sm:$0xff] }
 0x139   : > { %4666 = vmatmul.msk.f32.gmra.mxu1 %vm1349_vm2, %v1723_v63  ;;  %v4712_v63 = vld [vmem:[%s8454_s5 + $0xe0] sm:$0xff]  ;;  %2141 = vmatpush.msra.mxu2 %v4727_v43 }
 0x13a   : > { %2033 = vmatpush.msra.mxu0 %v4712_v63  ;;  %2072 = vmatpush.msra.mxu1 %v1982_v29  ;;  %v4734_v63 = vld [vmem:[%s8454_s5 + $0x190] sm:$0xff] }
 0x13b   : > { %2218 = vmatpush.msra.mxu3 %v4743_v46  ;;  %v4717_v46 = vld [vmem:[%s8454_s5 + $0x108] sm:$0xff] }
 0x13c   : > { %4650 = vmatmul.msk.f32.gmra.mxu0 %vm1349_vm2, %v1637_v57  ;;  %4680 = vmatmul.msk.f32.gmra.mxu2 %vm1349_vm2, %v1804_v27 }
 0x13d   : > { %4695 = vmatmul.msk.f32.gmra.mxu3 %vm1349_vm2, %v1888_v26  ;;  %2034 = vmatpush.msra.mxu0 %v4711_v62 }
 0x13e   : > { %2219 = vmatpush.msra.mxu3 %v4742_v33 }
 0x140   : > { %2220 = vmatpush.msra.mxu3 %v4741_v20 }
 0x141   : > { %4667 = vmatmul.msk.f32.gmra.mxu1 %vm1349_vm2, %v1725_v12  ;;  %v1981_v12 = vld [vmem:[%s8454_s5 + $0x38] sm:$0xff] }
 0x142   : > { %2073 = vmatpush.msra.mxu1 %v1981_v12  ;;  %v4701_v12 = vld [vmem:[%s8454_s5 + $0x88] sm:$0xff] }
 0x144   : > { %4651 = vmatmul.msk.f32.gmra.mxu0 %vm1349_vm2, %v1639_v61  ;;  %4681 = vmatmul.msk.f32.gmra.mxu2 %vm1349_vm2, %v1806_v1  ;;  %v1980_v61 = vld [vmem:[%s8454_s5 + $0x30] sm:$0xff] }
 0x145   : > { %4696 = vmatmul.msk.f32.gmra.mxu3 %vm1349_vm2, %v1890_v51  ;;  %v4726_v1 = vld [vmem:[%s8454_s5 + $0x150] sm:$0xff]  ;;  %2074 = vmatpush.msra.mxu1 %v1980_v61  ;;  %v4733_v61 = vld [vmem:[%s8454_s5 + $0x188] sm:$0xff] }
 0x146   : > { %v4710_v51 = vld [vmem:[%s8454_s5 + $0xd0] sm:$0xff]  ;;  %2142 = vmatpush.msra.mxu2 %v4726_v1 }
 0x147   : > { %2035 = vmatpush.msra.mxu0 %v4710_v51  ;;  %2075 = vmatpush.msra.mxu1 %v1979_v2  ;;  %v4732_v51 = vld [vmem:[%s8454_s5 + $0x180] sm:$0xff] }
 0x149   : > { %4668 = vmatmul.msk.f32.gmra.mxu1 %vm1349_vm2, %v1727_v3  ;;  %v4725_v3 = vld [vmem:[%s8454_s5 + $0x148] sm:$0xff]  ;;  %2036 = vmatpush.msra.mxu0 %v4709_v14 }
 0x14a   : > { %2143 = vmatpush.msra.mxu2 %v4725_v3 }
 0x14c   : > { %4652 = vmatmul.msk.f32.gmra.mxu0 %vm1349_vm2, %v1641_v4  ;;  %4682 = vmatmul.msk.f32.gmra.mxu2 %vm1349_vm2, %v1808_v15 }
 0x14d   : > { %4697 = vmatmul.msk.f32.gmra.mxu3 %vm1349_vm2, %v1892_v6  ;;  %v1978_v6 = vld [vmem:[%s8454_s5 + $0x20] sm:$0xff]  ;;  %2144 = vmatpush.msra.mxu2 %v4724_v22  ;;  %v4778_v22 = vld [vmem:[%s8454_s5 + $0x2f0] sm:$0xff] }
 0x14e   : > { %2076 = vmatpush.msra.mxu1 %v1978_v6 }
 0x14f   : > { %2145 = vmatpush.msra.mxu2 %v4723_v24 }
 0x150   : > { %2077 = vmatpush.msra.mxu1 %v1977_v58  ;;  %v4779_v58 = vld [vmem:[%s8454_s5 + $0x2f8] sm:$0xff] }
 0x151   : > { %4669 = vmatmul.msk.f32.gmra.mxu1 %vm1349_vm2, %v1729_v54  ;;  %v4708_v54 = vld [vmem:[%s8454_s5 + $0xc0] sm:$0xff]  ;;  %2146 = vmatpush.msra.mxu2 %v4722_v9 }
 0x152   : > { %2037 = vmatpush.msra.mxu0 %v4708_v54 }
 0x153   : > { %2147 = vmatpush.msra.mxu2 %v4721_v42  ;;  %v4774_v42 = vld [vmem:[%s8454_s5 + $0x2d0] sm:$0xff] }
 0x154   : > { %4653 = vmatmul.msk.f32.gmra.mxu0 %vm1349_vm2, %v1643_v23  ;;  %4683 = vmatmul.msk.f32.gmra.mxu2 %vm1349_vm2, %v1810_v7  ;;  %v4740_v23 = vld [vmem:[%s8454_s5 + $0x1c0] sm:$0xff]  ;;  %v1976_v7 = vld [vmem:[%s8454_s5 + $0x10] sm:$0xff] }
 0x155   : > { %4698 = vmatmul.msk.f32.gmra.mxu3 %vm1349_vm2, %v1894_v8  ;;  %2078 = vmatpush.msra.mxu1 %v1976_v7  ;;  %v4707_v8 = vld [vmem:[%s8454_s5 + $0xb8] sm:$0xff] }
 0x156   : > { %2221 = vmatpush.msra.mxu3 %v4740_v23  ;;  %2038 = vmatpush.msra.mxu0 %v4707_v8  ;;  %v4777_v23 = vld [vmem:[%s8454_s5 + $0x2e8] sm:$0xff] }
 0x157   : > { %2148 = vmatpush.msra.mxu2 %v4720_v44 }
 0x158   : > { %2222 = vmatpush.msra.mxu3 %v4739_v28  ;;  %v4776_v28 = vld [vmem:[%s8454_s5 + $0x2e0] sm:$0xff] }
 0x159   : > { %2149 = vmatpush.msra.mxu2 %v4719_v48  ;;  %v4762_v48 = vld [vmem:[%s8454_s5 + $0x270] sm:$0xff] }
 0x15a   : > { %2223 = vmatpush.msra.mxu3 %v4738_v17 }
 0x15b   : > { %2150 = vmatpush.msra.mxu2 %v4718_v56 }
 0x15c   : > { %4654 = vmatmul.msk.f32.gmra.mxu0 %vm1349_vm2, %v1645_v30  ;;  %4684 = vmatmul.msk.f32.gmra.mxu2 %vm1349_vm2, %v1812_v11  ;;  %v1975_v11 = vld [vmem:[%s8454_s5 + $0x8] sm:$0xff] }
 0x15d   : > { %4699 = vmatmul.msk.f32.gmra.mxu3 %vm1349_vm2, %v1896_v31  ;;  %v4706_v31 = vld [vmem:[%s8454_s5 + $0xb0] sm:$0xff]  ;;  %2079 = vmatpush.msra.mxu1 %v1975_v11 }
 0x15e   : > { %2039 = vmatpush.msra.mxu0 %v4706_v31  ;;  %2224 = vmatpush.msra.mxu3 %v4737_v60 }
 0x15f   : > { %2080 = vmatpush.msra.mxu1 %v1974_v39  ;;  %2151 = vmatpush.msra.mxu2 %v4717_v46 }
 0x160   : > { %2040 = vmatpush.msra.mxu0 %v4705_v40  ;;  %2225 = vmatpush.msra.mxu3 %v4736_v19  ;;  %v4794_v19 = vld [vmem:[%s8454_s5 + $0x370] sm:$0xff] }
 0x161   : > { %2368 = vmatpush.msrb.mxu1 %v4779_v58  ;;  %v4791_v58 = vld [vmem:[%s8454_s5 + $0x358] sm:$0xff] }
 0x162   : > { %2041 = vmatpush.msra.mxu0 %v4704_v45  ;;  %2226 = vmatpush.msra.mxu3 %v4735_v49  ;;  %v4763_v45 = vld [vmem:[%s8454_s5 + $0x278] sm:$0xff] }
 0x163   : > { %2369 = vmatpush.msrb.mxu1 %v4778_v22 }
 0x164   : > { %2042 = vmatpush.msra.mxu0 %v4703_v47  ;;  %2227 = vmatpush.msra.mxu3 %v4734_v63  ;;  %v4773_v47 = vld [vmem:[%s8454_s5 + $0x2c8] sm:$0xff]  ;;  %v4810_v63 = vld [vmem:[%s8454_s5 + $0x3f0] sm:$0xff] }
 0x165   : > { %2370 = vmatpush.msrb.mxu1 %v4777_v23 }
 0x166   : > { %v5957_v53 = vpop.f32.mrf.mxu1  ;;  %2043 = vmatpush.msra.mxu0 %v4702_v52  ;;  %2228 = vmatpush.msra.mxu3 %v4733_v61  ;;  %v4793_v61 = vld [vmem:[%s8454_s5 + $0x368] sm:$0xff] }
 0x167   : > { %2371 = vmatpush.msrb.mxu1 %v4776_v28 }
 0x168   : > { %2044 = vmatpush.msra.mxu0 %v4701_v12  ;;  %2229 = vmatpush.msra.mxu3 %v4732_v51  ;;  %v4772_v12 = vld [vmem:[%s8454_s5 + $0x2c0] sm:$0xff] }
 0x169   : > { %v4760_v51 = vld [vmem:[%s8454_s5 + $0x260] sm:$0xff] }
 0x16e   : > { %v5959_v55 = vpop.f32.mrf.mxu1 }
 0x171   : > { %v5961_v32 = vpop.f32.mrf.mxu0 }
 0x172   : > { %v1434_v62 = vadd.f32 %v5957_v53, %v5961_v32  ;;  %v4700_v53 = vld [vmem:[%s8454_s5 + $0x80] sm:$0xff] }
 0x173   : > { %v4716_v32 = vld [vmem:[%s8454_s5 + $0x100] sm:$0xff]  ;;  %2045 = vmatpush.msra.mxu0 %v4700_v53  ;;  %v4771_v53 = vld [vmem:[%s8454_s5 + $0x2b8] sm:$0xff] }
 0x174   : > { %2152 = vmatpush.msra.mxu2 %v4716_v32 }
 0x175   : > { %2291 = vmatpush.msrb.mxu0 %v4763_v45 }
 0x176   : > { %v5963_v34 = vpop.f32.mrf.mxu1 }
 0x177   : > { %v5965_v59 = vpop.f32.mrf.mxu2  ;;  %2292 = vmatpush.msrb.mxu0 %v4762_v48  ;;  %v4767_v48 = vld [vmem:[%s8454_s5 + $0x298] sm:$0xff] }
 0x178   : > { %v5967_v37 = vpop.f32.mrf.mxu3  ;;  %v1529_v1 = vadd.f32 %v5965_v59, %v1434_v62 }
 0x179   : > { %v5969_v36 = vpop.f32.mrf.mxu0 }
 0x17a   : > { %v1614_v59 = vadd.f32 %v5967_v37, %v1529_v1  ;;  %v1437_v6 = vadd.f32 %v5959_v55, %v5969_v36  ;;  %v4761_v1 = vld [vmem:[%s8454_s5 + $0x268] sm:$0xff] }
 0x17b   : > { %2293 = vmatpush.msrb.mxu0 %v4761_v1 }
 0x17d   : > { %2294 = vmatpush.msrb.mxu0 %v4760_v51  ;;  %v4755_v51 = vld [vmem:[%s8454_s5 + $0x238] sm:$0xff] }
 0x17e   : > { %v5992_v18 = vpop.f32.mrf.mxu1 }
 0x17f   : > { %v5994_v0 = vpop.f32.mrf.mxu2 }
 0x180   : > { %v5996_v21 = vpop.f32.mrf.mxu3  ;;  %v1530_v54 = vadd.f32 %v5994_v0, %v1437_v6  ;;  %v6225_v0 = vld [vmem:[%s8453_s4] ss:$0 sm:$0xff] }
 0x181   : > { %v5998_v25 = vpop.f32.mrf.mxu0 }
 0x182   : > { %v1615_v36 = vadd.f32 %v5996_v21, %v1530_v54  ;;  %v1440_v11 = vadd.f32 %v5963_v34, %v5998_v25  ;;  %v4775_v21 = vld [vmem:[%s8454_s5 + $0x2d8] sm:$0xff] }
 0x183   : > { %2372 = vmatpush.msrb.mxu1 %v4775_v21  ;;  %v4795_v25 = vld [vmem:[%s8454_s5 + $0x378] sm:$0xff] }
 0x184   : > { %2445 = vmatpush.msrb.mxu2 %v4795_v25  ;;  %v4807_v54 = vld [vmem:[%s8454_s5 + $0x3d8] sm:$0xff] }
 0x185   : > { %2373 = vmatpush.msrb.mxu1 %v4774_v42 }
 0x186   : > { %v6030_v13 = vpop.f32.mrf.mxu1  ;;  %2446 = vmatpush.msrb.mxu2 %v4794_v19  ;;  %v4789_v19 = vld [vmem:[%s8454_s5 + $0x348] sm:$0xff] }
 0x187   : > { %v6038_v57 = vpop.f32.mrf.mxu2  ;;  %2374 = vmatpush.msrb.mxu1 %v4773_v47 }
 0x188   : > { %v6040_v27 = vpop.f32.mrf.mxu3  ;;  %v1531_v17 = vadd.f32 %v6038_v57, %v1440_v11  ;;  %v4811_v57 = vld [vmem:[%s8454_s5 + $0x3f8] sm:$0xff]  ;;  %2447 = vmatpush.msrb.mxu2 %v4793_v61 }
 0x189   : > { %v6042_v26 = vpop.f32.mrf.mxu0  ;;  %2522 = vmatpush.msrb.mxu3 %v4811_v57  ;;  %2375 = vmatpush.msrb.mxu1 %v4772_v12 }
 0x18a   : > { %v1616_v49 = vadd.f32 %v6040_v27, %v1531_v17 }
 0x18b   : > { %2523 = vmatpush.msrb.mxu3 %v4810_v63  ;;  %2376 = vmatpush.msrb.mxu1 %v4771_v53  ;;  %v4788_v63 = vld [vmem:[%s8454_s5 + $0x340] sm:$0xff] }
 0x18e   : > { %v6074_v10 = vpop.f32.mrf.mxu1 }
 0x18f   : > { %v6079_v35 = vpop.f32.mrf.mxu2 }
 0x190   : > { %v6081_v4 = vpop.f32.mrf.mxu3 }
 0x191   : > { %v6083_v15 = vpop.f32.mrf.mxu0 }
 0x196   : > { %v6118_v16 = vpop.f32.mrf.mxu1 }
 0x197   : > { %v6120_v30 = vpop.f32.mrf.mxu2 }
 0x198   : > { %v6131_v41 = vpop.f32.mrf.mxu3 }
 0x199   : > { %v6136_v38 = vpop.f32.mrf.mxu0 }
 0x19e   : > { %v1761_v29 = vpop.f32.mrf.mxu1 }
 0x19f   : > { %v6168_v50 = vpop.f32.mrf.mxu2 }
 0x1a0   : > { %v6179_v5 = vpop.f32.mrf.mxu3 }
 0x1a1   : > { %v6181_v43 = vpop.f32.mrf.mxu0 }
 0x1a6   : > { %v1764_v20 = vpop.f32.mrf.mxu1 }
 0x1a7   : > { %v6204_v33 = vpop.f32.mrf.mxu2 }
 0x1a8   : > { %v6207_v2 = vpop.f32.mrf.mxu3 }
 0x1a9   : > { %v1677_v3 = vpop.f32.mrf.mxu0 }
 0x1aa   : > { %v1698_v14 = vadd.f32 %v1677_v3, %v1614_v59  ;;  %v4792_v59 = vld [vmem:[%s8454_s5 + $0x360] sm:$0xff]  ;;  %v4770_v3 = vld [vmem:[%s8454_s5 + $0x2b0] sm:$0xff] }
 0x1ab   : > { %2448 = vmatpush.msrb.mxu2 %v4792_v59  ;;  %2377 = vmatpush.msrb.mxu1 %v4770_v3 }
 0x1ac   : > { %v1782_v37 = vadd.f32 %v1761_v29, %v1698_v14  ;;  %v1443_v29 = vadd.f32 %v5992_v18, %v6042_v26  ;;  %v4809_v18 = vld [vmem:[%s8454_s5 + $0x3e8] sm:$0xff] }
 0x1ad   : > { %2524 = vmatpush.msrb.mxu3 %v4809_v18  ;;  %2449 = vmatpush.msrb.mxu2 %v4791_v58 }
 0x1ae   : > { %v1767_v40 = vpop.f32.mrf.mxu1  ;;  %v1532_v26 = vadd.f32 %v6079_v35, %v1443_v29  ;;  %v4808_v35 = vld [vmem:[%s8454_s5 + $0x3e0] sm:$0xff] }
 0x1af   : > { %v1844_v55 = vpop.f32.mrf.mxu2  ;;  %2525 = vmatpush.msrb.mxu3 %v4808_v35  ;;  %v4804_v29 = vld [vmem:[%s8454_s5 + $0x3c0] sm:$0xff] }
 0x1b0   : > { %v1865_v7 = vadd.f32 %v1844_v55, %v1782_v37  ;;  %v1928_v8 = vpop.f32.mrf.mxu3  ;;  %v1617_v22 = vadd.f32 %v6081_v4, %v1532_v26 }
 0x1b1   : > { %v1680_v24 = vpop.f32.mrf.mxu0  ;;  %2526 = vmatpush.msrb.mxu3 %v4807_v54  ;;  %v4765_v54 = vld [vmem:[%s8454_s5 + $0x288] sm:$0xff] }
 0x1b2   : > { %v1949_v31 = vadd.f32 %v1928_v8, %v1865_v7  ;;  %v1699_v9 = vadd.f32 %v1680_v24, %v1615_v36  ;;  %v4769_v7 = vld [vmem:[%s8454_s5 + $0x2a8] sm:$0xff]  ;;  %v4758_v8 = vld [vmem:[%s8454_s5 + $0x250] sm:$0xff] }
 0x1b3   : > { %2378 = vmatpush.msrb.mxu1 %v4769_v7 }
 0x1b4   : > { %v1960_v39 = vadd.f32 %v6225_v0, %v1949_v31  ;;  %v1783_v34 = vadd.f32 %v1764_v20, %v1699_v9  ;;  %v4759_v20 = vld [vmem:[%s8454_s5 + $0x258] sm:$0xff]  ;;  %v1446_v9 = vadd.f32 %v6030_v13, %v6083_v15  ;;  %v4806_v13 = vld [vmem:[%s8454_s5 + $0x3d0] sm:$0xff]  ;;  %v4768_v15 = vld [vmem:[%s8454_s5 + $0x2a0] sm:$0xff] }
 0x1b5   : > { %2295 = vmatpush.msrb.mxu0 %v4759_v20  ;;  %2527 = vmatpush.msrb.mxu3 %v4806_v13  ;;  %v4787_v20 = vld [vmem:[%s8454_s5 + $0x338] sm:$0xff] }
 0x1b6   : > { %v6240_v60 = vmax.f32 %v1960_v39, 0.0  ;;  %v1770_v37 = vpop.f32.mrf.mxu1  ;;  %v4790_v39 = vld [vmem:[%s8454_s5 + $0x350] sm:$0xff]  ;;  %v1533_v45 = vadd.f32 %v6120_v30, %v1446_v9  ;;  %v4805_v30 = vld [vmem:[%s8454_s5 + $0x3c8] sm:$0xff]  ;;  %2379 = vmatpush.msrb.mxu1 %v4768_v15 }
 0x1b7   : > { %v1847_v44 = vpop.f32.mrf.mxu2  ;;  %2296 = vmatpush.msrb.mxu0 %v4758_v8  ;;  %2450 = vmatpush.msrb.mxu2 %v4790_v39  ;;  %v4764_v8 = vld [vmem:[%s8454_s5 + $0x280] sm:$0xff] }
 0x1b8   : > { %v1866_v52 = vadd.f32 %v1847_v44, %v1783_v34  ;;  %v1931_v56 = vpop.f32.mrf.mxu3  ;;  %2081 = vmatmul.f32.vlgmr.msra.gmra.mxu1 %v6240_v60  ;;  %v2013_v55 = vrot.slane %v6240_v60, 1  ;;  %v2118_v36 = vrot.slane %v6240_v60, 2  ;;  %v2195_v17 = vrot.slane %v6240_v60, 3  ;;  %v4757_v44 = vld [vmem:[%s8454_s5 + $0x248] sm:$0xff]  ;;  %2528 = vmatpush.msrb.mxu3 %v4805_v30  ;;  %v4783_v30 = vld [vmem:[%s8454_s5 + $0x318] sm:$0xff] }
 0x1b9   : > { %v1683_v62 = vpop.f32.mrf.mxu0  ;;  %2297 = vmatpush.msrb.mxu0 %v4757_v44  ;;  %2451 = vmatpush.msrb.mxu2 %v4789_v19  ;;  %v4751_v19 = vld [vmem:[%s8454_s5 + $0x218] sm:$0xff] }
 0x1ba   : > { %v1950_v27 = vadd.f32 %v1931_v56, %v1866_v52  ;;  %v1700_v46 = vadd.f32 %v1683_v62, %v1616_v49  ;;  %v4756_v49 = vld [vmem:[%s8454_s5 + $0x240] sm:$0xff]  ;;  %v1618_v62 = vadd.f32 %v6131_v41, %v1533_v45  ;;  %2380 = vmatpush.msrb.mxu1 %v4767_v48  ;;  %v1449_v41 = vadd.f32 %v6074_v10, %v6136_v38  ;;  %v4803_v10 = vld [vmem:[%s8454_s5 + $0x3b8] sm:$0xff]  ;;  %v4750_v48 = vld [vmem:[%s8454_s5 + $0x210] sm:$0xff] }
 0x1bb   : > { %2298 = vmatpush.msrb.mxu0 %v4756_v49  ;;  %2452 = vmatpush.msrb.mxu2 %v4788_v63  ;;  %v4784_v45 = vld [vmem:[%s8454_s5 + $0x320] sm:$0xff]  ;;  %v4782_v63 = vld [vmem:[%s8454_s5 + $0x310] sm:$0xff] }
 0x1bc   : > { %v1961_v32 = vadd.f32 %v6225_v0, %v1950_v27  ;;  %v1784_v14 = vadd.f32 %v1767_v40, %v1700_v46  ;;  %v4766_v27 = vld [vmem:[%s8454_s5 + $0x290] sm:$0xff]  ;;  %2529 = vmatpush.msrb.mxu3 %v4804_v29  ;;  %v1534_v38 = vadd.f32 %v6168_v50, %v1449_v41 }
 0x1bd   : > { %2381 = vmatpush.msrb.mxu1 %v4766_v27  ;;  %2299 = vmatpush.msrb.mxu0 %v4755_v51  ;;  %v4786_v50 = vld [vmem:[%s8454_s5 + $0x330] sm:$0xff]  ;;  %v4749_v27 = vld [vmem:[%s8454_s5 + $0x208] sm:$0xff] }
 0x1be   : > { %v6296_v6 = vmax.f32 %v1961_v32, 0.0  ;;  %v1773_v53 = vpop.f32.mrf.mxu1  ;;  %2453 = vmatpush.msrb.mxu2 %v4787_v20  ;;  %2530 = vmatpush.msrb.mxu3 %v4803_v10  ;;  %v4798_v29 = vld [vmem:[%s8454_s5 + $0x390] sm:$0xff]  ;;  %v4780_v20 = vld [vmem:[%s8454_s5 + $0x300] sm:$0xff] }
 0x1bf   : > { %v1850_v23 = vpop.f32.mrf.mxu2  ;;  %2382 = vmatpush.msrb.mxu1 %v4765_v54 }
 0x1c0   : > { %v1867_v24 = vadd.f32 %v1850_v23, %v1784_v14  ;;  %v1934_v28 = vpop.f32.mrf.mxu3  ;;  %2084 = vmatmul.f32.gmra.mxu1 %v6296_v6  ;;  %v2014_v4 = vrot.slane %v6296_v6, 1  ;;  %v2119_v11 = vrot.slane %v6296_v6, 2  ;;  %v2196_v31 = vrot.slane %v6296_v6, 3  ;;  %v4802_v23 = vld [vmem:[%s8454_s5 + $0x3b0] sm:$0xff]  ;;  %2454 = vmatpush.msrb.mxu2 %v4786_v50 }
 0x1c1   : > { %v1686_v21 = vpop.f32.mrf.mxu0  ;;  %2531 = vmatpush.msrb.mxu3 %v4802_v23  ;;  %2383 = vmatpush.msrb.mxu1 %v4764_v8 }
 0x1c2   : > { %v1951_v40 = vadd.f32 %v1934_v28, %v1867_v24  ;;  %v1701_v42 = vadd.f32 %v1686_v21, %v1617_v22  ;;  %v2015_v34 = vsel %vm1335_vm3, %v2013_v55, %v2014_v4  ;;  %v2120_v25 = vsel %vm1463_vm4, %v2118_v36, %v2119_v11  ;;  %v4754_v22 = vld [vmem:[%s8454_s5 + $0x230] sm:$0xff]  ;;  %v4753_v55 = vld [vmem:[%s8454_s5 + $0x228] sm:$0xff] }
 0x1c3   : > { %2046 = vmatmul.f32.vlgmr.msra.gmra.mxu0 %v2015_v34  ;;  %2153 = vmatmul.f32.vlgmr.msra.gmra.mxu2 %v2120_v25  ;;  %v2197_v57 = vsel %vm1546_vm5, %v2195_v17, %v2196_v31  ;;  %v4785_v24 = vld [vmem:[%s8454_s5 + $0x328] sm:$0xff]  ;;  %v1619_v28 = vadd.f32 %v6179_v5, %v1534_v38  ;;  %v1452_v5 = vadd.f32 %v6118_v16, %v6181_v43  ;;  %v4800_v16 = vld [vmem:[%s8454_s5 + $0x3a0] sm:$0xff] }
 0x1c4   : > { %v1962_v47 = vadd.f32 %v6225_v0, %v1951_v40  ;;  %2230 = vmatmul.f32.vlgmr.msra.gmra.mxu3 %v2197_v57  ;;  %v1785_v56 = vadd.f32 %v1770_v37, %v1701_v42  ;;  %2300 = vmatpush.msrb.mxu0 %v4754_v22  ;;  %v4752_v42 = vld [vmem:[%s8454_s5 + $0x220] sm:$0xff] }
 0x1c5   : > { %2455 = vmatpush.msrb.mxu2 %v4785_v24  ;;  %v1535_v43 = vadd.f32 %v6204_v33, %v1452_v5  ;;  %v4799_v33 = vld [vmem:[%s8454_s5 + $0x398] sm:$0xff]  ;;  %v4796_v38 = vld [vmem:[%s8454_s5 + $0x380] sm:$0xff] }
 0x1c6   : > { %v6354_v52 = vmax.f32 %v1962_v47, 0.0  ;;  %2301 = vmatpush.msrb.mxu0 %v4753_v55  ;;  %v1776_v57 = vpop.f32.mrf.mxu1 }
 0x1c7   : > { %v1853_v12 = vpop.f32.mrf.mxu2  ;;  %2456 = vmatpush.msrb.mxu2 %v4784_v45  ;;  %v2504_v45 = vrot.slane %v6296_v6, 7 }
 0x1c8   : > { %v1868_v46 = vadd.f32 %v1853_v12, %v1785_v56  ;;  %v1937_v61 = vpop.f32.mrf.mxu3  ;;  %2087 = vmatmul.f32.gmra.mxu1 %v6354_v52  ;;  %v2016_v1 = vrot.slane %v6354_v52, 1  ;;  %v2121_v18 = vrot.slane %v6354_v52, 2  ;;  %v2198_v26 = vrot.slane %v6354_v52, 3  ;;  %2302 = vmatpush.msrb.mxu0 %v4752_v42 }
 0x1c9   : > { %v1689_v32 = vpop.f32.mrf.mxu0  ;;  %2457 = vmatpush.msrb.mxu2 %v4783_v30 }
 0x1ca   : > { %v1952_v59 = vadd.f32 %v1937_v61, %v1868_v46  ;;  %v1702_v35 = vadd.f32 %v1689_v32, %v1618_v62  ;;  %v2017_v3 = vsel %vm1335_vm3, %v2014_v4, %v2016_v1  ;;  %v2122_v14 = vsel %vm1463_vm4, %v2119_v11, %v2121_v18  ;;  %v4801_v11 = vld [vmem:[%s8454_s5 + $0x3a8] sm:$0xff]  ;;  %2303 = vmatpush.msrb.mxu0 %v4751_v19 }
 0x1cb   : > { %2049 = vmatmul.f32.gmra.mxu0 %v2017_v3  ;;  %2156 = vmatmul.f32.gmra.mxu2 %v2122_v14  ;;  %v2199_v58 = vsel %vm1546_vm5, %v2196_v31, %v2198_v26  ;;  %v1620_v62 = vadd.f32 %v6207_v2, %v1535_v43  ;;  %v4781_v2 = vld [vmem:[%s8454_s5 + $0x308] sm:$0xff]  ;;  %v4748_v3 = vld [vmem:[%s8454_s5 + $0x200] sm:$0xff]  ;;  %v2426_v43 = vrot.slane %v6240_v60, 6 }
 0x1cc   : > { %v1963_v37 = vadd.f32 %v6225_v0, %v1952_v59  ;;  %2233 = vmatmul.f32.gmra.mxu3 %v2199_v58  ;;  %v1786_v7 = vadd.f32 %v1773_v53, %v1702_v35  ;;  %2304 = vmatpush.msrb.mxu0 %v4750_v48  ;;  %v4797_v35 = vld [vmem:[%s8454_s5 + $0x388] sm:$0xff] }
 0x1cd   : > { %2532 = vmatpush.msrb.mxu3 %v4801_v11  ;;  %2458 = vmatpush.msrb.mxu2 %v4782_v63 }
 0x1ce   : > { %v6405_v36 = vmax.f32 %v1963_v37, 0.0  ;;  %2305 = vmatpush.msrb.mxu0 %v4749_v27  ;;  %v1779_v58 = vpop.f32.mrf.mxu1 }
 0x1cf   : > { %v1856_v4 = vpop.f32.mrf.mxu2  ;;  %2533 = vmatpush.msrb.mxu3 %v4800_v16  ;;  %2459 = vmatpush.msrb.mxu2 %v4781_v2  ;;  %v2272_v16 = vrot.slane %v6240_v60, 4 }
 0x1d0   : > { %v1869_v31 = vadd.f32 %v1856_v4, %v1786_v7  ;;  %v1940_v9 = vpop.f32.mrf.mxu3  ;;  %2090 = vmatmul.f32.gmra.mxu1 %v6405_v36  ;;  %v2018_v21 = vrot.slane %v6405_v36, 1  ;;  %v2123_v17 = vrot.slane %v6405_v36, 2  ;;  %v2200_v39 = vrot.slane %v6405_v36, 3  ;;  %2306 = vmatpush.msrb.mxu0 %v4748_v3 }
 0x1d1   : > { %v1692_v40 = vpop.f32.mrf.mxu0  ;;  %2534 = vmatpush.msrb.mxu3 %v4799_v33  ;;  %2460 = vmatpush.msrb.mxu2 %v4780_v20  ;;  %v2354_v30 = vrot.slane %v6405_v36, 5  ;;  %v2429_v33 = vrot.slane %v6354_v52, 6  ;;  %v2431_v27 = vrot.slane %v6405_v36, 6 }
 0x1d2   : > { %v1953_v34 = vadd.f32 %v1940_v9, %v1869_v31  ;;  %v1703_v25 = vadd.f32 %v1692_v40, %v1619_v28  ;;  %v2019_v13 = vsel %vm1335_vm3, %v2016_v1, %v2018_v21  ;;  %v2124_v15 = vsel %vm1463_vm4, %v2121_v18, %v2123_v17 }
 0x1d3   : > { %2052 = vmatmul.f32.gmra.mxu0 %v2019_v13  ;;  %2159 = vmatmul.f32.gmra.mxu2 %v2124_v15  ;;  %v2201_v44 = vsel %vm1546_vm5, %v2198_v26, %v2200_v39  ;;  %v2350_v31 = vrot.slane %v6296_v6, 5  ;;  %v2427_v13 = vrot.slane %v6296_v6, 6 }
 0x1d4   : > { %v1964_v47 = vadd.f32 %v6225_v0, %v1953_v34  ;;  %2236 = vmatmul.f32.gmra.mxu3 %v2201_v44  ;;  %v1787_v56 = vadd.f32 %v1776_v57, %v1703_v25  ;;  %v2273_v25 = vrot.slane %v6296_v6, 4  ;;  %v2503_v57 = vrot.slane %v6240_v60, 7 }
 0x1d5   : > { %2535 = vmatpush.msrb.mxu3 %v4798_v29  ;;  %v2428_v19 = vsel %vm672_vm0, %v2426_v43, %v2427_v13  ;;  %v2275_v6 = vrot.slane %v6354_v52, 4  ;;  %v2430_v63 = vsel %vm672_vm0, %v2427_v13, %v2429_v33  ;;  %v2589_v13 = vld [vmem:[%s8456_s7 + $0x50] sm:$0xff]  ;;  %v2588_v43 = vld [vmem:[%s8456_s7 + $0x48] sm:$0xff] }
 0x1d6   : > { %v6451_v49 = vmax.f32 %v1964_v47, 0.0  ;;  %v2274_v44 = vsel %vm1630_vm7, %v2272_v16, %v2273_v25  ;;  %v2505_v47 = vsel %vm1881_vm8, %v2503_v57, %v2504_v45  ;;  %v4858_v16 = vld [vmem:[%s8456_s7 + $0x1f0] sm:$0xff] }
 0x1d7   : > { %v1859_v12 = vpop.f32.mrf.mxu2  ;;  %2536 = vmatpush.msrb.mxu3 %v4797_v35 }
 0x1d8   : > { %v1870_v46 = vadd.f32 %v1859_v12, %v1787_v56  ;;  %v1943_v61 = vpop.f32.mrf.mxu3  ;;  %2093 = vmatmul.f32.gmra.mxu1 %v6451_v49  ;;  %v2020_v1 = vrot.slane %v6451_v49, 1  ;;  %v2125_v18 = vrot.slane %v6451_v49, 2  ;;  %v2202_v26 = vrot.slane %v6451_v49, 3 }
 0x1d9   : > { %v1695_v41 = vpop.f32.mrf.mxu0  ;;  %2537 = vmatpush.msrb.mxu3 %v4796_v38  ;;  %v2506_v56 = vrot.slane %v6354_v52, 7  ;;  %v2277_v12 = vrot.slane %v6405_v36, 4  ;;  %v2433_v2 = vrot.slane %v6451_v49, 6 }
 0x1da   : > { %v1954_v53 = vadd.f32 %v1943_v61, %v1870_v46  ;;  %v1704_v32 = vadd.f32 %v1695_v41, %v1620_v62  ;;  %v2021_v51 = vsel %vm1335_vm3, %v2018_v21, %v2020_v1  ;;  %v2126_v59 = vsel %vm1463_vm4, %v2123_v17, %v2125_v18 }
 0x1db   : > { %2055 = vmatmul.f32.gmra.mxu0 %v2021_v51  ;;  %2162 = vmatmul.f32.gmra.mxu2 %v2126_v59  ;;  %v2203_v14 = vsel %vm1546_vm5, %v2200_v39, %v2202_v26  ;;  %v2349_v21 = vrot.slane %v6240_v60, 5  ;;  %v2276_v60 = vsel %vm1630_vm7, %v2273_v25, %v2275_v6  ;;  %v2507_v29 = vsel %vm1881_vm8, %v2504_v45, %v2506_v56  ;;  %v4825_v25 = vld [vmem:[%s8456_s7 + $0xe8] sm:$0xff]  ;;  %v4842_v45 = vld [vmem:[%s8456_s7 + $0x170] sm:$0xff] }
 0x1dc   : > { %v1965_v10 = vadd.f32 %v6225_v0, %v1954_v53  ;;  %2239 = vmatmul.f32.gmra.mxu3 %v2203_v14  ;;  %v1788_v22 = vadd.f32 %v1779_v58, %v1704_v32  ;;  %v2356_v62 = vrot.slane %v6451_v49, 5  ;;  %v2278_v61 = vsel %vm1630_vm7, %v2275_v6, %v2277_v12  ;;  %v2587_v6 = vld [vmem:[%s8456_s7 + $0x40] sm:$0xff] }
 0x1dd   : > { %v2351_v39 = vsel %vm1714_vm6, %v2349_v21, %v2350_v31  ;;  %v2279_v41 = vrot.slane %v6451_v49, 4  ;;  %v2434_v51 = vsel %vm672_vm0, %v2431_v27, %v2433_v2 }
 0x1de   : > { %v6486_v54 = vmax.f32 %v1965_v10, 0.0  ;;  %v2357_v46 = vsel %vm1714_vm6, %v2354_v30, %v2356_v62 }
 0x1df   : > { %v1862_v37 = vpop.f32.mrf.mxu2  ;;  %v2280_v32 = vsel %vm1630_vm7, %v2277_v12, %v2279_v41  ;;  %v2585_v12 = vld [vmem:[%s8456_s7 + $0x30] sm:$0xff] }
 0x1e0   : > { %v1871_v50 = vadd.f32 %v1862_v37, %v1788_v22  ;;  %2096 = vmatmul.f32.gmra.mxu1 %v6486_v54  ;;  %v2022_v23 = vrot.slane %v6486_v54, 1  ;;  %v2127_v55 = vrot.slane %v6486_v54, 2  ;;  %v2204_v7 = vrot.slane %v6486_v54, 3  ;;  %v1946_v8 = vpop.f32.mrf.mxu3 }
 0x1e1   : > { %v2281_v3 = vrot.slane %v6486_v54, 4  ;;  %v2435_v14 = vrot.slane %v6486_v54, 6 }
 0x1e2   : > { %v1955_v24 = vadd.f32 %v1946_v8, %v1871_v50  ;;  %v2023_v28 = vsel %vm1335_vm3, %v2020_v1, %v2022_v23  ;;  %v2128_v4 = vsel %vm1463_vm4, %v2125_v18, %v2127_v55  ;;  %v2205_v11 = vsel %vm1546_vm5, %v2202_v26, %v2204_v7 }
 0x1e3   : > { %2058 = vmatmul.f32.gmra.mxu0 %v2023_v28  ;;  %2165 = vmatmul.f32.gmra.mxu2 %v2128_v4  ;;  %v2432_v1 = vsel %vm672_vm0, %v2429_v33, %v2431_v27  ;;  %v2358_v26 = vrot.slane %v6486_v54, 5  ;;  %v2282_v10 = vsel %vm1630_vm7, %v2279_v41, %v2281_v3  ;;  %v2436_v38 = vsel %vm672_vm0, %v2433_v2, %v2435_v14  ;;  %v2594_v28 = vld [vmem:[%s8456_s7 + $0x78] sm:$0xff]  ;;  %v2593_v4 = vld [vmem:[%s8456_s7 + $0x70] sm:$0xff]  ;;  %v4841_v33 = vld [vmem:[%s8456_s7 + $0x168] sm:$0xff] }
 0x1e4   : > { %v1966_v9 = vadd.f32 %v6225_v0, %v1955_v24  ;;  %2242 = vmatmul.f32.gmra.mxu3 %v2205_v11  ;;  %v2352_v0 = vrot.slane %v6354_v52, 5  ;;  %v2508_v52 = vrot.slane %v6405_v36, 7  ;;  %v2510_v36 = vrot.slane %v6451_v49, 7  ;;  %2666 = vmatpush.msra.mxu1 %v2594_v28  ;;  %v2592_v11 = vld [vmem:[%s8456_s7 + $0x68] sm:$0xff]  ;;  %v4820_v27 = vld [vmem:[%s8456_s7 + $0xc0] sm:$0xff]  ;;  %v4819_v2 = vld [vmem:[%s8456_s7 + $0xb8] sm:$0xff] }
 0x1e5   : > { %v2359_v53 = vsel %vm1714_vm6, %v2356_v62, %v2358_v26  ;;  %v2512_v49 = vrot.slane %v6486_v54, 7  ;;  %v4856_v62 = vld [vmem:[%s8456_s7 + $0x1e0] sm:$0xff]  ;;  %v4850_v28 = vld [vmem:[%s8456_s7 + $0x1b0] sm:$0xff] }
 0x1e6   : > { %v6498_v17 = vmax.f32 %v1966_v9, 0.0  ;;  %v2353_v15 = vsel %vm1714_vm6, %v2350_v31, %v2352_v0  ;;  %v2355_v48 = vsel %vm1714_vm6, %v2352_v0, %v2354_v30  ;;  %v2509_v18 = vsel %vm1881_vm8, %v2506_v56, %v2508_v52  ;;  %2667 = vmatpush.msra.mxu1 %v2593_v4  ;;  %v4827_v9 = vld [vmem:[%s8456_s7 + $0xf8] sm:$0xff]  ;;  %v4822_v56 = vld [vmem:[%s8456_s7 + $0xd0] sm:$0xff] }
 0x1e7   : > { %v2511_v59 = vsel %vm1881_vm8, %v2508_v52, %v2510_v36  ;;  %v2513_v58 = vsel %vm1881_vm8, %v2510_v36, %v2512_v49  ;;  %2634 = vmatpush.msra.mxu0 %v4827_v9  ;;  %v4859_v0 = vld [vmem:[%s8456_s7 + $0x1f8] sm:$0xff]  ;;  %v2579_v9 = vld [vmem:[%s8456_s7] sm:$0xff] }
 0x1e8   : > { %2384 = vmatmul.f32.vlgmr.msrb.gmra.mxu1 %v2351_v39  ;;  %v2129_v5 = vrot.slane %v6498_v17, 2  ;;  %v2206_v40 = vrot.slane %v6498_v17, 3  ;;  %v2360_v35 = vrot.slane %v6498_v17, 5  ;;  %v2283_v22 = vrot.slane %v6498_v17, 4  ;;  %2801 = vmatpush.msra.mxu3 %v4859_v0  ;;  %v4855_v52 = vld [vmem:[%s8456_s7 + $0x1d8] sm:$0xff]  ;;  %v4832_v0 = vld [vmem:[%s8456_s7 + $0x120] sm:$0xff] }
 0x1e9   : > { %v2437_v37 = vrot.slane %v6498_v17, 6  ;;  %v2514_v50 = vrot.slane %v6498_v17, 7  ;;  %2668 = vmatpush.msra.mxu1 %v2592_v11 }
 0x1ea   : > { %v2130_v42 = vsel %vm1463_vm4, %v2127_v55, %v2129_v5  ;;  %v2207_v34 = vsel %vm1546_vm5, %v2204_v7, %v2206_v40  ;;  %v2361_v20 = vsel %vm1714_vm6, %v2358_v26, %v2360_v35  ;;  %v2591_v5 = vld [vmem:[%s8456_s7 + $0x60] sm:$0xff]  ;;  %v4826_v40 = vld [vmem:[%s8456_s7 + $0xf0] sm:$0xff]  ;;  %2802 = vmatpush.msra.mxu3 %v4858_v16  ;;  %v4853_v35 = vld [vmem:[%s8456_s7 + $0x1c8] sm:$0xff] }
 0x1eb   : > { %2061 = vmatmul.f32.gmra.mxu0 %v2022_v23  ;;  %2168 = vmatmul.f32.gmra.mxu2 %v2130_v42  ;;  %v2284_v23 = vsel %vm1630_vm7, %v2281_v3, %v2283_v22  ;;  %v2438_v54 = vsel %vm672_vm0, %v2435_v14, %v2437_v37  ;;  %v2515_v55 = vsel %vm1881_vm8, %v2512_v49, %v2514_v50  ;;  %v2590_v42 = vld [vmem:[%s8456_s7 + $0x58] sm:$0xff]  ;;  %v4817_v14 = vld [vmem:[%s8456_s7 + $0xa8] sm:$0xff]  ;;  %v4852_v49 = vld [vmem:[%s8456_s7 + $0x1c0] sm:$0xff] }
 0x1ec   : > { %2245 = vmatmul.f32.gmra.mxu3 %v2207_v34  ;;  %2669 = vmatpush.msra.mxu1 %v2591_v5  ;;  %v4843_v34 = vld [vmem:[%s8456_s7 + $0x178] sm:$0xff]  ;;  %v2580_v50 = vld [vmem:[%s8456_s7 + $0x8] sm:$0xff]  ;;  %v4814_v5 = vld [vmem:[%s8456_s7 + $0x90] sm:$0xff] }
 0x1ed   : > { %2635 = vmatpush.msra.mxu0 %v4826_v40  ;;  %2731 = vmatpush.msra.mxu2 %v4843_v34  ;;  %v2582_v3 = vld [vmem:[%s8456_s7 + $0x18] sm:$0xff]  ;;  %v4833_v40 = vld [vmem:[%s8456_s7 + $0x128] sm:$0xff] }
 0x1ee   : > { %2670 = vmatpush.msra.mxu1 %v2590_v42  ;;  %v4851_v22 = vld [vmem:[%s8456_s7 + $0x1b8] sm:$0xff]  ;;  %v4849_v42 = vld [vmem:[%s8456_s7 + $0x1a8] sm:$0xff] }
 0x1ef   : > { %2636 = vmatpush.msra.mxu0 %v4825_v25  ;;  %2732 = vmatpush.msra.mxu2 %v4842_v45  ;;  %v4813_v34 = vld [vmem:[%s8456_s7 + $0x88] sm:$0xff]  ;;  %v4848_v25 = vld [vmem:[%s8456_s7 + $0x1a0] sm:$0xff]  ;;  %v4847_v45 = vld [vmem:[%s8456_s7 + $0x198] sm:$0xff] }
 0x1f0   : > { %2387 = vmatmul.f32.gmra.mxu1 %v2353_v15  ;;  %v4824_v15 = vld [vmem:[%s8456_s7 + $0xe0] sm:$0xff] }
 0x1f1   : > { %2671 = vmatpush.msra.mxu1 %v2589_v13  ;;  %2637 = vmatpush.msra.mxu0 %v4824_v15  ;;  %v4812_v13 = vld [vmem:[%s8456_s7 + $0x80] sm:$0xff]  ;;  %v4831_v15 = vld [vmem:[%s8456_s7 + $0x118] sm:$0xff] }
 0x1f2   : > { %2733 = vmatpush.msra.mxu2 %v4841_v33 }
 0x1f3   : > { %2307 = vmatmul.f32.vlgmr.msrb.gmra.mxu0 %v2274_v44  ;;  %2461 = vmatmul.f32.vlgmr.msrb.gmra.mxu2 %v2428_v19  ;;  %v4823_v44 = vld [vmem:[%s8456_s7 + $0xd8] sm:$0xff] }
 0x1f4   : > { %2538 = vmatmul.f32.vlgmr.msrb.gmra.mxu3 %v2505_v47  ;;  %2672 = vmatpush.msra.mxu1 %v2588_v43  ;;  %v4875_v43 = vld [vmem:[%s8456_s7 + $0x278] sm:$0xff] }
 0x1f5   : > { %2638 = vmatpush.msra.mxu0 %v4823_v44  ;;  %v4830_v44 = vld [vmem:[%s8456_s7 + $0x110] sm:$0xff] }
 0x1f6   : > { %2673 = vmatpush.msra.mxu1 %v2587_v6  ;;  %v4846_v6 = vld [vmem:[%s8456_s7 + $0x190] sm:$0xff] }
 0x1f7   : > { %2639 = vmatpush.msra.mxu0 %v4822_v56  ;;  %v4874_v56 = vld [vmem:[%s8456_s7 + $0x270] sm:$0xff] }
 0x1f8   : > { %2390 = vmatmul.f32.gmra.mxu1 %v2355_v48  ;;  %v4857_v48 = vld [vmem:[%s8456_s7 + $0x1e8] sm:$0xff] }
 0x1f9   : > { %2803 = vmatpush.msra.mxu3 %v4857_v48 }
 0x1fb   : > { %2310 = vmatmul.f32.gmra.mxu0 %v2276_v60  ;;  %2464 = vmatmul.f32.gmra.mxu2 %v2430_v63  ;;  %v2586_v60 = vld [vmem:[%s8456_s7 + $0x38] sm:$0xff]  ;;  %v4821_v63 = vld [vmem:[%s8456_s7 + $0xc8] sm:$0xff] }
 0x1fc   : > { %2541 = vmatmul.f32.gmra.mxu3 %v2507_v29  ;;  %v4840_v29 = vld [vmem:[%s8456_s7 + $0x160] sm:$0xff]  ;;  %2674 = vmatpush.msra.mxu1 %v2586_v60  ;;  %v4891_v60 = vld [vmem:[%s8456_s7 + $0x2f8] sm:$0xff] }
 0x1fd   : > { %2734 = vmatpush.msra.mxu2 %v4840_v29  ;;  %2804 = vmatpush.msra.mxu3 %v4856_v62  ;;  %v4829_v29 = vld [vmem:[%s8456_s7 + $0x108] sm:$0xff] }
 0x1fe   : > { %2640 = vmatpush.msra.mxu0 %v4821_v63  ;;  %2675 = vmatpush.msra.mxu1 %v2585_v12  ;;  %v4845_v62 = vld [vmem:[%s8456_s7 + $0x188] sm:$0xff] }
 0x1ff   : > { %2805 = vmatpush.msra.mxu3 %v4855_v52  ;;  %v4844_v52 = vld [vmem:[%s8456_s7 + $0x180] sm:$0xff] }
 0x200   : > { %2393 = vmatmul.f32.gmra.mxu1 %v2357_v46  ;;  %v4839_v46 = vld [vmem:[%s8456_s7 + $0x158] sm:$0xff]  ;;  %2641 = vmatpush.msra.mxu0 %v4820_v27  ;;  %v4873_v27 = vld [vmem:[%s8456_s7 + $0x268] sm:$0xff] }
 0x201   : > { %2735 = vmatpush.msra.mxu2 %v4839_v46  ;;  %v4828_v46 = vld [vmem:[%s8456_s7 + $0x100] sm:$0xff] }
 0x202   : > { %2642 = vmatpush.msra.mxu0 %v4819_v2  ;;  %v4907_v2 = vld [vmem:[%s8456_s7 + $0x378] sm:$0xff] }
 0x203   : > { %2313 = vmatmul.f32.gmra.mxu0 %v2278_v61  ;;  %2467 = vmatmul.f32.gmra.mxu2 %v2432_v1  ;;  %v2584_v61 = vld [vmem:[%s8456_s7 + $0x28] sm:$0xff]  ;;  %v4838_v1 = vld [vmem:[%s8456_s7 + $0x150] sm:$0xff] }
 0x204   : > { %2544 = vmatmul.f32.gmra.mxu3 %v2509_v18  ;;  %v4854_v18 = vld [vmem:[%s8456_s7 + $0x1d0] sm:$0xff]  ;;  %2676 = vmatpush.msra.mxu1 %v2584_v61  ;;  %v4872_v61 = vld [vmem:[%s8456_s7 + $0x260] sm:$0xff] }
 0x205   : > { %2736 = vmatpush.msra.mxu2 %v4838_v1  ;;  %2806 = vmatpush.msra.mxu3 %v4854_v18  ;;  %v4871_v1 = vld [vmem:[%s8456_s7 + $0x258] sm:$0xff]  ;;  %v4888_v18 = vld [vmem:[%s8456_s7 + $0x2e0] sm:$0xff] }
 0x207   : > { %2807 = vmatpush.msra.mxu3 %v4853_v35 }
 0x208   : > { %2396 = vmatmul.f32.gmra.mxu1 %v2359_v53 }
 0x209   : > { %2808 = vmatpush.msra.mxu3 %v4852_v49 }
 0x20b   : > { %2316 = vmatmul.f32.gmra.mxu0 %v2280_v32  ;;  %2470 = vmatmul.f32.gmra.mxu2 %v2434_v51  ;;  %v2583_v32 = vld [vmem:[%s8456_s7 + $0x20] sm:$0xff]  ;;  %v4818_v51 = vld [vmem:[%s8456_s7 + $0xb0] sm:$0xff] }
 0x20c   : > { %2547 = vmatmul.f32.gmra.mxu3 %v2511_v59  ;;  %2677 = vmatpush.msra.mxu1 %v2583_v32  ;;  %v4837_v59 = vld [vmem:[%s8456_s7 + $0x148] sm:$0xff] }
 0x20d   : > { %2737 = vmatpush.msra.mxu2 %v4837_v59  ;;  %2643 = vmatpush.msra.mxu0 %v4818_v51 }
 0x20e   : > { %2678 = vmatpush.msra.mxu1 %v2582_v3  ;;  %2809 = vmatpush.msra.mxu3 %v4851_v22  ;;  %v4870_v3 = vld [vmem:[%s8456_s7 + $0x250] sm:$0xff]  ;;  %v4868_v22 = vld [vmem:[%s8456_s7 + $0x240] sm:$0xff] }
 0x20f   : > { %2644 = vmatpush.msra.mxu0 %v4817_v14  ;;  %v4887_v14 = vld [vmem:[%s8456_s7 + $0x2d8] sm:$0xff] }
 0x210   : > { %2399 = vmatmul.f32.gmra.mxu1 %v2361_v20  ;;  %v4836_v20 = vld [vmem:[%s8456_s7 + $0x140] sm:$0xff]  ;;  %2810 = vmatpush.msra.mxu3 %v4850_v28  ;;  %v4867_v28 = vld [vmem:[%s8456_s7 + $0x238] sm:$0xff] }
 0x211   : > { %2738 = vmatpush.msra.mxu2 %v4836_v20 }
 0x212   : > { %2811 = vmatpush.msra.mxu3 %v4849_v42  ;;  %v4922_v42 = vld [vmem:[%s8456_s7 + $0x3f0] sm:$0xff] }
 0x213   : > { %2319 = vmatmul.f32.gmra.mxu0 %v2282_v10  ;;  %2473 = vmatmul.f32.gmra.mxu2 %v2436_v38  ;;  %v2581_v10 = vld [vmem:[%s8456_s7 + $0x10] sm:$0xff]  ;;  %v4816_v38 = vld [vmem:[%s8456_s7 + $0xa0] sm:$0xff] }
 0x214   : > { %2550 = vmatmul.f32.gmra.mxu3 %v2513_v58  ;;  %v4835_v58 = vld [vmem:[%s8456_s7 + $0x138] sm:$0xff]  ;;  %2679 = vmatpush.msra.mxu1 %v2581_v10  ;;  %v4869_v10 = vld [vmem:[%s8456_s7 + $0x248] sm:$0xff] }
 0x215   : > { %2739 = vmatpush.msra.mxu2 %v4835_v58  ;;  %2645 = vmatpush.msra.mxu0 %v4816_v38  ;;  %v4886_v38 = vld [vmem:[%s8456_s7 + $0x2d0] sm:$0xff] }
 0x216   : > { %2680 = vmatpush.msra.mxu1 %v2580_v50  ;;  %2812 = vmatpush.msra.mxu3 %v4848_v25  ;;  %v4885_v50 = vld [vmem:[%s8456_s7 + $0x2c8] sm:$0xff] }
 0x218   : > { %2681 = vmatpush.msra.mxu1 %v2579_v9  ;;  %2813 = vmatpush.msra.mxu3 %v4847_v45  ;;  %v4866_v45 = vld [vmem:[%s8456_s7 + $0x230] sm:$0xff] }
 0x21a   : > { %2814 = vmatpush.msra.mxu3 %v4846_v6  ;;  %2941 = vmatpush.msrb.mxu1 %v4891_v60  ;;  %v4921_v60 = vld [vmem:[%s8456_s7 + $0x3e8] sm:$0xff] }
 0x21b   : > { %2322 = vmatmul.f32.gmra.mxu0 %v2284_v23  ;;  %2476 = vmatmul.f32.gmra.mxu2 %v2438_v54  ;;  %v4815_v23 = vld [vmem:[%s8456_s7 + $0x98] sm:$0xff]  ;;  %v4834_v54 = vld [vmem:[%s8456_s7 + $0x130] sm:$0xff] }
 0x21c   : > { %2553 = vmatmul.f32.gmra.mxu3 %v2515_v55  ;;  %2740 = vmatpush.msra.mxu2 %v4834_v54  ;;  %v4923_v54 = vld [vmem:[%s8456_s7 + $0x3f8] sm:$0xff] }
 0x21d   : > { %2646 = vmatpush.msra.mxu0 %v4815_v23  ;;  %2815 = vmatpush.msra.mxu3 %v4845_v62  ;;  %v4901_v62 = vld [vmem:[%s8456_s7 + $0x348] sm:$0xff] }
 0x21e   : > { %2741 = vmatpush.msra.mxu2 %v4833_v40  ;;  %v4903_v40 = vld [vmem:[%s8456_s7 + $0x358] sm:$0xff] }
 0x21f   : > { %2647 = vmatpush.msra.mxu0 %v4814_v5  ;;  %2816 = vmatpush.msra.mxu3 %v4844_v52  ;;  %v4884_v5 = vld [vmem:[%s8456_s7 + $0x2c0] sm:$0xff]  ;;  %v4919_v52 = vld [vmem:[%s8456_s7 + $0x3d8] sm:$0xff] }
 0x220   : > { %2742 = vmatpush.msra.mxu2 %v4832_v0 }
 0x221   : > { %2648 = vmatpush.msra.mxu0 %v4813_v34  ;;  %3081 = vmatpush.msrb.mxu3 %v4923_v54 }
 0x222   : > { %2743 = vmatpush.msra.mxu2 %v4831_v15 }
 0x223   : > { %2649 = vmatpush.msra.mxu0 %v4812_v13  ;;  %v6877_v13 = vld [vmem:[%s8455_s6] ss:$0 sm:$0xff]  ;;  %3082 = vmatpush.msrb.mxu3 %v4922_v42 }
 0x224   : > { %2744 = vmatpush.msra.mxu2 %v4830_v44 }
 0x225   : > { %2871 = vmatpush.msrb.mxu0 %v4875_v43  ;;  %3083 = vmatpush.msrb.mxu3 %v4921_v60 }
 0x226   : > { %2745 = vmatpush.msra.mxu2 %v4829_v29 }
 0x227   : > { %2872 = vmatpush.msrb.mxu0 %v4874_v56  ;;  %v4902_v56 = vld [vmem:[%s8456_s7 + $0x350] sm:$0xff] }
 0x228   : > { %2746 = vmatpush.msra.mxu2 %v4828_v46  ;;  %v4900_v46 = vld [vmem:[%s8456_s7 + $0x340] sm:$0xff] }
 0x229   : > { %2873 = vmatpush.msrb.mxu0 %v4873_v27  ;;  %v4864_v27 = vld [vmem:[%s8456_s7 + $0x220] sm:$0xff] }
 0x22a   : > { %3011 = vmatpush.msrb.mxu2 %v4907_v2  ;;  %v4899_v2 = vld [vmem:[%s8456_s7 + $0x338] sm:$0xff] }
 0x22b   : > { %2874 = vmatpush.msrb.mxu0 %v4872_v61  ;;  %v4863_v61 = vld [vmem:[%s8456_s7 + $0x218] sm:$0xff] }
 0x22d   : > { %2875 = vmatpush.msrb.mxu0 %v4871_v1 }
 0x22f   : > { %2876 = vmatpush.msrb.mxu0 %v4870_v3 }
 0x231   : > { %2877 = vmatpush.msrb.mxu0 %v4869_v10  ;;  %v4879_v10 = vld [vmem:[%s8456_s7 + $0x298] sm:$0xff] }
 0x233   : > { %2878 = vmatpush.msrb.mxu0 %v4868_v22 }
 0x235   : > { %v6554_v7 = vpop.f32.mrf.mxu1  ;;  %2879 = vmatpush.msrb.mxu0 %v4867_v28 }
 0x237   : > { %2880 = vmatpush.msrb.mxu0 %v4866_v45 }
 0x23d   : > { %v6556_v8 = vpop.f32.mrf.mxu1 }
 0x240   : > { %v6558_v24 = vpop.f32.mrf.mxu0 }
 0x241   : > { %v2083_v63 = vadd.f32 %v6554_v7, %v6558_v24  ;;  %v4890_v7 = vld [vmem:[%s8456_s7 + $0x2f0] sm:$0xff] }
 0x242   : > { %2942 = vmatpush.msrb.mxu1 %v4890_v7 }
 0x245   : > { %v6569_v31 = vpop.f32.mrf.mxu1 }
 0x246   : > { %v6574_v21 = vpop.f32.mrf.mxu2 }
 0x247   : > { %v6576_v17 = vpop.f32.mrf.mxu3  ;;  %v2172_v24 = vadd.f32 %v6574_v21, %v2083_v63  ;;  %v4889_v21 = vld [vmem:[%s8456_s7 + $0x2e8] sm:$0xff] }
 0x248   : > { %v6578_v39 = vpop.f32.mrf.mxu0  ;;  %2943 = vmatpush.msrb.mxu1 %v4889_v21  ;;  %v4865_v63 = vld [vmem:[%s8456_s7 + $0x228] sm:$0xff] }
 0x249   : > { %v2249_v51 = vadd.f32 %v6576_v17, %v2172_v24  ;;  %v2086_v20 = vadd.f32 %v6556_v8, %v6578_v39  ;;  %v4906_v17 = vld [vmem:[%s8456_s7 + $0x370] sm:$0xff]  ;;  %v4905_v8 = vld [vmem:[%s8456_s7 + $0x368] sm:$0xff]  ;;  %2881 = vmatpush.msrb.mxu0 %v4865_v63 }
 0x24a   : > { %2944 = vmatpush.msrb.mxu1 %v4888_v18  ;;  %3012 = vmatpush.msrb.mxu2 %v4906_v17  ;;  %v4880_v18 = vld [vmem:[%s8456_s7 + $0x2a0] sm:$0xff]  ;;  %v4862_v17 = vld [vmem:[%s8456_s7 + $0x210] sm:$0xff] }
 0x24b   : > { %2882 = vmatpush.msrb.mxu0 %v4864_v27 }
 0x24c   : > { %2945 = vmatpush.msrb.mxu1 %v4887_v14  ;;  %3013 = vmatpush.msrb.mxu2 %v4905_v8  ;;  %v4861_v8 = vld [vmem:[%s8456_s7 + $0x208] sm:$0xff] }
 0x24d   : > { %v6613_v57 = vpop.f32.mrf.mxu1  ;;  %2883 = vmatpush.msrb.mxu0 %v4863_v61  ;;  %v7028_v61 = vld [vmem:[%s8459_s10 + $0xf0] sm:$0xff] }
 0x24e   : > { %v6618_v19 = vpop.f32.mrf.mxu2  ;;  %2946 = vmatpush.msrb.mxu1 %v4886_v38 }
 0x24f   : > { %v6620_v47 = vpop.f32.mrf.mxu3  ;;  %v2173_v58 = vadd.f32 %v6618_v19, %v2086_v20  ;;  %v4904_v19 = vld [vmem:[%s8456_s7 + $0x360] sm:$0xff]  ;;  %2884 = vmatpush.msrb.mxu0 %v4862_v17 }
 0x250   : > { %v6622_v30 = vpop.f32.mrf.mxu0  ;;  %2947 = vmatpush.msrb.mxu1 %v4885_v50  ;;  %3014 = vmatpush.msrb.mxu2 %v4904_v19  ;;  %v4897_v50 = vld [vmem:[%s8456_s7 + $0x328] sm:$0xff] }
 0x251   : > { %v2250_v34 = vadd.f32 %v6620_v47, %v2173_v58  ;;  %v4883_v47 = vld [vmem:[%s8456_s7 + $0x2b8] sm:$0xff]  ;;  %v2089_v43 = vadd.f32 %v6569_v31, %v6622_v30  ;;  %v4882_v31 = vld [vmem:[%s8456_s7 + $0x2b0] sm:$0xff]  ;;  %2885 = vmatpush.msrb.mxu0 %v4861_v8  ;;  %v4877_v19 = vld [vmem:[%s8456_s7 + $0x288] sm:$0xff] }
 0x252   : > { %2948 = vmatpush.msrb.mxu1 %v4884_v5  ;;  %3015 = vmatpush.msrb.mxu2 %v4903_v40  ;;  %v4898_v58 = vld [vmem:[%s8456_s7 + $0x330] sm:$0xff]  ;;  %v4915_v5 = vld [vmem:[%s8456_s7 + $0x3b8] sm:$0xff] }
 0x254   : > { %2949 = vmatpush.msrb.mxu1 %v4883_v47  ;;  %3016 = vmatpush.msrb.mxu2 %v4902_v56 }
 0x255   : > { %v6669_v26 = vpop.f32.mrf.mxu1 }
 0x256   : > { %v6671_v41 = vpop.f32.mrf.mxu2  ;;  %2950 = vmatpush.msrb.mxu1 %v4882_v31  ;;  %3017 = vmatpush.msrb.mxu2 %v4901_v62  ;;  %v6996_v31 = vld [vmem:[%s8459_s10 + $0x78] sm:$0xff] }
 0x257   : > { %v6676_v53 = vpop.f32.mrf.mxu3  ;;  %v2174_v30 = vadd.f32 %v6671_v41, %v2089_v43  ;;  %v4881_v41 = vld [vmem:[%s8456_s7 + $0x2a8] sm:$0xff] }
 0x258   : > { %v6678_v36 = vpop.f32.mrf.mxu0  ;;  %2951 = vmatpush.msrb.mxu1 %v4881_v41  ;;  %3018 = vmatpush.msrb.mxu2 %v4900_v46  ;;  %v4894_v46 = vld [vmem:[%s8456_s7 + $0x310] sm:$0xff] }
 0x259   : > { %v2092_v20 = vadd.f32 %v6613_v57, %v6678_v36  ;;  %v4917_v57 = vld [vmem:[%s8456_s7 + $0x3c8] sm:$0xff] }
 0x25a   : > { %2952 = vmatpush.msrb.mxu1 %v4880_v18  ;;  %3019 = vmatpush.msrb.mxu2 %v4899_v2  ;;  %v4893_v2 = vld [vmem:[%s8456_s7 + $0x308] sm:$0xff] }
 0x25c   : > { %2953 = vmatpush.msrb.mxu1 %v4879_v10  ;;  %3020 = vmatpush.msrb.mxu2 %v4898_v58  ;;  %v7062_v58 = vld [vmem:[%s8459_s10 + $0xe8] sm:$0xff] }
 0x25d   : > { %v6732_v4 = vpop.f32.mrf.mxu1 }
 0x25e   : > { %v6716_v37 = vpop.f32.mrf.mxu2  ;;  %3021 = vmatpush.msrb.mxu2 %v4897_v50 }
 0x25f   : > { %v6727_v55 = vpop.f32.mrf.mxu3  ;;  %v2175_v36 = vadd.f32 %v6716_v37, %v2092_v20  ;;  %v4916_v37 = vld [vmem:[%s8456_s7 + $0x3c0] sm:$0xff] }
 0x260   : > { %v6734_v11 = vpop.f32.mrf.mxu0 }
 0x261   : > { %v2252_v40 = vadd.f32 %v6727_v55, %v2175_v36 }
 0x265   : > { %v2385_v12 = vpop.f32.mrf.mxu1 }
 0x266   : > { %v6766_v16 = vpop.f32.mrf.mxu2 }
 0x267   : > { %v6777_v33 = vpop.f32.mrf.mxu3 }
 0x268   : > { %v6779_v48 = vpop.f32.mrf.mxu0 }
 0x26d   : > { %v2388_v39 = vpop.f32.mrf.mxu1 }
 0x26e   : > { %v6823_v32 = vpop.f32.mrf.mxu2 }
 0x26f   : > { %v6826_v59 = vpop.f32.mrf.mxu3 }
 0x270   : > { %v2308_v35 = vpop.f32.mrf.mxu0 }
 0x271   : > { %v2326_v49 = vadd.f32 %v2308_v35, %v2249_v51  ;;  %v4918_v51 = vld [vmem:[%s8456_s7 + $0x3d0] sm:$0xff]  ;;  %v2251_v35 = vadd.f32 %v6676_v53, %v2174_v30 }
 0x273   : > { %v2403_v23 = vadd.f32 %v2385_v12, %v2326_v49  ;;  %v4920_v12 = vld [vmem:[%s8456_s7 + $0x3e0] sm:$0xff] }
 0x274   : > { %3084 = vmatpush.msrb.mxu3 %v4920_v12 }
 0x275   : > { %v2391_v21 = vpop.f32.mrf.mxu1 }
 0x276   : > { %v2462_v9 = vpop.f32.mrf.mxu2  ;;  %3085 = vmatpush.msrb.mxu3 %v4919_v52 }
 0x277   : > { %v2480_v0 = vadd.f32 %v2462_v9, %v2403_v23  ;;  %v2539_v25 = vpop.f32.mrf.mxu3  ;;  %v4860_v23 = vld [vmem:[%s8456_s7 + $0x200] sm:$0xff] }
 0x278   : > { %v2311_v15 = vpop.f32.mrf.mxu0  ;;  %3086 = vmatpush.msrb.mxu3 %v4918_v51  ;;  %v4896_v9 = vld [vmem:[%s8456_s7 + $0x320] sm:$0xff]  ;;  %2886 = vmatpush.msrb.mxu0 %v4860_v23  ;;  %v7080_v23 = vld [vmem:[%s8459_s10 + $0x58] sm:$0xff] }
 0x279   : > { %v2557_v44 = vadd.f32 %v2539_v25, %v2480_v0  ;;  %v2327_v6 = vadd.f32 %v2311_v15, %v2250_v34  ;;  %v4876_v25 = vld [vmem:[%s8456_s7 + $0x280] sm:$0xff]  ;;  %v4895_v15 = vld [vmem:[%s8456_s7 + $0x318] sm:$0xff]  ;;  %3022 = vmatpush.msrb.mxu2 %v4896_v9  ;;  %v4910_v9 = vld [vmem:[%s8456_s7 + $0x390] sm:$0xff] }
 0x27a   : > { %3087 = vmatpush.msrb.mxu3 %v4917_v57  ;;  %v4912_v51 = vld [vmem:[%s8456_s7 + $0x3a0] sm:$0xff] }
 0x27b   : > { %v2567_v29 = vadd.f32 %v6877_v13, %v2557_v44  ;;  %v2404_v24 = vadd.f32 %v2388_v39, %v2327_v6  ;;  %v4878_v39 = vld [vmem:[%s8456_s7 + $0x290] sm:$0xff]  ;;  %v2095_v6 = vadd.f32 %v6669_v26, %v6734_v11  ;;  %3023 = vmatpush.msrb.mxu2 %v4895_v15  ;;  %v7006_v11 = vld [vmem:[%s8459_s10 + $0xf8] sm:$0xff] }
 0x27c   : > { %2954 = vmatpush.msrb.mxu1 %v4878_v39  ;;  %3088 = vmatpush.msrb.mxu3 %v4916_v37  ;;  %v4914_v26 = vld [vmem:[%s8456_s7 + $0x3b0] sm:$0xff] }
 0x27d   : > { %v6913_v7 = vmax.f32 %v2567_v29, 0.0  ;;  %v2394_v56 = vpop.f32.mrf.mxu1  ;;  %v2176_v27 = vadd.f32 %v6766_v16, %v2095_v6  ;;  %v4913_v16 = vld [vmem:[%s8456_s7 + $0x3a8] sm:$0xff]  ;;  %3024 = vmatpush.msrb.mxu2 %v4894_v46 }
 0x27e   : > { %v2465_v1 = vpop.f32.mrf.mxu2  ;;  %2955 = vmatpush.msrb.mxu1 %v4877_v19  ;;  %3089 = vmatpush.msrb.mxu3 %v4915_v5  ;;  %v7085_v19 = vld [vmem:[%s8459_s10 + $0xe0] sm:$0xff]  ;;  %v7100_v5 = vld [vmem:[%s8459_s10 + $0x50] sm:$0xff] }
 0x27f   : > { %v2481_v3 = vadd.f32 %v2465_v1, %v2404_v24  ;;  %v2542_v14 = vpop.f32.mrf.mxu3  ;;  %2682 = vmatmul.f32.vlgmr.msra.gmra.mxu1 %v6913_v7  ;;  %v2618_v34 = vrot.slane %v6913_v7, 1  ;;  %v2715_v0 = vrot.slane %v6913_v7, 2  ;;  %v2785_v63 = vrot.slane %v6913_v7, 3  ;;  %v7015_v24 = vld [vmem:[%s8459_s10 + $0x70] sm:$0xff]  ;;  %3025 = vmatpush.msrb.mxu2 %v4893_v2  ;;  %v7171_v2 = vld [vmem:[%s8459_s10 + $0x38] sm:$0xff] }
 0x280   : > { %v2314_v49 = vpop.f32.mrf.mxu0  ;;  %2956 = vmatpush.msrb.mxu1 %v4876_v25  ;;  %3090 = vmatpush.msrb.mxu3 %v4914_v26 }
 0x281   : > { %v2558_v53 = vadd.f32 %v2542_v14, %v2481_v3  ;;  %v2328_v38 = vadd.f32 %v2314_v49, %v2251_v35  ;;  %v2253_v35 = vadd.f32 %v6777_v33, %v2176_v27  ;;  %v7050_v14 = vld [vmem:[%s8459_s10 + $0x60] sm:$0xff]  ;;  %v2098_v33 = vadd.f32 %v6732_v4, %v6779_v48  ;;  %v4911_v48 = vld [vmem:[%s8456_s7 + $0x398] sm:$0xff] }
 0x282   : > { %3248 = vmatpush.msra.mxu1 %v7006_v11  ;;  %3091 = vmatpush.msrb.mxu3 %v4913_v16  ;;  %v4892_v4 = vld [vmem:[%s8456_s7 + $0x300] sm:$0xff] }
 0x283   : > { %v2568_v22 = vadd.f32 %v6877_v13, %v2558_v53  ;;  %v2405_v28 = vadd.f32 %v2391_v21, %v2328_v38  ;;  %v7034_v21 = vld [vmem:[%s8459_s10 + $0x68] sm:$0xff]  ;;  %3026 = vmatpush.msrb.mxu2 %v4892_v4  ;;  %v4908_v27 = vld [vmem:[%s8456_s7 + $0x380] sm:$0xff] }
 0x284   : > { %3249 = vmatpush.msra.mxu1 %v7028_v61  ;;  %3092 = vmatpush.msrb.mxu3 %v4912_v51  ;;  %v7164_v16 = vld [vmem:[%s8459_s10 + $0x160] sm:$0xff] }
 0x285   : > { %v6969_v54 = vmax.f32 %v2568_v22, 0.0  ;;  %v2177_v22 = vadd.f32 %v6823_v32, %v2098_v33  ;;  %v2397_v50 = vpop.f32.mrf.mxu1  ;;  %v7092_v32 = vld [vmem:[%s8459_s10 + $0x178] sm:$0xff] }
 0x286   : > { %v2468_v42 = vpop.f32.mrf.mxu2  ;;  %3250 = vmatpush.msra.mxu1 %v7062_v58  ;;  %3093 = vmatpush.msrb.mxu3 %v4911_v48 }
 0x287   : > { %v2482_v45 = vadd.f32 %v2468_v42, %v2405_v28  ;;  %v2545_v47 = vpop.f32.mrf.mxu3  ;;  %2685 = vmatmul.f32.gmra.mxu1 %v6969_v54  ;;  %v2619_v55 = vrot.slane %v6969_v54, 1  ;;  %v2716_v43 = vrot.slane %v6969_v54, 2  ;;  %v2786_v44 = vrot.slane %v6969_v54, 3 }
 0x288   : > { %v2317_v60 = vpop.f32.mrf.mxu0  ;;  %3251 = vmatpush.msra.mxu1 %v7085_v19  ;;  %v2254_v25 = vadd.f32 %v6826_v59, %v2177_v22  ;;  %3094 = vmatpush.msrb.mxu3 %v4910_v9  ;;  %v7212_v22 = vld [vmem:[%s8459_s10 + $0x150] sm:$0xff]  ;;  %v7228_v9 = vld [vmem:[%s8459_s10 + $0x188] sm:$0xff] }
 0x289   : > { %v2559_v30 = vadd.f32 %v2545_v47, %v2482_v45  ;;  %v2329_v29 = vadd.f32 %v2317_v60, %v2252_v40  ;;  %v2620_v62 = vsel %vm1335_vm3, %v2618_v34, %v2619_v55  ;;  %v2717_v12 = vsel %vm1463_vm4, %v2715_v0, %v2716_v43  ;;  %v7109_v34 = vld [vmem:[%s8459_s10 + $0xd8] sm:$0xff]  ;;  %v7114_v0 = vld [vmem:[%s8459_s10 + $0x170] sm:$0xff]  ;;  %v4909_v45 = vld [vmem:[%s8456_s7 + $0x388] sm:$0xff] }
 0x28a   : > { %2650 = vmatmul.f32.vlgmr.msra.gmra.mxu0 %v2620_v62  ;;  %2747 = vmatmul.f32.vlgmr.msra.gmra.mxu2 %v2717_v12  ;;  %v2787_v41 = vsel %vm1546_vm5, %v2785_v63, %v2786_v44  ;;  %v7138_v62 = vld [vmem:[%s8459_s10 + $0xd0] sm:$0xff]  ;;  %v7143_v12 = vld [vmem:[%s8459_s10 + $0x168] sm:$0xff] }
 0x28b   : > { %v2569_v52 = vadd.f32 %v6877_v13, %v2559_v30  ;;  %2817 = vmatmul.f32.vlgmr.msra.gmra.mxu3 %v2787_v41  ;;  %3225 = vmatpush.msra.mxu0 %v6996_v31  ;;  %v2406_v18 = vadd.f32 %v2394_v56, %v2329_v29  ;;  %v7131_v56 = vld [vmem:[%s8459_s10 + $0x48] sm:$0xff]  ;;  %v7152_v41 = vld [vmem:[%s8459_s10 + $0x40] sm:$0xff] }
 0x28c   : > { %3271 = vmatpush.msra.mxu2 %v7092_v32  ;;  %3252 = vmatpush.msra.mxu1 %v7109_v34 }
 0x28d   : > { %v7036_v1 = vmax.f32 %v2569_v52, 0.0  ;;  %3226 = vmatpush.msra.mxu0 %v7015_v24  ;;  %3095 = vmatpush.msrb.mxu3 %v4909_v45  ;;  %v7159_v52 = vld [vmem:[%s8459_s10 + $0xc8] sm:$0xff]  ;;  %v2925_v45 = vrot.slane %v6913_v7, 5 }
 0x28e   : > { %v2471_v3 = vpop.f32.mrf.mxu2  ;;  %3272 = vmatpush.msra.mxu2 %v7114_v0  ;;  %3253 = vmatpush.msra.mxu1 %v7138_v62 }
 0x28f   : > { %v2483_v20 = vadd.f32 %v2471_v3, %v2406_v18  ;;  %v2548_v49 = vpop.f32.mrf.mxu3  ;;  %2688 = vmatmul.f32.gmra.mxu1 %v7036_v1  ;;  %v2621_v17 = vrot.slane %v7036_v1, 1  ;;  %v2718_v10 = vrot.slane %v7036_v1, 2  ;;  %v2788_v53 = vrot.slane %v7036_v1, 3  ;;  %3227 = vmatpush.msra.mxu0 %v7034_v21  ;;  %v2400_v18 = vpop.f32.mrf.mxu1  ;;  %v7179_v3 = vld [vmem:[%s8459_s10 + $0xc0] sm:$0xff] }
 0x290   : > { %v2320_v38 = vpop.f32.mrf.mxu0  ;;  %3273 = vmatpush.msra.mxu2 %v7143_v12  ;;  %3096 = vmatpush.msrb.mxu3 %v4908_v27  ;;  %v7284_v27 = vld [vmem:[%s8459_s10 + $0x138] sm:$0xff] }
 0x291   : > { %v2560_v57 = vadd.f32 %v2548_v49, %v2483_v20  ;;  %v2330_v36 = vadd.f32 %v2320_v38, %v2253_v35  ;;  %v2622_v8 = vsel %vm1335_vm3, %v2619_v55, %v2621_v17  ;;  %v2719_v39 = vsel %vm1463_vm4, %v2716_v43, %v2718_v10  ;;  %3228 = vmatpush.msra.mxu0 %v7050_v14  ;;  %v7184_v20 = vld [vmem:[%s8459_s10 + $0x158] sm:$0xff] }
 0x292   : > { %2653 = vmatmul.f32.gmra.mxu0 %v2622_v8  ;;  %2750 = vmatmul.f32.gmra.mxu2 %v2719_v39  ;;  %v2789_v37 = vsel %vm1546_vm5, %v2786_v44, %v2788_v53 }
 0x293   : > { %v2570_v28 = vadd.f32 %v6877_v13, %v2560_v57  ;;  %2820 = vmatmul.f32.gmra.mxu3 %v2789_v37  ;;  %v2407_v42 = vadd.f32 %v2397_v50, %v2330_v36  ;;  %3229 = vmatpush.msra.mxu0 %v7080_v23  ;;  %v7203_v36 = vld [vmem:[%s8459_s10 + $0xb8] sm:$0xff]  ;;  %v7217_v50 = vld [vmem:[%s8459_s10 + $0x28] sm:$0xff]  ;;  %v2926_v37 = vrot.slane %v6969_v54, 5 }
 0x294   : > { %3254 = vmatpush.msra.mxu1 %v7159_v52  ;;  %3274 = vmatpush.msra.mxu2 %v7164_v16 }
 0x295   : > { %v7102_v40 = vmax.f32 %v2570_v28, 0.0  ;;  %3230 = vmatpush.msra.mxu0 %v7100_v5  ;;  %v7223_v28 = vld [vmem:[%s8459_s10 + $0xb0] sm:$0xff]  ;;  %3308 = vmatpush.msra.mxu3 %v7228_v9 }
 0x296   : > { %v2474_v15 = vpop.f32.mrf.mxu2  ;;  %3255 = vmatpush.msra.mxu1 %v7179_v3  ;;  %3275 = vmatpush.msra.mxu2 %v7184_v20 }
 0x297   : > { %v2484_v47 = vadd.f32 %v2474_v15, %v2407_v42  ;;  %v2551_v55 = vpop.f32.mrf.mxu3  ;;  %2691 = vmatmul.f32.gmra.mxu1 %v7102_v40  ;;  %v2623_v43 = vrot.slane %v7102_v40, 1  ;;  %v2720_v44 = vrot.slane %v7102_v40, 2  ;;  %v2790_v6 = vrot.slane %v7102_v40, 3  ;;  %3231 = vmatpush.msra.mxu0 %v7131_v56  ;;  %v7240_v15 = vld [vmem:[%s8459_s10 + $0x20] sm:$0xff] }
 0x298   : > { %v2323_v59 = vpop.f32.mrf.mxu0  ;;  %3256 = vmatpush.msra.mxu1 %v7203_v36  ;;  %3276 = vmatpush.msra.mxu2 %v7212_v22 }
 0x299   : > { %v2561_v60 = vadd.f32 %v2551_v55, %v2484_v47  ;;  %v2331_v63 = vadd.f32 %v2323_v59, %v2254_v25  ;;  %v2624_v30 = vsel %vm1335_vm3, %v2621_v17, %v2623_v43  ;;  %v2721_v29 = vsel %vm1463_vm4, %v2718_v10, %v2720_v44  ;;  %3232 = vmatpush.msra.mxu0 %v7152_v41  ;;  %v7191_v17 = vld [vmem:[%s8459_s10 + $0x30] sm:$0xff]  ;;  %v7235_v25 = vld [vmem:[%s8459_s10 + $0x148] sm:$0xff]  ;;  %v7256_v55 = vld [vmem:[%s8459_s10 + $0x140] sm:$0xff] }
 0x29a   : > { %2656 = vmatmul.f32.gmra.mxu0 %v2624_v30  ;;  %2753 = vmatmul.f32.gmra.mxu2 %v2721_v29  ;;  %v2791_v26 = vsel %vm1546_vm5, %v2788_v53, %v2790_v6  ;;  %v7251_v47 = vld [vmem:[%s8459_s10 + $0xa8] sm:$0xff] }
 0x29b   : > { %v2571_v46 = vadd.f32 %v6877_v13, %v2561_v60  ;;  %2823 = vmatmul.f32.gmra.mxu3 %v2791_v26  ;;  %v2408_v35 = vadd.f32 %v2400_v18, %v2331_v63  ;;  %3233 = vmatpush.msra.mxu0 %v7171_v2  ;;  %v7275_v63 = vld [vmem:[%s8459_s10 + $0xa0] sm:$0xff]  ;;  %v2928_v18 = vrot.slane %v7036_v1, 5 }
 0x29c   : > { %3257 = vmatpush.msra.mxu1 %v7223_v28  ;;  %3277 = vmatpush.msra.mxu2 %v7235_v25 }
 0x29d   : > { %v7173_v51 = vmax.f32 %v2571_v46, 0.0  ;;  %3234 = vmatpush.msra.mxu0 %v7191_v17  ;;  %v7289_v46 = vld [vmem:[%s8459_s10 + $0x10] sm:$0xff] }
 0x29e   : > { %v2477_v49 = vpop.f32.mrf.mxu2  ;;  %3258 = vmatpush.msra.mxu1 %v7251_v47  ;;  %3278 = vmatpush.msra.mxu2 %v7256_v55 }
 0x29f   : > { %v2485_v10 = vadd.f32 %v2477_v49, %v2408_v35  ;;  %2694 = vmatmul.f32.gmra.mxu1 %v7173_v51  ;;  %v2625_v53 = vrot.slane %v7173_v51, 1  ;;  %v2722_v33 = vrot.slane %v7173_v51, 2  ;;  %v2792_v38 = vrot.slane %v7173_v51, 3  ;;  %v2554_v57 = vpop.f32.mrf.mxu3  ;;  %3235 = vmatpush.msra.mxu0 %v7217_v50  ;;  %v7295_v35 = vld [vmem:[%s8459_s10 + $0x98] sm:$0xff]  ;;  %v7301_v49 = vld [vmem:[%s8459_s10 + $0x130] sm:$0xff] }
 0x2a0   : > { %3259 = vmatpush.msra.mxu1 %v7275_v63  ;;  %3279 = vmatpush.msra.mxu2 %v7284_v27 }
 0x2a1   : > { %v2562_v8 = vadd.f32 %v2554_v57, %v2485_v10  ;;  %v2626_v39 = vsel %vm1335_vm3, %v2623_v43, %v2625_v53  ;;  %v2723_v4 = vsel %vm1463_vm4, %v2720_v44, %v2722_v33  ;;  %v2793_v48 = vsel %vm1546_vm5, %v2790_v6, %v2792_v38  ;;  %3236 = vmatpush.msra.mxu0 %v7240_v15  ;;  %v7265_v44 = vld [vmem:[%s8459_s10 + $0x18] sm:$0xff]  ;;  %v7306_v10 = vld [vmem:[%s8459_s10 + $0x8] sm:$0xff] }
 0x2a2   : > { %2659 = vmatmul.f32.gmra.mxu0 %v2626_v39  ;;  %2756 = vmatmul.f32.gmra.mxu2 %v2723_v4  ;;  %v2927_v43 = vsel %vm1714_vm6, %v2925_v45, %v2926_v37  ;;  %v7321_v57 = vld [vmem:[%s8459_s10 + $0x128] sm:$0xff]  ;;  %v3066_v39 = vrot.slane %v6969_v54, 7  ;;  %v7330_v4 = vld [vmem:[%s8459_s10] sm:$0xff]  ;;  %v3065_v45 = vrot.slane %v6913_v7, 7 }
 0x2a3   : > { %v2572_v42 = vadd.f32 %v6877_v13, %v2562_v8  ;;  %2826 = vmatmul.f32.gmra.mxu3 %v2793_v48  ;;  %3237 = vmatpush.msra.mxu0 %v7265_v44  ;;  %v2929_v8 = vsel %vm1714_vm6, %v2926_v37, %v2928_v18  ;;  %v2855_v48 = vrot.slane %v6913_v7, 4 }
 0x2a4   : > { %3260 = vmatpush.msra.mxu1 %v7295_v35  ;;  %3280 = vmatpush.msra.mxu2 %v7301_v49 }
 0x2a5   : > { %v7245_v13 = vmax.f32 %v2572_v42, 0.0  ;;  %3238 = vmatpush.msra.mxu0 %v7289_v46  ;;  %v2995_v42 = vrot.slane %v6913_v7, 6  ;;  %v3067_v7 = vsel %vm1881_vm8, %v3065_v45, %v3066_v39  ;;  %v3068_v45 = vrot.slane %v7036_v1, 7 }
 0x2a6   : > { %3281 = vmatpush.msra.mxu2 %v7321_v57 }
 0x2a7   : > { %2957 = vmatmul.f32.vlgmr.msrb.gmra.mxu1 %v2927_v43  ;;  %v2627_v6 = vrot.slane %v7245_v13, 1  ;;  %v2724_v59 = vrot.slane %v7245_v13, 2  ;;  %v2794_v60 = vrot.slane %v7245_v13, 3  ;;  %3239 = vmatpush.msra.mxu0 %v7306_v10 }
 0x2a9   : > { %v2628_v30 = vsel %vm1335_vm3, %v2625_v53, %v2627_v6  ;;  %v2725_v29 = vsel %vm1463_vm4, %v2722_v33, %v2724_v59  ;;  %v2795_v26 = vsel %vm1546_vm5, %v2792_v38, %v2794_v60  ;;  %v2856_v53 = vrot.slane %v6969_v54, 4  ;;  %v7316_v38 = vld [vmem:[%s8459_s10 + $0x90] sm:$0xff]  ;;  %3240 = vmatpush.msra.mxu0 %v7330_v4  ;;  %v7348_v6 = vld [vmem:[%s8459_s10 + $0x120] sm:$0xff] }
 0x2aa   : > { %2662 = vmatmul.f32.gmra.mxu0 %v2628_v30  ;;  %2759 = vmatmul.f32.gmra.mxu2 %v2725_v29  ;;  %v2996_v33 = vrot.slane %v6969_v54, 6  ;;  %v7340_v54 = vld [vmem:[%s8459_s10 + $0x88] sm:$0xff]  ;;  %v2930_v59 = vrot.slane %v7102_v40, 5  ;;  %v7355_v60 = vld [vmem:[%s8459_s10 + $0x80] sm:$0xff]  ;;  %v7361_v30 = vld [vmem:[%s8459_s10 + $0x118] sm:$0xff] }
 0x2ab   : > { %2829 = vmatmul.f32.gmra.mxu3 %v2795_v26  ;;  %3261 = vmatpush.msra.mxu1 %v7316_v38  ;;  %v2857_v37 = vsel %vm1630_vm7, %v2855_v48, %v2856_v53  ;;  %v7366_v29 = vld [vmem:[%s8459_s10 + $0x180] sm:$0xff]  ;;  %v2858_v26 = vrot.slane %v7036_v1, 4  ;;  %v7376_v48 = vld [vmem:[%s8459_s10 + $0x110] sm:$0xff] }
 0x2ac   : > { %v2997_v43 = vsel %vm672_vm0, %v2995_v42, %v2996_v33  ;;  %3282 = vmatpush.msra.mxu2 %v7348_v6  ;;  %3309 = vmatpush.msra.mxu3 %v7366_v29  ;;  %v2931_v42 = vsel %vm1714_vm6, %v2928_v18, %v2930_v59  ;;  %v3069_v18 = vsel %vm1881_vm8, %v3066_v39, %v3068_v45 }
 0x2ad   : > { %3262 = vmatpush.msra.mxu1 %v7340_v54 }
 0x2ae   : > { %3283 = vmatpush.msra.mxu2 %v7361_v30 }
 0x2af   : > { %2960 = vmatmul.f32.gmra.mxu1 %v2929_v8  ;;  %v2998_v8 = vrot.slane %v7036_v1, 6  ;;  %v7392_v1 = vld [vmem:[%s8459_s10 + $0x108] sm:$0xff] }
 0x2b0   : > { %3263 = vmatpush.msra.mxu1 %v7355_v60  ;;  %3284 = vmatpush.msra.mxu2 %v7376_v48 }
 0x2b2   : > { %2887 = vmatmul.f32.vlgmr.msrb.gmra.mxu0 %v2857_v37  ;;  %3027 = vmatmul.f32.vlgmr.msrb.gmra.mxu2 %v2997_v43  ;;  %v2859_v37 = vsel %vm1630_vm7, %v2856_v53, %v2858_v26  ;;  %v2999_v43 = vsel %vm672_vm0, %v2996_v33, %v2998_v8  ;;  %v7401_v53 = vld [vmem:[%s8459_s10 + $0x100] sm:$0xff]  ;;  %v2860_v33 = vrot.slane %v7102_v40, 4 }
 0x2b3   : > { %3097 = vmatmul.f32.vlgmr.msrb.gmra.mxu3 %v3067_v7  ;;  %3332 = vmatpush.msrb.mxu0 %v6996_v31  ;;  %v2932_v7 = vrot.slane %v7173_v51, 5 }
 0x2b4   : > { %3415 = vmatpush.msrb.mxu3 %v7228_v9  ;;  %3355 = vmatpush.msrb.mxu1 %v7006_v11 }
 0x2b5   : > { %3333 = vmatpush.msrb.mxu0 %v7015_v24  ;;  %3285 = vmatpush.msra.mxu2 %v7392_v1  ;;  %v2933_v39 = vsel %vm1714_vm6, %v2930_v59, %v2932_v7  ;;  %v2934_v59 = vrot.slane %v7245_v13, 5 }
 0x2b6   : > { %3416 = vmatpush.msrb.mxu3 %v7366_v29  ;;  %3356 = vmatpush.msrb.mxu1 %v7028_v61 }
 0x2b7   : > { %2963 = vmatmul.f32.gmra.mxu1 %v2931_v42  ;;  %3334 = vmatpush.msrb.mxu0 %v7034_v21  ;;  %v3000_v42 = vrot.slane %v7102_v40, 6 }
 0x2b8   : > { %3357 = vmatpush.msrb.mxu1 %v7062_v58  ;;  %3286 = vmatpush.msra.mxu2 %v7401_v53 }
 0x2b9   : > { %3335 = vmatpush.msrb.mxu0 %v7050_v14 }
 0x2ba   : > { %2890 = vmatmul.f32.gmra.mxu0 %v2859_v37  ;;  %3030 = vmatmul.f32.gmra.mxu2 %v2999_v43  ;;  %v3070_v37 = vrot.slane %v7102_v40, 7  ;;  %v2861_v43 = vsel %vm1630_vm7, %v2858_v26, %v2860_v33  ;;  %v3002_v26 = vrot.slane %v7173_v51, 6 }
 0x2bb   : > { %3100 = vmatmul.f32.gmra.mxu3 %v3069_v18  ;;  %3336 = vmatpush.msrb.mxu0 %v7080_v23  ;;  %v3001_v18 = vsel %vm672_vm0, %v2998_v8, %v3000_v42  ;;  %v2935_v8 = vsel %vm1714_vm6, %v2932_v7, %v2934_v59  ;;  %v2864_v7 = vrot.slane %v7245_v13, 4  ;;  %v3161_v59 = vld [vmem:[%s7455_s28 + $0x8] sm:$0xff] }
 0x2bc   : > { %3378 = vmatpush.msrb.mxu2 %v7092_v32  ;;  %3358 = vmatpush.msrb.mxu1 %v7085_v19  ;;  %v3071_v40 = vsel %vm1881_vm8, %v3068_v45, %v3070_v37 }
 0x2bd   : > { %3337 = vmatpush.msrb.mxu0 %v7100_v5 }
 0x2be   : > { %3379 = vmatpush.msrb.mxu2 %v7114_v0  ;;  %3359 = vmatpush.msrb.mxu1 %v7109_v34 }
 0x2bf   : > { %2966 = vmatmul.f32.gmra.mxu1 %v2933_v39  ;;  %3338 = vmatpush.msrb.mxu0 %v7131_v56  ;;  %v2862_v39 = vrot.slane %v7173_v51, 4 }
 0x2c0   : > { %3380 = vmatpush.msrb.mxu2 %v7143_v12  ;;  %3360 = vmatpush.msrb.mxu1 %v7138_v62 }
 0x2c1   : > { %3339 = vmatpush.msrb.mxu0 %v7152_v41  ;;  %v2863_v45 = vsel %vm1630_vm7, %v2860_v33, %v2862_v39  ;;  %v3004_v33 = vrot.slane %v7245_v13, 6 }
 0x2c2   : > { %2893 = vmatmul.f32.gmra.mxu0 %v2861_v43  ;;  %3033 = vmatmul.f32.gmra.mxu2 %v3001_v18  ;;  %v3072_v43 = vrot.slane %v7173_v51, 7  ;;  %v3003_v18 = vsel %vm672_vm0, %v3000_v42, %v3002_v26  ;;  %v3074_v42 = vrot.slane %v7245_v13, 7 }
 0x2c3   : > { %3103 = vmatmul.f32.gmra.mxu3 %v3071_v40  ;;  %3381 = vmatpush.msrb.mxu2 %v7164_v16  ;;  %v3005_v40 = vsel %vm672_vm0, %v3002_v26, %v3004_v33  ;;  %v3160_v26 = vld [vmem:[%s7455_s28] sm:$0xff]  ;;  %v4929_v33 = vld [vmem:[%s7455_s28 + $0x58] sm:$0xff] }
 0x2c4   : > { %3361 = vmatpush.msrb.mxu1 %v7159_v52  ;;  %3340 = vmatpush.msrb.mxu0 %v7171_v2  ;;  %v3073_v51 = vsel %vm1881_vm8, %v3070_v37, %v3072_v43  ;;  %v2865_v37 = vsel %vm1630_vm7, %v2862_v39, %v2864_v7  ;;  %v3075_v13 = vsel %vm1881_vm8, %v3072_v43, %v3074_v42  ;;  %v3162_v39 = vld [vmem:[%s7455_s28 + $0x10] sm:$0xff]  ;;  %v4926_v42 = vld [vmem:[%s7455_s28 + $0x40] sm:$0xff] }
 0x2c5   : > { %3382 = vmatpush.msrb.mxu2 %v7184_v20  ;;  %v3166_v43 = vld [vmem:[%s7455_s28 + $0x30] sm:$0x1f] }
 0x2c6   : > { %3362 = vmatpush.msrb.mxu1 %v7179_v3  ;;  %3341 = vmatpush.msrb.mxu0 %v7191_v17  ;;  %v4928_v7 = vld [vmem:[%s7455_s28 + $0x50] sm:$0xff] }
 0x2c7   : > { %2969 = vmatmul.f32.gmra.mxu1 %v2935_v8  ;;  %3383 = vmatpush.msrb.mxu2 %v7212_v22  ;;  %v3163_v8 = vld [vmem:[%s7455_s28 + $0x18] sm:$0xff] }
 0x2c8   : > { %3363 = vmatpush.msrb.mxu1 %v7203_v36  ;;  %3342 = vmatpush.msrb.mxu0 %v7217_v50 }
 0x2c9   : > { %3384 = vmatpush.msrb.mxu2 %v7235_v25 }
 0x2ca   : > { %2896 = vmatmul.f32.gmra.mxu0 %v2863_v45  ;;  %3036 = vmatmul.f32.gmra.mxu2 %v3003_v18  ;;  %v3167_v45 = vld [vmem:[%s7455_s28 + $0x38] sm:$0x1f]  ;;  %v3164_v18 = vld [vmem:[%s7455_s28 + $0x20] sm:$0x1f] }
 0x2cb   : > { %3106 = vmatmul.f32.gmra.mxu3 %v3073_v51  ;;  %3364 = vmatpush.msrb.mxu1 %v7223_v28  ;;  %v3165_v51 = vld [vmem:[%s7455_s28 + $0x28] sm:$0x1f] }
 0x2cc   : > { %3343 = vmatpush.msrb.mxu0 %v7240_v15  ;;  %3385 = vmatpush.msrb.mxu2 %v7256_v55 }
 0x2cd   : > { %3365 = vmatpush.msrb.mxu1 %v7251_v47 }
 0x2ce   : > { %3344 = vmatpush.msrb.mxu0 %v7265_v44  ;;  %3386 = vmatpush.msrb.mxu2 %v7284_v27 }
 0x2cf   : > { %3366 = vmatpush.msrb.mxu1 %v7275_v63 }
 0x2d0   : > { %3345 = vmatpush.msrb.mxu0 %v7289_v46  ;;  %3264 = vmatmul.f32.vlgmr.msra.gmra.mxu1 %v3161_v59  ;;  %v4930_v59 = vld [vmem:[%s7455_s28 + $0x60] sm:$0x1f] }
 0x2d1   : > { %3367 = vmatpush.msrb.mxu1 %v7295_v35  ;;  %3387 = vmatpush.msrb.mxu2 %v7301_v49 }
 0x2d2   : > { %2899 = vmatmul.f32.gmra.mxu0 %v2865_v37  ;;  %3039 = vmatmul.f32.gmra.mxu2 %v3005_v40  ;;  %v4927_v37 = vld [vmem:[%s7455_s28 + $0x48] sm:$0xff]  ;;  %v4932_v40 = vld [vmem:[%s7455_s28 + $0x70] sm:$0x1f] }
 0x2d3   : > { %3109 = vmatmul.f32.gmra.mxu3 %v3075_v13  ;;  %3346 = vmatpush.msrb.mxu0 %v7306_v10  ;;  %v4933_v13 = vld [vmem:[%s7455_s28 + $0x78] sm:$0x1f] }
 0x2d4   : > { %3368 = vmatpush.msrb.mxu1 %v7316_v38  ;;  %3388 = vmatpush.msrb.mxu2 %v7321_v57 }
 0x2d5   : > { %3347 = vmatpush.msrb.mxu0 %v7330_v4 }
 0x2d6   : > { %3369 = vmatpush.msrb.mxu1 %v7340_v54  ;;  %3389 = vmatpush.msrb.mxu2 %v7348_v6 }
 0x2d8   : > { %3370 = vmatpush.msrb.mxu1 %v7355_v60  ;;  %3390 = vmatpush.msrb.mxu2 %v7361_v30 }
 0x2d9   : > { %3267 = vmatmul.f32.gmra.mxu1 %v3165_v51 }
 0x2da   : > { %3287 = vmatmul.f32.vlgmr.msra.gmra.mxu2 %v3162_v39  ;;  %3241 = vmatmul.f32.vlgmr.msra.gmra.mxu0 %v3160_v26  ;;  %v4931_v39 = vld [vmem:[%s7455_s28 + $0x68] sm:$0x1f]  ;;  %v4936_v26 = vld [vmem:[%s7455_s28 + $0x80] sm:$0xff] }
 0x2db   : > { %4924 = vmatmul.msk.f32.vlgmr.msra.gmra.mxu3 %vm3218_vm9, %v3163_v8  ;;  %3464 = vmatpush.msra.mxu0 %v7006_v11  ;;  %v4938_v8 = vld [vmem:[%s7455_s28 + $0x90] sm:$0xff] }
 0x2dc   : > { %3441 = vmatpush.msra.mxu3 %v6996_v31  ;;  %3487 = vmatpush.msra.mxu1 %v7092_v32 }
 0x2dd   : > { %3465 = vmatpush.msra.mxu0 %v7028_v61  ;;  %3391 = vmatpush.msrb.mxu2 %v7376_v48 }
 0x2de   : > { %3442 = vmatpush.msra.mxu3 %v7015_v24  ;;  %3488 = vmatpush.msra.mxu1 %v7114_v0 }
 0x2df   : > { %3466 = vmatpush.msra.mxu0 %v7062_v58  ;;  %3392 = vmatpush.msrb.mxu2 %v7392_v1 }
 0x2e0   : > { %3443 = vmatpush.msra.mxu3 %v7034_v21  ;;  %3489 = vmatpush.msra.mxu1 %v7143_v12 }
 0x2e1   : > { %3467 = vmatpush.msra.mxu0 %v7085_v19  ;;  %3393 = vmatpush.msrb.mxu2 %v7401_v53 }
 0x2e2   : > { %3444 = vmatpush.msra.mxu3 %v7050_v14  ;;  %3290 = vmatmul.f32.gmra.mxu2 %v3166_v43 }
 0x2e3   : > { %4925 = vmatmul.msk.f32.gmra.mxu3 %vm3218_vm9, %v3167_v45  ;;  %3244 = vmatmul.f32.gmra.mxu0 %v3164_v18 }
 0x2e4   : > { %3445 = vmatpush.msra.mxu3 %v7080_v23  ;;  %3468 = vmatpush.msra.mxu0 %v7109_v34 }
 0x2e5   : > { %3490 = vmatpush.msra.mxu1 %v7164_v16  ;;  %3524 = vmatpush.msra.mxu2 %v7228_v9 }
 0x2e6   : > { %3446 = vmatpush.msra.mxu3 %v7100_v5  ;;  %3469 = vmatpush.msra.mxu0 %v7138_v62 }
 0x2e7   : > { %3491 = vmatpush.msra.mxu1 %v7184_v20  ;;  %3525 = vmatpush.msra.mxu2 %v7366_v29 }
 0x2e8   : > { %3447 = vmatpush.msra.mxu3 %v7131_v56  ;;  %3470 = vmatpush.msra.mxu0 %v7159_v52 }
 0x2e9   : > { %3492 = vmatpush.msra.mxu1 %v7212_v22 }
 0x2ea   : > { %3448 = vmatpush.msra.mxu3 %v7152_v41  ;;  %3394 = vmatmul.f32.vlgmr.msrb.gmra.mxu2 %v4928_v7 }
 0x2eb   : > { %4934 = vmatmul.msk.f32.vlgmr.msrb.gmra.mxu3 %vm3218_vm9, %v4929_v33  ;;  %3348 = vmatmul.f32.vlgmr.msrb.gmra.mxu0 %v4926_v42 }
 0x2ec   : > { %3449 = vmatpush.msra.mxu3 %v7171_v2  ;;  %3371 = vmatmul.f32.vlgmr.msrb.gmra.mxu1 %v4927_v37 }
 0x2ed   : > { %3471 = vmatpush.msra.mxu0 %v7179_v3  ;;  %3493 = vmatpush.msra.mxu1 %v7235_v25 }
 0x2ee   : > { %3450 = vmatpush.msra.mxu3 %v7191_v17  ;;  %3550 = vmatpush.msrb.mxu2 %v6996_v31 }
 0x2ef   : > { %3472 = vmatpush.msra.mxu0 %v7203_v36  ;;  %3494 = vmatpush.msra.mxu1 %v7256_v55 }
 0x2f0   : > { %3451 = vmatpush.msra.mxu3 %v7217_v50  ;;  %3551 = vmatpush.msrb.mxu2 %v7015_v24  ;;  %v4939_v24 = vld [vmem:[%s7455_s28 + $0x98] sm:$0xff] }
 0x2f1   : > { %3473 = vmatpush.msra.mxu0 %v7223_v28  ;;  %3495 = vmatpush.msra.mxu1 %v7284_v27 }
 0x2f2   : > { %3452 = vmatpush.msra.mxu3 %v7240_v15  ;;  %3397 = vmatmul.f32.gmra.mxu2 %v4932_v40 }
 0x2f3   : > { %4935 = vmatmul.msk.f32.gmra.mxu3 %vm3218_vm9, %v4933_v13  ;;  %3474 = vmatpush.msra.mxu0 %v7251_v47 }
 0x2f4   : > { %3453 = vmatpush.msra.mxu3 %v7265_v44  ;;  %3496 = vmatpush.msra.mxu1 %v7301_v49 }
 0x2f5   : > { %3351 = vmatmul.f32.gmra.mxu0 %v4930_v59  ;;  %3374 = vmatmul.f32.gmra.mxu1 %v4931_v39 }
 0x2f6   : > { %3454 = vmatpush.msra.mxu3 %v7289_v46  ;;  %3475 = vmatpush.msra.mxu0 %v7275_v63 }
 0x2f7   : > { %3497 = vmatpush.msra.mxu1 %v7321_v57  ;;  %3552 = vmatpush.msrb.mxu2 %v7034_v21 }
 0x2f8   : > { %3455 = vmatpush.msra.mxu3 %v7306_v10  ;;  %3476 = vmatpush.msra.mxu0 %v7295_v35 }
 0x2f9   : > { %3498 = vmatpush.msra.mxu1 %v7348_v6  ;;  %3553 = vmatpush.msrb.mxu2 %v7050_v14  ;;  %v4943_v14 = vld [vmem:[%s7455_s28 + $0xb8] sm:$0x1f] }
 0x2fa   : > { %3456 = vmatpush.msra.mxu3 %v7330_v4  ;;  %3477 = vmatpush.msra.mxu0 %v7316_v38 }
 0x2fb   : > { %3457 = vmatmul.f32.vlgmr.msra.gmra.mxu3 %v4936_v26  ;;  %3499 = vmatpush.msra.mxu1 %v7361_v30 }
 0x2fc   : > { %3573 = vmatpush.msrb.mxu3 %v7006_v11  ;;  %v7543_v31 = vpop.f32.mrf.mxu1  ;;  %3478 = vmatpush.msra.mxu0 %v7340_v54  ;;  %v4937_v11 = vld [vmem:[%s7455_s28 + $0x88] sm:$0xff] }
 0x2fd   : > { %3500 = vmatpush.msra.mxu1 %v7376_v48  ;;  %4944 = vmatmul.msk.f32.vlgmr.msra.gmra.mxu2 %vm3218_vm9, %v4939_v24 }
 0x2fe   : > { %3574 = vmatpush.msrb.mxu3 %v7028_v61  ;;  %3479 = vmatpush.msra.mxu0 %v7355_v60  ;;  %v4940_v61 = vld [vmem:[%s7455_s28 + $0xa0] sm:$0x1f] }
 0x2ff   : > { %3501 = vmatpush.msra.mxu1 %v7392_v1  ;;  %3480 = vmatmul.f32.vlgmr.msra.gmra.mxu0 %v4937_v11 }
 0x300   : > { %3575 = vmatpush.msrb.mxu3 %v7062_v58  ;;  %3554 = vmatpush.msrb.mxu2 %v7080_v23  ;;  %v4941_v23 = vld [vmem:[%s7455_s28 + $0xa8] sm:$0x1f] }
 0x301   : > { %3502 = vmatpush.msra.mxu1 %v7401_v53  ;;  %3596 = vmatpush.msrb.mxu0 %v7092_v32 }
 0x302   : > { %3576 = vmatpush.msrb.mxu3 %v7085_v19  ;;  %3503 = vmatmul.f32.vlgmr.msra.gmra.mxu1 %v4938_v8  ;;  %v4942_v19 = vld [vmem:[%s7455_s28 + $0xb0] sm:$0x1f] }
 0x303   : > { %3460 = vmatmul.f32.gmra.mxu3 %v4940_v61  ;;  %3555 = vmatpush.msrb.mxu2 %v7100_v5 }
 0x304   : > { %3577 = vmatpush.msrb.mxu3 %v7109_v34  ;;  %v7564_v21 = vpop.f32.mrf.mxu1  ;;  %3597 = vmatpush.msrb.mxu0 %v7114_v0 }
 0x305   : > { %3633 = vmatpush.msrb.mxu1 %v7228_v9  ;;  %3556 = vmatpush.msrb.mxu2 %v7131_v56  ;;  %v4949_v56 = vld [vmem:[%s7455_s28 + $0xd8] sm:$0xff]  ;;  %v4948_v9 = vld [vmem:[%s7455_s28 + $0xd0] sm:$0xff] }
 0x306   : > { %3578 = vmatpush.msrb.mxu3 %v7138_v62  ;;  %3598 = vmatpush.msrb.mxu0 %v7143_v12 }
 0x307   : > { %v7570_v58 = vpop.f32.mrf.mxu0  ;;  %4945 = vmatmul.msk.f32.gmra.mxu2 %vm3218_vm9, %v4943_v14  ;;  %3634 = vmatpush.msrb.mxu1 %v7366_v29 }
 0x308   : > { %3579 = vmatpush.msrb.mxu3 %v7159_v52  ;;  %3557 = vmatpush.msrb.mxu2 %v7152_v41 }
 0x309   : > { %3599 = vmatpush.msrb.mxu0 %v7164_v16  ;;  %v4946_v16 = vld [vmem:[%s7455_s28 + $0xc0] sm:$0xff] }
 0x30a   : > { %3580 = vmatpush.msrb.mxu3 %v7179_v3  ;;  %3483 = vmatmul.f32.gmra.mxu0 %v4941_v23  ;;  %v4953_v3 = vld [vmem:[%s7455_s28 + $0xf8] sm:$0x1f] }
 0x30b   : > { %3558 = vmatpush.msrb.mxu2 %v7171_v2  ;;  %3600 = vmatpush.msrb.mxu0 %v7184_v20  ;;  %v4947_v2 = vld [vmem:[%s7455_s28 + $0xc8] sm:$0xff] }
 0x30c   : > { %3581 = vmatpush.msrb.mxu3 %v7203_v36  ;;  %v7586_v32 = vpop.f32.mrf.mxu1  ;;  %3506 = vmatmul.f32.gmra.mxu1 %v4942_v19 }
 0x30d   : > { %v2748_v5 = vpop.f32.mrf.mxu2  ;;  %3559 = vmatpush.msrb.mxu2 %v7191_v17  ;;  %3601 = vmatpush.msrb.mxu0 %v7212_v22 }
 0x30e   : > { %v2818_v34 = vpop.f32.mrf.mxu3  ;;  %3582 = vmatpush.msrb.mxu3 %v7223_v28  ;;  %v4951_v28 = vld [vmem:[%s7455_s28 + $0xe8] sm:$0x1f] }
 0x30f   : > { %v2654_v0 = vpop.f32.mrf.mxu0  ;;  %3560 = vmatpush.msrb.mxu2 %v7217_v50  ;;  %3602 = vmatpush.msrb.mxu0 %v7235_v25  ;;  %v4950_v50 = vld [vmem:[%s7455_s28 + $0xe0] sm:$0x1f] }
 0x310   : > { %3583 = vmatpush.msrb.mxu3 %v7251_v47 }
 0x311   : > { %3561 = vmatpush.msrb.mxu2 %v7240_v15  ;;  %3603 = vmatpush.msrb.mxu0 %v7256_v55  ;;  %v2684_v55 = vadd.f32 %v7543_v31, %v7570_v58 }
 0x312   : > { %3584 = vmatpush.msrb.mxu3 %v7275_v63  ;;  %v4952_v63 = vld [vmem:[%s7455_s28 + $0xf0] sm:$0x1f] }
 0x313   : > { %3562 = vmatpush.msrb.mxu2 %v7265_v44  ;;  %3604 = vmatpush.msrb.mxu0 %v7284_v27  ;;  %v2763_v44 = vadd.f32 %v2748_v5, %v2684_v55 }
 0x314   : > { %3585 = vmatpush.msrb.mxu3 %v7295_v35  ;;  %4954 = vmatmul.msk.f32.vlgmr.msrb.gmra.mxu1 %vm3218_vm9, %v4949_v56  ;;  %v7605_v41 = vpop.f32.mrf.mxu1 }
 0x315   : > { %v2751_v62 = vpop.f32.mrf.mxu2  ;;  %3563 = vmatpush.msrb.mxu2 %v7289_v46  ;;  %3605 = vmatpush.msrb.mxu0 %v7301_v49  ;;  %v2833_v35 = vadd.f32 %v2818_v34, %v2763_v44 }
 0x316   : > { %v2821_v12 = vpop.f32.mrf.mxu3  ;;  %3586 = vmatpush.msrb.mxu3 %v7316_v38  ;;  %v2687_v38 = vadd.f32 %v7564_v21, %v2654_v0 }
 0x317   : > { %v2657_v52 = vpop.f32.mrf.mxu0  ;;  %3564 = vmatpush.msrb.mxu2 %v7306_v10  ;;  %3606 = vmatpush.msrb.mxu0 %v7321_v57 }
 0x318   : > { %3587 = vmatpush.msrb.mxu3 %v7340_v54  ;;  %v2690_v43 = vadd.f32 %v7586_v32, %v2657_v52 }
 0x319   : > { %3565 = vmatpush.msrb.mxu2 %v7330_v4  ;;  %3607 = vmatpush.msrb.mxu0 %v7348_v6  ;;  %v2764_v4 = vadd.f32 %v2751_v62, %v2687_v38 }
 0x31a   : > { %3588 = vmatpush.msrb.mxu3 %v7355_v60  ;;  %3566 = vmatmul.f32.vlgmr.msrb.gmra.mxu2 %v4946_v16 }
 0x31b   : > { %3589 = vmatmul.f32.vlgmr.msrb.gmra.mxu3 %v4947_v2  ;;  %3608 = vmatpush.msrb.mxu0 %v7361_v30  ;;  %v2834_v30 = vadd.f32 %v2821_v12, %v2764_v4 }
 0x31c   : > { %4955 = vmatmul.msk.f32.gmra.mxu1 %vm3218_vm9, %v4953_v3  ;;  %v2695_v22 = vpop.f32.mrf.mxu1 }
 0x31d   : > { %v2754_v20 = vpop.f32.mrf.mxu2  ;;  %3609 = vmatpush.msrb.mxu0 %v7376_v48 }
 0x31e   : > { %v2824_v17 = vpop.f32.mrf.mxu3  ;;  %v2765_v51 = vadd.f32 %v2754_v20, %v2690_v43 }
 0x31f   : > { %v2660_v36 = vpop.f32.mrf.mxu0  ;;  %3610 = vmatpush.msrb.mxu0 %v7392_v1  ;;  %v5179_v1 = vld [vmem:[%s8457_s8] ss:$0 sm:$0xff] }
 0x320   : > { %v2835_v40 = vadd.f32 %v2824_v17, %v2765_v51  ;;  %v2693_v31 = vadd.f32 %v7605_v41, %v2660_v36 }
 0x321   : > { %3611 = vmatpush.msrb.mxu0 %v7401_v53 }
 0x322   : > { %3569 = vmatmul.f32.gmra.mxu2 %v4950_v50  ;;  %3612 = vmatmul.f32.vlgmr.msrb.gmra.mxu0 %v4948_v9 }
 0x323   : > { %3592 = vmatmul.f32.gmra.mxu3 %v4951_v28 }
 0x324   : > { %v2958_v27 = vpop.f32.mrf.mxu1 }
 0x325   : > { %v2757_v25 = vpop.f32.mrf.mxu2 }
 0x326   : > { %v2827_v15 = vpop.f32.mrf.mxu3  ;;  %v2766_v61 = vadd.f32 %v2757_v25, %v2693_v31 }
 0x327   : > { %v2663_v47 = vpop.f32.mrf.mxu0 }
 0x328   : > { %v2836_v23 = vadd.f32 %v2827_v15, %v2766_v61  ;;  %v2696_v34 = vadd.f32 %v2695_v22, %v2663_v47  ;;  %v4963_v61 = vld [vmem:[%s8461_s12 + $0x78] sm:$0xff] }
 0x329   : > { %3684 = vmatpush.msra.mxu1 %v4963_v61 }
 0x32a   : > { %3615 = vmatmul.f32.gmra.mxu0 %v4952_v63 }
 0x32c   : > { %v2961_v6 = vpop.f32.mrf.mxu1 }
 0x32d   : > { %v2760_v46 = vpop.f32.mrf.mxu2 }
 0x32e   : > { %v2830_v49 = vpop.f32.mrf.mxu3  ;;  %v2767_v12 = vadd.f32 %v2760_v46, %v2696_v34  ;;  %v4960_v34 = vld [vmem:[%s8461_s12 + $0x60] sm:$0xff] }
 0x32f   : > { %v2888_v10 = vpop.f32.mrf.mxu0 }
 0x330   : > { %v2903_v57 = vadd.f32 %v2888_v10, %v2833_v35  ;;  %v2837_v3 = vadd.f32 %v2830_v49, %v2767_v12  ;;  %v4982_v12 = vld [vmem:[%s8461_s12 + $0xf8] sm:$0xff] }
 0x331   : > { %3775 = vmatpush.msra.mxu0 %v4982_v12 }
 0x332   : > { %v2973_v54 = vadd.f32 %v2958_v27, %v2903_v57 }
 0x334   : > { %v2964_v39 = vpop.f32.mrf.mxu1 }
 0x335   : > { %v3028_v60 = vpop.f32.mrf.mxu2 }
 0x336   : > { %v3043_v29 = vadd.f32 %v3028_v60, %v2973_v54  ;;  %v3098_v48 = vpop.f32.mrf.mxu3 }
 0x337   : > { %v2891_v53 = vpop.f32.mrf.mxu0 }
 0x338   : > { %v3113_v45 = vadd.f32 %v3098_v48, %v3043_v29  ;;  %v2904_v18 = vadd.f32 %v2891_v53, %v2834_v30 }
 0x33a   : > { %v3122_v7 = vadd.f32 %v5179_v1, %v3113_v45  ;;  %v2974_v42 = vadd.f32 %v2961_v6, %v2904_v18 }
 0x33c   : > { %v3127_v33 = vmax.f32 %v3122_v7, 0.0  ;;  %v2967_v62 = vpop.f32.mrf.mxu1 }
 0x33d   : > { %v3031_v37 = vpop.f32.mrf.mxu2 }
 0x33e   : > { %3132 = vst [vmem:[#allocation2] sm:$0xff] %v3127_v33  ;;  %v3044_v13 = vadd.f32 %v3031_v37, %v2974_v42  ;;  %v3101_v59 = vpop.f32.mrf.mxu3  ;;  %v3659_v33 = vld [vmem:[%s8461_s12 + $0x38] sm:$0xff]  ;;  %v3658_v42 = vld [vmem:[%s8461_s12 + $0x30] sm:$0xff] }
 0x33f   : > { %v2894_v26 = vpop.f32.mrf.mxu0  ;;  %3706 = vmatpush.msra.mxu2 %v3659_v33 }
 0x340   : > { %v3114_v24 = vadd.f32 %v3101_v59, %v3044_v13  ;;  %v2905_v11 = vadd.f32 %v2894_v26, %v2835_v40  ;;  %v3657_v13 = vld [vmem:[%s8461_s12 + $0x28] sm:$0xff] }
 0x341   : > { %3707 = vmatpush.msra.mxu2 %v3658_v42 }
 0x342   : > { %v3123_v8 = vadd.f32 %v5179_v1, %v3114_v24  ;;  %v2975_v14 = vadd.f32 %v2964_v39, %v2905_v11  ;;  %v3656_v11 = vld [vmem:[%s8461_s12 + $0x20] sm:$0xff] }
 0x343   : > { %3708 = vmatpush.msra.mxu2 %v3657_v13 }
 0x344   : > { %v3128_v21 = vmax.f32 %v3123_v8, 0.0  ;;  %v2970_v25 = vpop.f32.mrf.mxu1  ;;  %v3655_v8 = vld [vmem:[%s8461_s12 + $0x18] sm:$0xff] }
 0x345   : > { %v3034_v58 = vpop.f32.mrf.mxu2  ;;  %3709 = vmatpush.msra.mxu2 %v3656_v11 }
 0x346   : > { %3133 = vst [vmem:[#allocation2 + $0x8] sm:$0xff] %v3128_v21  ;;  %v3045_v19 = vadd.f32 %v3034_v58, %v2975_v14  ;;  %v3104_v32 = vpop.f32.mrf.mxu3  ;;  %v4962_v14 = vld [vmem:[%s8461_s12 + $0x70] sm:$0xff] }
 0x347   : > { %v2897_v5 = vpop.f32.mrf.mxu0  ;;  %3710 = vmatpush.msra.mxu2 %v3655_v8  ;;  %v3654_v58 = vld [vmem:[%s8461_s12 + $0x10] sm:$0xff]  ;;  %3685 = vmatpush.msra.mxu1 %v4962_v14  ;;  %v4987_v14 = vld [vmem:[%s8461_s12 + $0x118] sm:$0xff] }
 0x348   : > { %v3115_v0 = vadd.f32 %v3104_v32, %v3045_v19  ;;  %v2906_v56 = vadd.f32 %v2897_v5, %v2836_v23  ;;  %v4961_v19 = vld [vmem:[%s8461_s12 + $0x68] sm:$0xff] }
 0x349   : > { %3711 = vmatpush.msra.mxu2 %v3654_v58  ;;  %v3653_v32 = vld [vmem:[%s8461_s12 + $0x8] sm:$0xff]  ;;  %3686 = vmatpush.msra.mxu1 %v4961_v19 }
 0x34a   : > { %v3124_v52 = vadd.f32 %v5179_v1, %v3115_v0  ;;  %v2976_v41 = vadd.f32 %v2967_v62, %v2906_v56  ;;  %v3652_v0 = vld [vmem:[%s8461_s12] sm:$0xff]  ;;  %v4973_v62 = vld [vmem:[%s8461_s12 + $0xb8] sm:$0xff]  ;;  %v4985_v19 = vld [vmem:[%s8461_s12 + $0x108] sm:$0xff] }
 0x34b   : > { %3712 = vmatpush.msra.mxu2 %v3653_v32  ;;  %3687 = vmatpush.msra.mxu1 %v4960_v34  ;;  %v4984_v32 = vld [vmem:[%s8461_s12 + $0x100] sm:$0xff] }
 0x34c   : > { %v3129_v16 = vmax.f32 %v3124_v52, 0.0  ;;  %v5000_v52 = vld [vmem:[%s8461_s12 + $0x178] sm:$0xff]  ;;  %3740 = vmatpush.msra.mxu3 %v4973_v62 }
 0x34d   : > { %v3037_v2 = vpop.f32.mrf.mxu2  ;;  %v7641_v43 = vpop.f32.mrf.mxu1  ;;  %3713 = vmatpush.msra.mxu2 %v3652_v0 }
 0x34e   : > { %3134 = vst [vmem:[#allocation2 + $0x10] sm:$0xff] %v3129_v16  ;;  %v3046_v20 = vadd.f32 %v3037_v2, %v2976_v41  ;;  %v3107_v17 = vpop.f32.mrf.mxu3  ;;  %v4959_v16 = vld [vmem:[%s8461_s12 + $0x58] sm:$0xff]  ;;  %v4972_v41 = vld [vmem:[%s8461_s12 + $0xb0] sm:$0xff] }
 0x34f   : > { %v2900_v36 = vpop.f32.mrf.mxu0  ;;  %3845 = vmatpush.msrb.mxu2 %v5000_v52  ;;  %3688 = vmatpush.msra.mxu1 %v4959_v16  ;;  %v4981_v2 = vld [vmem:[%s8461_s12 + $0xf0] sm:$0xff] }
 0x350   : > { %v3116_v50 = vadd.f32 %v3107_v17, %v3046_v20  ;;  %v2907_v28 = vadd.f32 %v2900_v36, %v2837_v3  ;;  %v4999_v3 = vld [vmem:[%s8461_s12 + $0x170] sm:$0xff]  ;;  %3741 = vmatpush.msra.mxu3 %v4972_v41  ;;  %3776 = vmatpush.msra.mxu0 %v4981_v2  ;;  %v4971_v17 = vld [vmem:[%s8461_s12 + $0xa8] sm:$0xff]  ;;  %v5017_v41 = vld [vmem:[%s8463_s14 + $0xf8] sm:$0xff] }
 0x351   : > { %v4958_v20 = vld [vmem:[%s8461_s12 + $0x50] sm:$0xff]  ;;  %3846 = vmatpush.msrb.mxu2 %v4999_v3  ;;  %v4980_v36 = vld [vmem:[%s8461_s12 + $0xe8] sm:$0xff] }
 0x352   : > { %v3125_v9 = vadd.f32 %v5179_v1, %v3116_v50  ;;  %v2977_v22 = vadd.f32 %v2970_v25, %v2907_v28  ;;  %3689 = vmatpush.msra.mxu1 %v4958_v20  ;;  %v4998_v50 = vld [vmem:[%s8461_s12 + $0x168] sm:$0xff]  ;;  %3742 = vmatpush.msra.mxu3 %v4971_v17 }
 0x353   : > { %3777 = vmatpush.msra.mxu0 %v4980_v36  ;;  %v4957_v25 = vld [vmem:[%s8461_s12 + $0x48] sm:$0xff]  ;;  %3847 = vmatpush.msrb.mxu2 %v4998_v50 }
 0x354   : > { %v3130_v15 = vmax.f32 %v3125_v9, 0.0  ;;  %3690 = vmatpush.msra.mxu1 %v4957_v25  ;;  %v3877_v3 = vld [vmem:[%s8463_s14 + $0x68] sm:$0xff] }
 0x355   : > { %v3040_v47 = vpop.f32.mrf.mxu2  ;;  %v5015_v20 = vld [vmem:[%s8463_s14 + $0xe8] sm:$0xff] }
 0x356   : > { %3135 = vst [vmem:[#allocation2 + $0x18] sm:$0xff] %v3130_v15  ;;  %v3047_v55 = vadd.f32 %v3040_v47, %v2977_v22  ;;  %v3110_v44 = vpop.f32.mrf.mxu3  ;;  %v7655_v40 = vpop.f32.mrf.mxu1  ;;  %v4970_v22 = vld [vmem:[%s8461_s12 + $0xa0] sm:$0xff] }
 0x357   : > { %v7643_v51 = vpop.f32.mrf.mxu0  ;;  %v4979_v47 = vld [vmem:[%s8461_s12 + $0xe0] sm:$0xff]  ;;  %3743 = vmatpush.msra.mxu3 %v4970_v22 }
 0x358   : > { %v3117_v63 = vadd.f32 %v3110_v44, %v3047_v55  ;;  %v4997_v55 = vld [vmem:[%s8461_s12 + $0x160] sm:$0xff]  ;;  %3778 = vmatpush.msra.mxu0 %v4979_v47  ;;  %v3266_v61 = vadd.f32 %v7641_v43, %v7643_v51  ;;  %v5013_v47 = vld [vmem:[%s8463_s14 + $0xd8] sm:$0xff] }
 0x359   : > { %v4956_v44 = vld [vmem:[%s8461_s12 + $0x40] sm:$0xff]  ;;  %3848 = vmatpush.msrb.mxu2 %v4997_v55 }
 0x35a   : > { %v3126_v27 = vadd.f32 %v5179_v1, %v3117_v63  ;;  %3691 = vmatpush.msra.mxu1 %v4956_v44 }
 0x35c   : > { %v3131_v46 = vmax.f32 %v3126_v27, 0.0  ;;  %v4969_v27 = vld [vmem:[%s8461_s12 + $0x98] sm:$0xff] }
 0x35d   : > { %v3137_v35 = vld [vmem:[#allocation2] ss:$4 sm:$0xff]  ;;  %v3141_v49 = vld [vmem:[#allocation2 + $0x1] ss:$4 sm:$0xff]  ;;  %v3147_v38 = vld [vmem:[#allocation2 + $0x2] ss:$4 sm:$0xff]  ;;  %v7639_v1 = vpop.f32.mrf.mxu2  ;;  %3744 = vmatpush.msra.mxu3 %v4969_v27 }
 0x35e   : > { %v3144_v10 = vmax.f32 %v3137_v35, %v3141_v49  ;;  %3136 = vst [vmem:[#allocation2 + $0x20] sm:$0xff] %v3131_v46  ;;  %v3153_v4 = vld [vmem:[#allocation2 + $0x3] ss:$4 sm:$0xff]  ;;  %v7637_v30 = vpop.f32.mrf.mxu3  ;;  %v3289_v43 = vadd.f32 %v7639_v1, %v3266_v61 }
 0x35f   : > { %v4978_v46 = vld [vmem:[%s8461_s12 + $0xd8] sm:$0xff] }
 0x360   : > { %v3150_v57 = vmax.f32 %v3144_v10, %v3147_v38  ;;  %v7660_v59 = vpop.f32.mrf.mxu0  ;;  %v4991_v35 = vld [vmem:[%s8461_s12 + $0x138] sm:$0xff]  ;;  %3779 = vmatpush.msra.mxu0 %v4978_v46  ;;  %v4968_v10 = vld [vmem:[%s8461_s12 + $0x90] sm:$0xff] }
 0x361   : > { %v4996_v49 = vld [vmem:[%s8461_s12 + $0x158] sm:$0xff]  ;;  %3810 = vmatpush.msrb.mxu1 %v4991_v35  ;;  %v4977_v38 = vld [vmem:[%s8461_s12 + $0xd0] sm:$0xff]  ;;  %3745 = vmatpush.msra.mxu3 %v4968_v10  ;;  %v3269_v12 = vadd.f32 %v7655_v40, %v7660_v59 }
 0x362   : > { %v3156_v54 = vmax.f32 %v3150_v57, %v3153_v4  ;;  %3849 = vmatpush.msrb.mxu2 %v4996_v49  ;;  %v4990_v57 = vld [vmem:[%s8461_s12 + $0x130] sm:$0xff]  ;;  %3780 = vmatpush.msra.mxu0 %v4977_v38  ;;  %v3879_v1 = vld [vmem:[%s8463_s14 + $0x78] sm:$0xff] }
 0x363   : > { %v4995_v4 = vld [vmem:[%s8461_s12 + $0x150] sm:$0xff]  ;;  %3811 = vmatpush.msrb.mxu1 %v4990_v57  ;;  %v5009_v61 = vld [vmem:[%s8463_s14 + $0xb8] sm:$0xff] }
 0x364   : > { %3158 = vst [vmem:[%s628_s23] sm:$0xff] %v3156_v54  ;;  %v4967_v54 = vld [vmem:[%s8461_s12 + $0x88] sm:$0xff]  ;;  %3850 = vmatpush.msrb.mxu2 %v4995_v4  ;;  %v5016_v59 = vld [vmem:[%s8463_s14 + $0xf0] sm:$0xff] }
 0x365   : > { %v3139_v6 = vld [vmem:[#allocation2 + $0x20] ss:$4 sm:$0x3]  ;;  %v3143_v60 = vld [vmem:[#allocation2 + $0x21] ss:$4 sm:$0x3]  ;;  %v7653_v37 = vpop.f32.mrf.mxu2  ;;  %3746 = vmatpush.msra.mxu3 %v4967_v54 }
 0x366   : > { %v3145_v29 = vmax.f32 %v3139_v6, %v3143_v60  ;;  %v3149_v48 = vld [vmem:[#allocation2 + $0x22] ss:$4 sm:$0x3]  ;;  %v3155_v45 = vld [vmem:[#allocation2 + $0x23] ss:$4 sm:$0x3]  ;;  %v7645_v7 = vpop.f32.mrf.mxu3  ;;  %v3292_v50 = vadd.f32 %v7653_v37, %v3269_v12 }
 0x367   : > { %v4976_v6 = vld [vmem:[%s8461_s12 + $0xc8] sm:$0xff]  ;;  %v3875_v37 = vld [vmem:[%s8463_s14 + $0x58] sm:$0xff]  ;;  %v3874_v35 = vld [vmem:[%s8463_s14 + $0x50] sm:$0xff] }
 0x368   : > { %v3151_v53 = vmax.f32 %v3145_v29, %v3149_v48  ;;  %v7668_v24 = vpop.f32.mrf.mxu0  ;;  %v4989_v60 = vld [vmem:[%s8461_s12 + $0x128] sm:$0xff]  ;;  %v4966_v48 = vld [vmem:[%s8461_s12 + $0x80] sm:$0xff]  ;;  %3781 = vmatpush.msra.mxu0 %v4976_v6  ;;  %v5012_v49 = vld [vmem:[%s8463_s14 + $0xd0] sm:$0xff]  ;;  %v3315_v10 = vadd.f32 %v7645_v7, %v3292_v50 }
 0x369   : > { %v7666_v31 = vpop.f32.mrf.mxu1  ;;  %v4994_v29 = vld [vmem:[%s8461_s12 + $0x148] sm:$0xff]  ;;  %3812 = vmatpush.msrb.mxu1 %v4989_v60  ;;  %3747 = vmatpush.msra.mxu3 %v4966_v48  ;;  %v5049_v48 = vld [vmem:[%s8463_s14 + $0x1f8] sm:$0xff] }
 0x36a   : > { %v3157_v18 = vmax.f32 %v3151_v53, %v3155_v45  ;;  %v4975_v53 = vld [vmem:[%s8461_s12 + $0xc0] sm:$0xff]  ;;  %3851 = vmatpush.msrb.mxu2 %v4994_v29  ;;  %v3373_v33 = vadd.f32 %v7666_v31, %v7668_v24  ;;  %v4986_v31 = vld [vmem:[%s8461_s12 + $0x110] sm:$0xff]  ;;  %v3873_v54 = vld [vmem:[%s8463_s14 + $0x48] sm:$0xff] }
 0x36b   : > { %v4988_v45 = vld [vmem:[%s8461_s12 + $0x120] sm:$0xff]  ;;  %3782 = vmatpush.msra.mxu0 %v4975_v53  ;;  %3900 = vmatpush.msrb.mxu3 %v5017_v41  ;;  %v5011_v7 = vld [vmem:[%s8463_s14 + $0xc8] sm:$0xff] }
 0x36c   : > { %3159 = vst [vmem:[%s628_s23 + $0x8] sm:$0x3] %v3157_v18  ;;  %v4993_v18 = vld [vmem:[%s8461_s12 + $0x140] sm:$0xff]  ;;  %3813 = vmatpush.msrb.mxu1 %v4988_v45  ;;  %v5031_v50 = vld [vmem:[%s8463_s14 + $0x168] sm:$0xff] }
 0x36d   : > { %v7664_v26 = vpop.f32.mrf.mxu2  ;;  %3852 = vmatpush.msrb.mxu2 %v4993_v18  ;;  %3920 = vmatpush.msrb.mxu0 %v3879_v1  ;;  %v3872_v53 = vld [vmem:[%s8463_s14 + $0x40] sm:$0xff] }
 0x36e   : > { %v7662_v39 = vpop.f32.mrf.mxu3  ;;  %3814 = vmatpush.msrb.mxu1 %v4987_v14  ;;  %v3396_v58 = vadd.f32 %v7664_v26, %v3373_v33  ;;  %3901 = vmatpush.msrb.mxu3 %v5016_v59  ;;  %v5010_v33 = vld [vmem:[%s8463_s14 + $0xc0] sm:$0xff]  ;;  %v3870_v14 = vld [vmem:[%s8463_s14 + $0x30] sm:$0xff]  ;;  %v5033_v59 = vld [vmem:[%s8463_s14 + $0x178] sm:$0xff] }
 0x370   : > { %3815 = vmatpush.msrb.mxu1 %v4986_v31  ;;  %v3419_v34 = vadd.f32 %v7662_v39, %v3396_v58  ;;  %v3878_v39 = vld [vmem:[%s8463_s14 + $0x70] sm:$0xff]  ;;  %3902 = vmatpush.msrb.mxu3 %v5015_v20  ;;  %v3869_v58 = vld [vmem:[%s8463_s14 + $0x28] sm:$0xff] }
 0x371   : > { %3921 = vmatpush.msrb.mxu0 %v3878_v39  ;;  %v5032_v20 = vld [vmem:[%s8463_s14 + $0x170] sm:$0xff] }
 0x372   : > { %v7695_v5 = vpop.f32.mrf.mxu1  ;;  %v7703_v56 = vpop.f32.mrf.mxu0  ;;  %3816 = vmatpush.msrb.mxu1 %v4985_v19 }
 0x373   : > { %v3376_v0 = vadd.f32 %v7695_v5, %v7703_v56  ;;  %v3312_v5 = vadd.f32 %v7637_v30, %v3289_v43  ;;  %3922 = vmatpush.msrb.mxu0 %v3877_v3  ;;  %v5007_v43 = vld [vmem:[%s8463_s14 + $0xa8] sm:$0xff]  ;;  %v3866_v3 = vld [vmem:[%s8463_s14 + $0x10] sm:$0xff] }
 0x374   : > { %3817 = vmatpush.msrb.mxu1 %v4984_v32 }
 0x375   : > { %v7687_v23 = vpop.f32.mrf.mxu2  ;;  %v3424_v17 = vmax.f32 %v3312_v5, %v3419_v34 }
 0x376   : > { %v7679_v21 = vpop.f32.mrf.mxu3  ;;  %v3399_v30 = vadd.f32 %v7687_v23, %v3376_v0  ;;  %v5180_v23 = vld [vmem:[%s8460_s11] ss:$0 sm:$0xff] }
 0x378   : > { %v3422_v55 = vadd.f32 %v7679_v21, %v3399_v30  ;;  %v5004_v30 = vld [vmem:[%s8463_s14 + $0x90] sm:$0xff] }
 0x37a   : > { %v3425_v6 = vmax.f32 %v3315_v10, %v3422_v55  ;;  %v5029_v55 = vld [vmem:[%s8463_s14 + $0x158] sm:$0xff]  ;;  %v5079_v10 = vld [vmem:[%s8463_s14 + $0x2e8] sm:$0xff] }
 0x37c   : > { %v3481_v63 = vpop.f32.mrf.mxu0 }
 0x37e   : > { %v3458_v28 = vpop.f32.mrf.mxu3 }
 0x37f   : > { %v3504_v15 = vpop.f32.mrf.mxu1  ;;  %v3482_v8 = vadd.f32 %v3481_v63, %v3458_v28  ;;  %v3876_v28 = vld [vmem:[%s8463_s14 + $0x60] sm:$0xff] }
 0x380   : > { %v7738_v9 = vpop.f32.mrf.mxu2  ;;  %3923 = vmatpush.msrb.mxu0 %v3876_v28 }
 0x381   : > { %v3505_v51 = vadd.f32 %v3504_v15, %v3482_v8  ;;  %v5047_v8 = vld [vmem:[%s8463_s14 + $0x1e8] sm:$0xff] }
 0x382   : > { %3924 = vmatpush.msrb.mxu0 %v3875_v37  ;;  %v5081_v37 = vld [vmem:[%s8463_s14 + $0x2f8] sm:$0xff] }
 0x383   : > { %v3528_v56 = vadd.f32 %v7738_v9, %v3505_v51  ;;  %v5014_v9 = vld [vmem:[%s8463_s14 + $0xe0] sm:$0xff] }
 0x384   : > { %3903 = vmatpush.msrb.mxu3 %v5014_v9  ;;  %3925 = vmatpush.msrb.mxu0 %v3874_v35  ;;  %v5044_v35 = vld [vmem:[%s8463_s14 + $0x1d0] sm:$0xff] }
 0x385   : > { %v3533_v25 = vmax.f32 %v3424_v17, %v3528_v56  ;;  %v5006_v56 = vld [vmem:[%s8463_s14 + $0xa0] sm:$0xff] }
 0x386   : > { %v3461_v42 = vpop.f32.mrf.mxu3  ;;  %3904 = vmatpush.msrb.mxu3 %v5013_v47  ;;  %3926 = vmatpush.msrb.mxu0 %v3873_v54  ;;  %v5002_v47 = vld [vmem:[%s8463_s14 + $0x80] sm:$0xff] }
 0x387   : > { %v3484_v24 = vpop.f32.mrf.mxu0  ;;  %v5026_v54 = vld [vmem:[%s8463_s14 + $0x140] sm:$0xff] }
 0x388   : > { %v3485_v40 = vadd.f32 %v3484_v24, %v3461_v42  ;;  %3905 = vmatpush.msrb.mxu3 %v5012_v49  ;;  %v5048_v42 = vld [vmem:[%s8463_s14 + $0x1f0] sm:$0xff]  ;;  %3927 = vmatpush.msrb.mxu0 %v3872_v53  ;;  %v5061_v53 = vld [vmem:[%s8463_s14 + $0x258] sm:$0xff] }
 0x389   : > { %v3507_v11 = vpop.f32.mrf.mxu1  ;;  %v5008_v24 = vld [vmem:[%s8463_s14 + $0xb0] sm:$0xff] }
 0x38a   : > { %v7805_v13 = vpop.f32.mrf.mxu2  ;;  %v3508_v15 = vadd.f32 %v3507_v11, %v3485_v40  ;;  %3906 = vmatpush.msrb.mxu3 %v5011_v7  ;;  %v3867_v40 = vld [vmem:[%s8463_s14 + $0x18] sm:$0xff]  ;;  %v5064_v49 = vld [vmem:[%s8463_s14 + $0x270] sm:$0xff] }
 0x38b   : > { %v5025_v7 = vld [vmem:[%s8463_s14 + $0x138] sm:$0xff] }
 0x38c   : > { %v3531_v38 = vadd.f32 %v7805_v13, %v3508_v15  ;;  %v3871_v13 = vld [vmem:[%s8463_s14 + $0x38] sm:$0xff]  ;;  %3907 = vmatpush.msrb.mxu3 %v5010_v33  ;;  %v3864_v15 = vld [vmem:[%s8463_s14] sm:$0xff]  ;;  %v5040_v33 = vld [vmem:[%s8463_s14 + $0x1b0] sm:$0xff] }
 0x38d   : > { %3928 = vmatpush.msrb.mxu0 %v3871_v13  ;;  %v5075_v13 = vld [vmem:[%s8463_s14 + $0x2c8] sm:$0xff] }
 0x38e   : > { %v3534_v45 = vmax.f32 %v3425_v6, %v3531_v38  ;;  %3908 = vmatpush.msrb.mxu3 %v5009_v61  ;;  %v5027_v38 = vld [vmem:[%s8463_s14 + $0x148] sm:$0xff]  ;;  %v5042_v6 = vld [vmem:[%s8463_s14 + $0x1c0] sm:$0xff] }
 0x38f   : > { %3929 = vmatpush.msrb.mxu0 %v3870_v14  ;;  %v5039_v61 = vld [vmem:[%s8463_s14 + $0x1a8] sm:$0xff]  ;;  %v5074_v14 = vld [vmem:[%s8463_s14 + $0x2c0] sm:$0xff] }
 0x390   : > { %3909 = vmatpush.msrb.mxu3 %v5008_v24  ;;  %v5038_v24 = vld [vmem:[%s8463_s14 + $0x1a0] sm:$0xff] }
 0x391   : > { %v3636_v16 = vpop.f32.mrf.mxu1  ;;  %3930 = vmatpush.msrb.mxu0 %v3869_v58  ;;  %v5058_v58 = vld [vmem:[%s8463_s14 + $0x240] sm:$0xff] }
 0x392   : > { %3910 = vmatpush.msrb.mxu3 %v5007_v43  ;;  %v5021_v43 = vld [vmem:[%s8463_s14 + $0x118] sm:$0xff] }
 0x394   : > { %3911 = vmatpush.msrb.mxu3 %v5006_v56  ;;  %v5054_v56 = vld [vmem:[%s8463_s14 + $0x220] sm:$0xff] }
 0x399   : > { %v3639_v4 = vpop.f32.mrf.mxu1 }
 0x39d   : > { %v3567_v62 = vpop.f32.mrf.mxu2 }
 0x39e   : > { %v3590_v26 = vpop.f32.mrf.mxu3 }
 0x39f   : > { %v3591_v52 = vadd.f32 %v3590_v26, %v3567_v62  ;;  %v3613_v2 = vpop.f32.mrf.mxu0  ;;  %v3868_v62 = vld [vmem:[%s8463_s14 + $0x20] sm:$0xff] }
 0x3a0   : > { %3931 = vmatpush.msrb.mxu0 %v3868_v62  ;;  %v5036_v62 = vld [vmem:[%s8463_s14 + $0x190] sm:$0xff] }
 0x3a1   : > { %v3614_v36 = vadd.f32 %v3613_v2, %v3591_v52  ;;  %v5005_v2 = vld [vmem:[%s8463_s14 + $0x98] sm:$0xff] }
 0x3a2   : > { %3932 = vmatpush.msrb.mxu0 %v3867_v40  ;;  %3912 = vmatpush.msrb.mxu3 %v5005_v2  ;;  %v5069_v40 = vld [vmem:[%s8463_s14 + $0x298] sm:$0xff]  ;;  %v5068_v2 = vld [vmem:[%s8463_s14 + $0x290] sm:$0xff] }
 0x3a3   : > { %v3637_v22 = vadd.f32 %v3636_v16, %v3614_v36  ;;  %v3865_v36 = vld [vmem:[%s8463_s14 + $0x8] sm:$0xff] }
 0x3a4   : > { %3933 = vmatpush.msrb.mxu0 %v3866_v3  ;;  %3913 = vmatpush.msrb.mxu3 %v5004_v30  ;;  %v5052_v3 = vld [vmem:[%s8463_s14 + $0x210] sm:$0xff]  ;;  %v5066_v30 = vld [vmem:[%s8463_s14 + $0x280] sm:$0xff] }
 0x3a5   : > { %v3642_v44 = vmax.f32 %v3533_v25, %v3637_v22  ;;  %v3570_v63 = vpop.f32.mrf.mxu2  ;;  %v5003_v25 = vld [vmem:[%s8463_s14 + $0x88] sm:$0xff]  ;;  %v5030_v22 = vld [vmem:[%s8463_s14 + $0x160] sm:$0xff] }
 0x3a6   : > { %v3593_v27 = vpop.f32.mrf.mxu3  ;;  %3934 = vmatpush.msrb.mxu0 %v3865_v36  ;;  %3914 = vmatpush.msrb.mxu3 %v5003_v25  ;;  %v5050_v36 = vld [vmem:[%s8463_s14 + $0x200] sm:$0xff]  ;;  %v5096_v25 = vld [vmem:[%s8465_s16 + $0xf0] sm:$0xff] }
 0x3a7   : > { %v3594_v46 = vadd.f32 %v3593_v27, %v3570_v63  ;;  %v3648_v57 = vadd.f32 %v5180_v23, %v3642_v44  ;;  %v3616_v21 = vpop.f32.mrf.mxu0  ;;  %v5045_v44 = vld [vmem:[%s8463_s14 + $0x1d8] sm:$0xff]  ;;  %v5080_v27 = vld [vmem:[%s8463_s14 + $0x2f0] sm:$0xff] }
 0x3a8   : > { %3935 = vmatpush.msrb.mxu0 %v3864_v15  ;;  %v5065_v63 = vld [vmem:[%s8463_s14 + $0x278] sm:$0xff]  ;;  %3915 = vmatpush.msrb.mxu3 %v5002_v47  ;;  %v4122_v15 = vld [vmem:[%s8465_s16 + $0x68] sm:$0xff]  ;;  %v5094_v47 = vld [vmem:[%s8465_s16 + $0xe0] sm:$0xff] }
 0x3a9   : > { %v7877_v60 = vmax.f32 %v3648_v57, 0.0  ;;  %v3617_v29 = vadd.f32 %v3616_v21, %v3594_v46  ;;  %v5028_v46 = vld [vmem:[%s8463_s14 + $0x150] sm:$0xff]  ;;  %v5043_v57 = vld [vmem:[%s8463_s14 + $0x1c8] sm:$0xff] }
 0x3aa   : > { %v5063_v21 = vld [vmem:[%s8463_s14 + $0x268] sm:$0xff] }
 0x3ab   : > { %v3640_v18 = vadd.f32 %v3639_v4, %v3617_v29  ;;  %4965 = vmatmul.msk.f32.vlgmr.msra.gmra.mxu2 %vm1349_vm2, %v7877_v60  ;;  %v3671_v51 = vrot.slane %v7877_v60, 1  ;;  %v3727_v32 = vrot.slane %v7877_v60, 2  ;;  %v3762_v34 = vrot.slane %v7877_v60, 3  ;;  %v5078_v4 = vld [vmem:[%s8463_s14 + $0x2e0] sm:$0xff]  ;;  %v5077_v29 = vld [vmem:[%s8463_s14 + $0x2d8] sm:$0xff] }
 0x3ac   : > { %3999 = vmatpush.msra.mxu2 %v5049_v48  ;;  %v3832_v0 = vrot.slane %v7877_v60, 5  ;;  %v3797_v28 = vrot.slane %v7877_v60, 4  ;;  %v5062_v60 = vld [vmem:[%s8463_s14 + $0x260] sm:$0xff]  ;;  %v5041_v48 = vld [vmem:[%s8463_s14 + $0x1b8] sm:$0xff] }
 0x3ad   : > { %v3643_v11 = vmax.f32 %v3534_v45, %v3640_v18  ;;  %v5076_v45 = vld [vmem:[%s8463_s14 + $0x2d0] sm:$0xff] }
 0x3ae   : > { %4000 = vmatpush.msra.mxu2 %v5048_v42  ;;  %v5024_v18 = vld [vmem:[%s8463_s14 + $0x130] sm:$0xff] }
 0x3af   : > { %v3649_v31 = vadd.f32 %v5180_v23, %v3643_v11  ;;  %v5046_v23 = vld [vmem:[%s8463_s14 + $0x1e0] sm:$0xff]  ;;  %v5060_v42 = vld [vmem:[%s8463_s14 + $0x250] sm:$0xff]  ;;  %v5023_v11 = vld [vmem:[%s8463_s14 + $0x128] sm:$0xff] }
 0x3b0   : > { %4001 = vmatpush.msra.mxu2 %v5047_v8  ;;  %v5059_v8 = vld [vmem:[%s8463_s14 + $0x248] sm:$0xff] }
 0x3b1   : > { %v3651_v19 = vmax.f32 %v3649_v31, 0.0  ;;  %v5022_v31 = vld [vmem:[%s8463_s14 + $0x120] sm:$0xff] }
 0x3b2   : > { %4002 = vmatpush.msra.mxu2 %v5046_v23  ;;  %v5095_v23 = vld [vmem:[%s8465_s16 + $0xe8] sm:$0xff] }
 0x3b3   : > { %v3672_v26 = vrot.slane %v3651_v19, 1  ;;  %v3728_v12 = vrot.slane %v3651_v19, 2  ;;  %v3763_v52 = vrot.slane %v3651_v19, 3  ;;  %v3833_v16 = vrot.slane %v3651_v19, 5 }
 0x3b4   : > { %v3798_v17 = vrot.slane %v3651_v19, 4  ;;  %4003 = vmatpush.msra.mxu2 %v5045_v44  ;;  %v5073_v19 = vld [vmem:[%s8463_s14 + $0x2b8] sm:$0xff] }
 0x3b5   : > { %v3673_v1 = vsel %vm1335_vm3, %v3671_v51, %v3672_v26  ;;  %v3729_v41 = vsel %vm1463_vm4, %v3727_v32, %v3728_v12  ;;  %v3764_v39 = vsel %vm1546_vm5, %v3762_v34, %v3763_v52  ;;  %v3834_v5 = vsel %vm1714_vm6, %v3832_v0, %v3833_v16  ;;  %v5037_v51 = vld [vmem:[%s8463_s14 + $0x198] sm:$0xff]  ;;  %v5072_v34 = vld [vmem:[%s8463_s14 + $0x2b0] sm:$0xff]  ;;  %v5071_v12 = vld [vmem:[%s8463_s14 + $0x2a8] sm:$0xff] }
 0x3b6   : > { %4964 = vmatmul.msk.f32.vlgmr.msra.gmra.mxu1 %vm1349_vm2, %v3673_v1  ;;  %4974 = vmatmul.msk.f32.vlgmr.msra.gmra.mxu3 %vm1349_vm2, %v3729_v41  ;;  %v3799_v9 = vsel %vm1630_vm7, %v3797_v28, %v3798_v17  ;;  %v5057_v32 = vld [vmem:[%s8463_s14 + $0x238] sm:$0xff]  ;;  %v5020_v0 = vld [vmem:[%s8463_s14 + $0x110] sm:$0xff]  ;;  %v5019_v52 = vld [vmem:[%s8463_s14 + $0x108] sm:$0xff] }
 0x3b7   : > { %4983 = vmatmul.msk.f32.vlgmr.msra.gmra.mxu0 %vm1349_vm2, %v3764_v39  ;;  %5001 = vmatmul.msk.f32.vlgmr.msrb.gmra.mxu2 %vm1349_vm2, %v3834_v5  ;;  %v5056_v26 = vld [vmem:[%s8463_s14 + $0x230] sm:$0xff]  ;;  %v5035_v16 = vld [vmem:[%s8463_s14 + $0x188] sm:$0xff]  ;;  %v5070_v41 = vld [vmem:[%s8463_s14 + $0x2a0] sm:$0xff] }
 0x3b8   : > { %3959 = vmatpush.msra.mxu1 %v5033_v59  ;;  %4079 = vmatpush.msra.mxu0 %v5081_v37  ;;  %v5055_v1 = vld [vmem:[%s8463_s14 + $0x228] sm:$0xff]  ;;  %v5018_v39 = vld [vmem:[%s8463_s14 + $0x100] sm:$0xff]  ;;  %v5053_v59 = vld [vmem:[%s8463_s14 + $0x218] sm:$0xff] }
 0x3b9   : > { %4039 = vmatpush.msra.mxu3 %v5065_v63  ;;  %4004 = vmatpush.msra.mxu2 %v5044_v35  ;;  %v5034_v5 = vld [vmem:[%s8463_s14 + $0x180] sm:$0xff]  ;;  %v5051_v17 = vld [vmem:[%s8463_s14 + $0x208] sm:$0xff]  ;;  %v5097_v28 = vld [vmem:[%s8465_s16 + $0xf8] sm:$0xff] }
 0x3ba   : > { %3960 = vmatpush.msra.mxu1 %v5032_v20  ;;  %4080 = vmatpush.msra.mxu0 %v5080_v27  ;;  %v5067_v20 = vld [vmem:[%s8463_s14 + $0x288] sm:$0xff]  ;;  %v4121_v37 = vld [vmem:[%s8465_s16 + $0x60] sm:$0xff]  ;;  %v5093_v63 = vld [vmem:[%s8465_s16 + $0xd8] sm:$0xff] }
 0x3bb   : > { %4040 = vmatpush.msra.mxu3 %v5064_v49  ;;  %4005 = vmatpush.msra.mxu2 %v5043_v57  ;;  %v5092_v49 = vld [vmem:[%s8465_s16 + $0xd0] sm:$0xff] }
 0x3bc   : > { %3961 = vmatpush.msra.mxu1 %v5031_v50  ;;  %4081 = vmatpush.msra.mxu0 %v5079_v10  ;;  %v4124_v50 = vld [vmem:[%s8465_s16 + $0x78] sm:$0xff] }
 0x3bd   : > { %4041 = vmatpush.msra.mxu3 %v5063_v21  ;;  %4006 = vmatpush.msra.mxu2 %v5042_v6  ;;  %v5091_v21 = vld [vmem:[%s8465_s16 + $0xc8] sm:$0xff] }
 0x3be   : > { %4992 = vmatmul.msk.f32.vlgmr.msrb.gmra.mxu1 %vm1349_vm2, %v3799_v9  ;;  %4082 = vmatpush.msra.mxu0 %v5078_v4  ;;  %v4123_v9 = vld [vmem:[%s8465_s16 + $0x70] sm:$0xff] }
 0x3bf   : > { %3962 = vmatpush.msra.mxu1 %v5030_v22  ;;  %4042 = vmatpush.msra.mxu3 %v5062_v60  ;;  %v5090_v60 = vld [vmem:[%s8465_s16 + $0xc0] sm:$0xff] }
 0x3c0   : > { %4083 = vmatpush.msra.mxu0 %v5077_v29  ;;  %4007 = vmatpush.msra.mxu2 %v5041_v48  ;;  %v4116_v48 = vld [vmem:[%s8465_s16 + $0x38] sm:$0xff] }
 0x3c1   : > { %3963 = vmatpush.msra.mxu1 %v5029_v55  ;;  %4043 = vmatpush.msra.mxu3 %v5061_v53  ;;  %v4120_v55 = vld [vmem:[%s8465_s16 + $0x58] sm:$0xff] }
 0x3c2   : > { %4084 = vmatpush.msra.mxu0 %v5076_v45  ;;  %4008 = vmatpush.msra.mxu2 %v5040_v33  ;;  %v5089_v45 = vld [vmem:[%s8465_s16 + $0xb8] sm:$0xff]  ;;  %v4115_v33 = vld [vmem:[%s8465_s16 + $0x30] sm:$0xff] }
 0x3c3   : > { %3964 = vmatpush.msra.mxu1 %v5028_v46  ;;  %4044 = vmatpush.msra.mxu3 %v5060_v42  ;;  %v4119_v46 = vld [vmem:[%s8465_s16 + $0x50] sm:$0xff] }
 0x3c4   : > { %4085 = vmatpush.msra.mxu0 %v5075_v13  ;;  %4009 = vmatpush.msra.mxu2 %v5039_v61  ;;  %v5088_v42 = vld [vmem:[%s8465_s16 + $0xb0] sm:$0xff] }
 0x3c5   : > { %3965 = vmatpush.msra.mxu1 %v5027_v38  ;;  %4045 = vmatpush.msra.mxu3 %v5059_v8  ;;  %v4118_v38 = vld [vmem:[%s8465_s16 + $0x48] sm:$0xff] }
 0x3c6   : > { %4086 = vmatpush.msra.mxu0 %v5074_v14  ;;  %4010 = vmatpush.msra.mxu2 %v5038_v24 }
 0x3c7   : > { %3966 = vmatpush.msra.mxu1 %v5026_v54  ;;  %4046 = vmatpush.msra.mxu3 %v5058_v58  ;;  %v4117_v54 = vld [vmem:[%s8465_s16 + $0x40] sm:$0xff] }
 0x3c8   : > { %4087 = vmatpush.msra.mxu0 %v5073_v19  ;;  %4011 = vmatpush.msra.mxu2 %v5037_v51  ;;  %v5087_v19 = vld [vmem:[%s8465_s16 + $0xa8] sm:$0xff]  ;;  %v5086_v51 = vld [vmem:[%s8465_s16 + $0xa0] sm:$0xff] }
 0x3c9   : > { %3967 = vmatpush.msra.mxu1 %v5025_v7  ;;  %4047 = vmatpush.msra.mxu3 %v5057_v32  ;;  %v5181_v7 = vld [vmem:[%s8462_s13] ss:$0 sm:$0xff]  ;;  %v4112_v32 = vld [vmem:[%s8465_s16 + $0x18] sm:$0xff] }
 0x3ca   : > { %4088 = vmatpush.msra.mxu0 %v5072_v34  ;;  %4012 = vmatpush.msra.mxu2 %v5036_v62  ;;  %v5113_v34 = vld [vmem:[%s8465_s16 + $0x178] sm:$0xff] }
 0x3cb   : > { %3968 = vmatpush.msra.mxu1 %v5024_v18  ;;  %4048 = vmatpush.msra.mxu3 %v5056_v26  ;;  %v5085_v62 = vld [vmem:[%s8465_s16 + $0x98] sm:$0xff]  ;;  %v4111_v26 = vld [vmem:[%s8465_s16 + $0x10] sm:$0xff] }
 0x3cc   : > { %4089 = vmatpush.msra.mxu0 %v5071_v12  ;;  %4013 = vmatpush.msra.mxu2 %v5035_v16  ;;  %v5112_v12 = vld [vmem:[%s8465_s16 + $0x170] sm:$0xff] }
 0x3cd   : > { %3969 = vmatpush.msra.mxu1 %v5023_v11  ;;  %4049 = vmatpush.msra.mxu3 %v5055_v1  ;;  %v4114_v11 = vld [vmem:[%s8465_s16 + $0x28] sm:$0xff]  ;;  %v5084_v16 = vld [vmem:[%s8465_s16 + $0x90] sm:$0xff] }
 0x3ce   : > { %4090 = vmatpush.msra.mxu0 %v5070_v41  ;;  %4014 = vmatpush.msra.mxu2 %v5034_v5  ;;  %v4110_v1 = vld [vmem:[%s8465_s16 + $0x8] sm:$0xff] }
 0x3cf   : > { %3970 = vmatpush.msra.mxu1 %v5022_v31  ;;  %4050 = vmatpush.msra.mxu3 %v5054_v56  ;;  %v5111_v41 = vld [vmem:[%s8465_s16 + $0x168] sm:$0xff]  ;;  %v4109_v56 = vld [vmem:[%s8465_s16] sm:$0xff] }
 0x3d0   : > { %4091 = vmatpush.msra.mxu0 %v5069_v40  ;;  %4165 = vmatpush.msrb.mxu2 %v4124_v50  ;;  %v5083_v5 = vld [vmem:[%s8465_s16 + $0x88] sm:$0xff]  ;;  %v5110_v40 = vld [vmem:[%s8465_s16 + $0x160] sm:$0xff]  ;;  %v5108_v50 = vld [vmem:[%s8465_s16 + $0x150] sm:$0xff] }
 0x3d1   : > { %3971 = vmatpush.msra.mxu1 %v5021_v43  ;;  %4051 = vmatpush.msra.mxu3 %v5053_v59  ;;  %v4113_v43 = vld [vmem:[%s8465_s16 + $0x20] sm:$0xff] }
 0x3d2   : > { %4092 = vmatpush.msra.mxu0 %v5068_v2  ;;  %4166 = vmatpush.msrb.mxu2 %v4123_v9  ;;  %v5126_v59 = vld [vmem:[%s8465_s16 + $0x1e0] sm:$0xff]  ;;  %v5161_v2 = vld [vmem:[%s8465_s16 + $0x2f8] sm:$0xff]  ;;  %v5144_v9 = vld [vmem:[%s8465_s16 + $0x270] sm:$0xff] }
 0x3d3   : > { %3972 = vmatpush.msra.mxu1 %v5020_v0  ;;  %4052 = vmatpush.msra.mxu3 %v5052_v3  ;;  %v5129_v0 = vld [vmem:[%s8465_s16 + $0x1f8] sm:$0xff]  ;;  %v5082_v3 = vld [vmem:[%s8465_s16 + $0x80] sm:$0xff] }
 0x3d4   : > { %4093 = vmatpush.msra.mxu0 %v5067_v20  ;;  %4167 = vmatpush.msrb.mxu2 %v4122_v15  ;;  %v5109_v20 = vld [vmem:[%s8465_s16 + $0x158] sm:$0xff]  ;;  %v5107_v15 = vld [vmem:[%s8465_s16 + $0x148] sm:$0xff] }
 0x3d5   : > { %3973 = vmatpush.msra.mxu1 %v5019_v52  ;;  %4053 = vmatpush.msra.mxu3 %v5051_v17  ;;  %v5128_v52 = vld [vmem:[%s8465_s16 + $0x1f0] sm:$0xff]  ;;  %v5125_v17 = vld [vmem:[%s8465_s16 + $0x1d8] sm:$0xff] }
 0x3d6   : > { %4094 = vmatpush.msra.mxu0 %v5066_v30  ;;  %4168 = vmatpush.msrb.mxu2 %v4121_v37  ;;  %v5145_v30 = vld [vmem:[%s8465_s16 + $0x278] sm:$0xff]  ;;  %v5158_v37 = vld [vmem:[%s8465_s16 + $0x2e0] sm:$0xff] }
 0x3d7   : > { %3974 = vmatpush.msra.mxu1 %v5018_v39  ;;  %4054 = vmatpush.msra.mxu3 %v5050_v36  ;;  %v5127_v39 = vld [vmem:[%s8465_s16 + $0x1e8] sm:$0xff]  ;;  %v5160_v36 = vld [vmem:[%s8465_s16 + $0x2f0] sm:$0xff] }
 0x3d8   : > { %4169 = vmatpush.msrb.mxu2 %v4120_v55  ;;  %v5122_v55 = vld [vmem:[%s8465_s16 + $0x1c0] sm:$0xff] }
 0x3d9   : > { %4145 = vmatpush.msrb.mxu1 %v5097_v28  ;;  %v5124_v28 = vld [vmem:[%s8465_s16 + $0x1d0] sm:$0xff] }
 0x3da   : > { %4170 = vmatpush.msrb.mxu2 %v4119_v46  ;;  %v5121_v46 = vld [vmem:[%s8465_s16 + $0x1b8] sm:$0xff] }
 0x3db   : > { %4146 = vmatpush.msrb.mxu1 %v5096_v25  ;;  %v5159_v25 = vld [vmem:[%s8465_s16 + $0x2e8] sm:$0xff] }
 0x3dc   : > { %4171 = vmatpush.msrb.mxu2 %v4118_v38  ;;  %v5120_v38 = vld [vmem:[%s8465_s16 + $0x1b0] sm:$0xff] }
 0x3dd   : > { %4147 = vmatpush.msrb.mxu1 %v5095_v23  ;;  %v5143_v23 = vld [vmem:[%s8465_s16 + $0x268] sm:$0xff] }
 0x3de   : > { %4172 = vmatpush.msrb.mxu2 %v4117_v54  ;;  %v5103_v54 = vld [vmem:[%s8465_s16 + $0x128] sm:$0xff] }
 0x3df   : > { %4148 = vmatpush.msrb.mxu1 %v5094_v47  ;;  %v5106_v47 = vld [vmem:[%s8465_s16 + $0x140] sm:$0xff] }
 0x3e0   : > { %4173 = vmatpush.msrb.mxu2 %v4116_v48  ;;  %v5118_v48 = vld [vmem:[%s8465_s16 + $0x1a0] sm:$0xff] }
 0x3e1   : > { %4149 = vmatpush.msrb.mxu1 %v5093_v63  ;;  %v5157_v63 = vld [vmem:[%s8465_s16 + $0x2d8] sm:$0xff] }
 0x3e2   : > { %4174 = vmatpush.msrb.mxu2 %v4115_v33  ;;  %v5117_v33 = vld [vmem:[%s8465_s16 + $0x198] sm:$0xff] }
 0x3e3   : > { %4150 = vmatpush.msrb.mxu1 %v5092_v49  ;;  %v5156_v49 = vld [vmem:[%s8465_s16 + $0x2d0] sm:$0xff] }
 0x3e4   : > { %4175 = vmatpush.msrb.mxu2 %v4114_v11  ;;  %v5100_v11 = vld [vmem:[%s8465_s16 + $0x110] sm:$0xff] }
 0x3e5   : > { %4151 = vmatpush.msrb.mxu1 %v5091_v21  ;;  %v5155_v21 = vld [vmem:[%s8465_s16 + $0x2c8] sm:$0xff] }
 0x3e6   : > { %4176 = vmatpush.msrb.mxu2 %v4113_v43  ;;  %v5098_v43 = vld [vmem:[%s8465_s16 + $0x100] sm:$0xff] }
 0x3e7   : > { %4152 = vmatpush.msrb.mxu1 %v5090_v60  ;;  %v5139_v60 = vld [vmem:[%s8465_s16 + $0x248] sm:$0xff] }
 0x3e8   : > { %4177 = vmatpush.msrb.mxu2 %v4112_v32  ;;  %v5134_v32 = vld [vmem:[%s8465_s16 + $0x220] sm:$0xff] }
 0x3e9   : > { %4153 = vmatpush.msrb.mxu1 %v5089_v45  ;;  %v5153_v45 = vld [vmem:[%s8465_s16 + $0x2b8] sm:$0xff] }
 0x3ea   : > { %4178 = vmatpush.msrb.mxu2 %v4111_v26  ;;  %v5132_v26 = vld [vmem:[%s8465_s16 + $0x210] sm:$0xff] }
 0x3eb   : > { %4154 = vmatpush.msrb.mxu1 %v5088_v42  ;;  %v5137_v42 = vld [vmem:[%s8465_s16 + $0x238] sm:$0xff] }
 0x3ec   : > { %4179 = vmatpush.msrb.mxu2 %v4110_v1 }
 0x3ed   : > { %4155 = vmatpush.msrb.mxu1 %v5087_v19  ;;  %v5150_v19 = vld [vmem:[%s8465_s16 + $0x2a0] sm:$0xff] }
 0x3ee   : > { %4180 = vmatpush.msrb.mxu2 %v4109_v56 }
 0x3ef   : > { %4156 = vmatpush.msrb.mxu1 %v5086_v51  ;;  %v5114_v51 = vld [vmem:[%s8465_s16 + $0x180] sm:$0xff] }
 0x3f1   : > { %4157 = vmatpush.msrb.mxu1 %v5085_v62  ;;  %v5148_v62 = vld [vmem:[%s8465_s16 + $0x290] sm:$0xff] }
 0x3f3   : > { %4158 = vmatpush.msrb.mxu1 %v5084_v16  ;;  %v5146_v16 = vld [vmem:[%s8465_s16 + $0x280] sm:$0xff] }
 0x3f5   : > { %4159 = vmatpush.msrb.mxu1 %v5083_v5  ;;  %v5130_v5 = vld [vmem:[%s8465_s16 + $0x200] sm:$0xff] }
 0x3f7   : > { %4160 = vmatpush.msrb.mxu1 %v5082_v3 }
 0x42e   : > { %v3715_v44 = vpop.f32.mrf.mxu2 }
 0x433   : > { %v3693_v22 = vpop.f32.mrf.mxu1 }
 0x434   : > { %v3716_v27 = vadd.f32 %v3715_v44, %v3693_v22  ;;  %v3784_v57 = vpop.f32.mrf.mxu0  ;;  %v5123_v22 = vld [vmem:[%s8465_s16 + $0x1c8] sm:$0xff]  ;;  %v5142_v44 = vld [vmem:[%s8465_s16 + $0x260] sm:$0xff] }
 0x439   : > { %v3749_v35 = vpop.f32.mrf.mxu3 }
 0x43a   : > { %v3752_v10 = vadd.f32 %v3749_v35, %v3716_v27  ;;  %v3854_v53 = vpop.f32.mrf.mxu2  ;;  %v5105_v27 = vld [vmem:[%s8465_s16 + $0x138] sm:$0xff] }
 0x43b   : > { %v3819_v6 = vpop.f32.mrf.mxu1  ;;  %v5141_v35 = vld [vmem:[%s8465_s16 + $0x258] sm:$0xff] }
 0x43c   : > { %v3787_v4 = vadd.f32 %v3784_v57, %v3752_v10  ;;  %v5104_v10 = vld [vmem:[%s8465_s16 + $0x130] sm:$0xff] }
 0x43d   : > { %v5140_v57 = vld [vmem:[%s8465_s16 + $0x250] sm:$0xff] }
 0x43e   : > { %v3822_v29 = vadd.f32 %v3819_v6, %v3787_v4  ;;  %v5192_v4 = vmov 0.0   ;;  %v5119_v6 = vld [vmem:[%s8465_s16 + $0x1a8] sm:$0xff] }
 0x43f   : > { %4106 = vst [vmem:[#allocation4] sm:$0x7f] %v5192_v4 }
 0x440   : > { %v3857_v18 = vadd.f32 %v3854_v53, %v3822_v29  ;;  %v5154_v29 = vld [vmem:[%s8465_s16 + $0x2c0] sm:$0xff] }
 0x441   : > { %v5138_v53 = vld [vmem:[%s8465_s16 + $0x240] sm:$0xff] }
 0x442   : > { %v3862_v13 = vadd.f32 %v5181_v7, %v3857_v18  ;;  %v5102_v7 = vld [vmem:[%s8465_s16 + $0x120] sm:$0xff]  ;;  %v5101_v18 = vld [vmem:[%s8465_s16 + $0x118] sm:$0xff] }
 0x444   : > { %v3863_v61 = vmax.f32 %v3862_v13, 0.0  ;;  %v5152_v13 = vld [vmem:[%s8465_s16 + $0x2b0] sm:$0xff] }
 0x446   : > { %3936 = vmatmul.f32.vlgmr.msrb.gmra.mxu0 %v3863_v61  ;;  %v3898_v8 = vrot.slane %v3863_v61, 1  ;;  %v3957_v14 = vrot.slane %v3863_v61, 2  ;;  %v3997_v31 = vrot.slane %v3863_v61, 3  ;;  %v4077_v24 = vrot.slane %v3863_v61, 5 }
 0x447   : > { %v4037_v58 = vrot.slane %v3863_v61, 4  ;;  %4244 = vmatpush.msrb.mxu0 %v5129_v0  ;;  %v5116_v61 = vld [vmem:[%s8465_s16 + $0x190] sm:$0xff]  ;;  %v5133_v0 = vld [vmem:[%s8465_s16 + $0x218] sm:$0xff] }
 0x448   : > { %3916 = vmatmul.f32.vlgmr.msrb.gmra.mxu3 %v3898_v8  ;;  %3975 = vmatmul.f32.vlgmr.msra.gmra.mxu1 %v3957_v14  ;;  %v5136_v8 = vld [vmem:[%s8465_s16 + $0x230] sm:$0xff]  ;;  %v5151_v14 = vld [vmem:[%s8465_s16 + $0x2a8] sm:$0xff] }
 0x449   : > { %4015 = vmatmul.f32.vlgmr.msra.gmra.mxu2 %v3997_v31  ;;  %4204 = vmatpush.msrb.mxu3 %v5113_v34  ;;  %v5099_v31 = vld [vmem:[%s8465_s16 + $0x108] sm:$0xff]  ;;  %v5149_v34 = vld [vmem:[%s8465_s16 + $0x298] sm:$0xff] }
 0x44a   : > { %4245 = vmatpush.msrb.mxu0 %v5128_v52  ;;  %4324 = vmatpush.msra.mxu2 %v5161_v2  ;;  %v5131_v52 = vld [vmem:[%s8465_s16 + $0x208] sm:$0xff] }
 0x44b   : > { %4205 = vmatpush.msrb.mxu3 %v5112_v12  ;;  %4284 = vmatpush.msra.mxu1 %v5145_v30  ;;  %v5147_v12 = vld [vmem:[%s8465_s16 + $0x288] sm:$0xff] }
 0x44c   : > { %4246 = vmatpush.msrb.mxu0 %v5127_v39  ;;  %4325 = vmatpush.msra.mxu2 %v5160_v36 }
 0x44d   : > { %4206 = vmatpush.msrb.mxu3 %v5111_v41  ;;  %4285 = vmatpush.msra.mxu1 %v5144_v9 }
 0x44e   : > { %4095 = vmatmul.f32.vlgmr.msra.gmra.mxu0 %v4077_v24  ;;  %4326 = vmatpush.msra.mxu2 %v5159_v25  ;;  %v5115_v24 = vld [vmem:[%s8465_s16 + $0x188] sm:$0xff] }
 0x44f   : > { %4207 = vmatpush.msrb.mxu3 %v5110_v40  ;;  %4247 = vmatpush.msrb.mxu0 %v5126_v59 }
 0x450   : > { %4055 = vmatmul.f32.vlgmr.msra.gmra.mxu3 %v4037_v58  ;;  %4286 = vmatpush.msra.mxu1 %v5143_v23  ;;  %v5135_v58 = vld [vmem:[%s8465_s16 + $0x228] sm:$0xff] }
 0x451   : > { %4208 = vmatpush.msrb.mxu3 %v5109_v20  ;;  %4248 = vmatpush.msrb.mxu0 %v5125_v17  ;;  %v5182_v17 = vld [vmem:[%s8464_s15] ss:$0 sm:$0xff] }
 0x452   : > { %4327 = vmatpush.msra.mxu2 %v5158_v37  ;;  %4287 = vmatpush.msra.mxu1 %v5142_v44 }
 0x453   : > { %4209 = vmatpush.msrb.mxu3 %v5108_v50  ;;  %4249 = vmatpush.msrb.mxu0 %v5124_v28 }
 0x454   : > { %4328 = vmatpush.msra.mxu2 %v5157_v63  ;;  %4288 = vmatpush.msra.mxu1 %v5141_v35 }
 0x455   : > { %4210 = vmatpush.msrb.mxu3 %v5107_v15  ;;  %4250 = vmatpush.msrb.mxu0 %v5123_v22 }
 0x456   : > { %4329 = vmatpush.msra.mxu2 %v5156_v49  ;;  %4289 = vmatpush.msra.mxu1 %v5140_v57 }
 0x457   : > { %4211 = vmatpush.msrb.mxu3 %v5106_v47  ;;  %4251 = vmatpush.msrb.mxu0 %v5122_v55 }
 0x458   : > { %4330 = vmatpush.msra.mxu2 %v5155_v21  ;;  %4290 = vmatpush.msra.mxu1 %v5139_v60 }
 0x459   : > { %4212 = vmatpush.msrb.mxu3 %v5105_v27  ;;  %4252 = vmatpush.msrb.mxu0 %v5121_v46 }
 0x45a   : > { %4331 = vmatpush.msra.mxu2 %v5154_v29  ;;  %4291 = vmatpush.msra.mxu1 %v5138_v53 }
 0x45b   : > { %4213 = vmatpush.msrb.mxu3 %v5104_v10  ;;  %4253 = vmatpush.msrb.mxu0 %v5120_v38  ;;  %v5183_v38 = vld [vmem:[%s8466_s17] ss:$0 sm:$0xff] }
 0x45c   : > { %4332 = vmatpush.msra.mxu2 %v5153_v45  ;;  %4292 = vmatpush.msra.mxu1 %v5137_v42 }
 0x45d   : > { %4214 = vmatpush.msrb.mxu3 %v5103_v54  ;;  %4254 = vmatpush.msrb.mxu0 %v5119_v6 }
 0x45e   : > { %4333 = vmatpush.msra.mxu2 %v5152_v13  ;;  %4293 = vmatpush.msra.mxu1 %v5136_v8 }
 0x45f   : > { %4215 = vmatpush.msrb.mxu3 %v5102_v7  ;;  %4255 = vmatpush.msrb.mxu0 %v5118_v48 }
 0x460   : > { %4334 = vmatpush.msra.mxu2 %v5151_v14  ;;  %4294 = vmatpush.msra.mxu1 %v5135_v58 }
 0x461   : > { %4216 = vmatpush.msrb.mxu3 %v5101_v18  ;;  %4256 = vmatpush.msrb.mxu0 %v5117_v33 }
 0x462   : > { %4335 = vmatpush.msra.mxu2 %v5150_v19  ;;  %4295 = vmatpush.msra.mxu1 %v5134_v32 }
 0x463   : > { %4217 = vmatpush.msrb.mxu3 %v5100_v11  ;;  %4257 = vmatpush.msrb.mxu0 %v5116_v61 }
 0x464   : > { %4336 = vmatpush.msra.mxu2 %v5149_v34  ;;  %4296 = vmatpush.msra.mxu1 %v5133_v0 }
 0x465   : > { %4218 = vmatpush.msrb.mxu3 %v5099_v31  ;;  %4258 = vmatpush.msrb.mxu0 %v5115_v24 }
 0x466   : > { %4337 = vmatpush.msra.mxu2 %v5148_v62  ;;  %4297 = vmatpush.msra.mxu1 %v5132_v26 }
 0x467   : > { %4219 = vmatpush.msrb.mxu3 %v5098_v43  ;;  %4259 = vmatpush.msrb.mxu0 %v5114_v51 }
 0x468   : > { %4338 = vmatpush.msra.mxu2 %v5147_v12  ;;  %4298 = vmatpush.msra.mxu1 %v5131_v52 }
 0x46a   : > { %4339 = vmatpush.msra.mxu2 %v5146_v16  ;;  %4299 = vmatpush.msra.mxu1 %v5130_v5 }
 0x4c3   : > { %v3937_v1 = vpop.f32.mrf.mxu0 }
 0x4c5   : > { %v3976_v56 = vpop.f32.mrf.mxu1 }
 0x4cb   : > { %v3917_v41 = vpop.f32.mrf.mxu3  ;;  %v4096_v30 = vpop.f32.mrf.mxu0 }
 0x4cc   : > { %v3938_v39 = vadd.f32 %v3937_v1, %v3917_v41  ;;  %v4016_v59 = vpop.f32.mrf.mxu2 }
 0x4ce   : > { %v3979_v40 = vadd.f32 %v3976_v56, %v3938_v39 }
 0x4d0   : > { %v4019_v2 = vadd.f32 %v4016_v59, %v3979_v40 }
 0x4d3   : > { %v4056_v3 = vpop.f32.mrf.mxu3 }
 0x4d4   : > { %v4059_v20 = vadd.f32 %v4056_v3, %v4019_v2 }
 0x4d6   : > { %v4099_v36 = vadd.f32 %v4096_v30, %v4059_v20 }
 0x4d8   : > { %v4104_v50 = vadd.f32 %v5182_v17, %v4099_v36 }
 0x4da   : > { %v4105_v28 = vmax.f32 %v4104_v50, 0.0 }
 0x4dc   : > { %4107 = vst [vmem:[#allocation4 + $0x2] sm:$0x7] %v4105_v28 }
 0x4e3   : > { %v4108_v9 = vld [vmem:[#allocation4] sm:$0x7f] }
 0x4e4   : > { %4181 = vmatmul.f32.vlgmr.msrb.gmra.mxu2 %v4108_v9  ;;  %v4143_v25 = vrot.slane %v4108_v9, 1  ;;  %v4202_v15 = vrot.slane %v4108_v9, 2  ;;  %v4242_v22 = vrot.slane %v4108_v9, 3  ;;  %v4322_v23 = vrot.slane %v4108_v9, 5 }
 0x4e5   : > { %v4282_v37 = vrot.slane %v4108_v9, 4 }
 0x4e6   : > { %4161 = vmatmul.f32.vlgmr.msrb.gmra.mxu1 %v4143_v25  ;;  %4220 = vmatmul.f32.vlgmr.msrb.gmra.mxu3 %v4202_v15 }
 0x4e7   : > { %4260 = vmatmul.f32.vlgmr.msrb.gmra.mxu0 %v4242_v22 }
 0x4ec   : > { %4340 = vmatmul.f32.vlgmr.msra.gmra.mxu2 %v4322_v23 }
 0x4ee   : > { %4300 = vmatmul.f32.vlgmr.msra.gmra.mxu1 %v4282_v37 }
 0x563   : > { %v4162_v47 = vpop.f32.mrf.mxu1 }
 0x564   : > { %v4261_v46 = vpop.f32.mrf.mxu0 }
 0x567   : > { %v4182_v55 = vpop.f32.mrf.mxu2 }
 0x568   : > { %v4183_v44 = vadd.f32 %v4182_v55, %v4162_v47 }
 0x569   : > { %v4221_v63 = vpop.f32.mrf.mxu3 }
 0x56a   : > { %v4224_v27 = vadd.f32 %v4221_v63, %v4183_v44 }
 0x56b   : > { %v4301_v49 = vpop.f32.mrf.mxu1 }
 0x56c   : > { %v4264_v35 = vadd.f32 %v4261_v46, %v4224_v27 }
 0x56e   : > { %v4304_v10 = vadd.f32 %v4301_v49, %v4264_v35 }
 0x56f   : > { %v4341_v57 = vpop.f32.mrf.mxu2 }
 0x570   : > { %v4344_v21 = vadd.f32 %v4341_v57, %v4304_v10 }
 0x572   : > { %v4349_v4 = vadd.f32 %v5183_v38, %v4344_v21 }
 0x574   : > { %v4350_v54 = vmax.f32 %v4349_v4, 0.0 }
 0x576   : > { %4351 = vst [vmem:[#allocation3] sm:$0x3] %v4350_v54 }
 0x57d   : > { %v4352_v6 = vld [vmem:[#allocation3] ss:$2 sm:$0x1]  ;;  %v4354_v60 = vld [vmem:[#allocation3 + $0x1] ss:$2 sm:$0x1] }
 0x57e   : > { %v4355_v29 = vmax.f32 %v4352_v6, %v4354_v60 }
 0x580   : > { %4356 = vst [vmem:[%s631_s20] sm:$0x1] %v4355_v29 }
 0x581 PF: > { %s30_s0 = sadd.s32 1, %s5190_s0  }
 0x582   : > { %p27_p4 = scmp.ge.s32.totalorder %s30_s0, 4  }
 0x584   :  { %29 = sbr.rel (!%p27_p4) target bundleno = 5 (0x5), region = 191 }

</bundles_post_ra>
